<compile_context>
chip_gen: v7x
topology: tpu7x:2x2x1
jax: 0.10.0
libtpu: 0.0.40
codegen_flags: <defaults>
</compile_context>

<pallas_src>
import functools

import jax
import jax.numpy as jnp
from jax import lax
from jax.experimental import pallas as pl
from jax.experimental.pallas import tpu as pltpu

LANE = 128


def _round_up(x, m):
    return ((x + m - 1) // m) * m


def _sam_kernel(xin_hbm, w12_ref, w3_ref, out_ref, xbuf, dma_sem, *,
                TH, H, W, C, Cp, k, p, n_tiles, im2col_12):
    """One (batch, row-tile) step of SAM.

    xin_hbm : (B, H+4p, W+2p, Cp) packed input; x -> lanes [0:C],
              x_img -> lanes [C:C+3], zeros elsewhere.  HBM (pl.ANY).
    w12_ref : (Cp, Cp) lane-banded fused conv1|conv2 weights   (im2col path)
              or (k, k, Cp, Cp) per-tap fused weights           (fallback).
    w3_ref  : (Cp, Cp) lane-banded conv3 weights + bias row.
    out_ref : (1, TH, W, Cp) packed output tile: lanes [0:C]=x1, [C:C+3]=img.
    xbuf    : VMEM (2, TH+4p, W+2p, Cp) double-buffered halo window.
    dma_sem : DMA semaphores, shape (2,).
    """
    b = pl.program_id(0)
    t = pl.program_id(1)

    rows_in = TH + 4 * p            # x rows needed (conv12 halo + conv3 halo)
    ext = TH + 2 * p                # img rows produced (incl. conv3 halo)
    f32 = jnp.float32

    # ----------------- double-buffered manual halo DMA -----------------
    def fetch(bb, tt, slot):
        row0 = pl.multiple_of(tt * TH, TH)
        return pltpu.make_async_copy(
            xin_hbm.at[bb, pl.ds(row0, rows_in)], xbuf.at[slot],
            dma_sem.at[slot])

    @pl.when(t == 0)                 # prime slot 0 at the start of each image
    def _():
        fetch(b, t, 0).start()

    @pl.when(t + 1 < n_tiles)        # prefetch next row tile before waiting
    def _():
        fetch(b, t + 1, (t + 1) % 2).start()

    slot = t % 2
    fetch(b, t, slot).wait()
    xcur = xbuf.at[slot]             # (rows_in, W+2p, Cp) VMEM view

    cdims = (((2,), (0,)), ((), ()))  # contract the channel (lane) dim

    # ----------------- fused conv1 | conv2 -----------------
    if im2col_12:
        # Lane-banded im2col: tap (ky,kx) occupies lanes
        # [tap*(C+3), tap*(C+3)+C); the +3 gap absorbs the packed x_img lanes
        # (their weight rows are zero).  One K=Cp matmul instead of k*k.
        xcol = None
        for ky in range(k):
            for kx in range(k):
                base = (ky * k + kx) * (C + 3)
                patch = xcur[ky:ky + ext, kx:kx + W, :]            # (ext,W,Cp)
                shifted = pltpu.roll(patch, base, 2) if base else patch
                xcol = shifted if xcol is None else xcol + shifted
        acc12 = lax.dot_general(xcol, w12_ref[...], cdims,
                                preferred_element_type=f32)         # (ext,W,Cp)
    else:
        # Fallback for large n_feat: per-tap fused matmuls.
        # TODO(synk): fold kx taps / pair taps to K=256 on v6e/v7x here.
        acc12 = jnp.zeros((ext, W, Cp), f32)
        for ky in range(k):
            for kx in range(k):
                patch = xcur[ky:ky + ext, kx:kx + W, :]
                acc12 = acc12 + lax.dot_general(
                    patch, w12_ref[ky, kx], cdims,
                    preferred_element_type=f32)
    # acc12 lanes: [0:C] = conv1(x), [C:C+3] = conv2(x), rest = 0.

    # ---------- img = conv2(x) + x_img on the extended rows ----------
    # Build a slab with img in lanes [0:3] and zeros elsewhere so conv3's
    # im2col is pure lane rolls; rows outside the image are zeroed (SAME pad).
    x_ext = xcur[p:p + ext, p:p + W, :].astype(f32)                 # (ext,W,Cp)
    conv2_lo = pltpu.roll(acc12, Cp - C, 2)                         # conv2 -> [0:3]
    ximg_lo = pltpu.roll(x_ext, Cp - C, 2)                          # x_img -> [0:3]
    lane = lax.broadcasted_iota(jnp.int32, (1, 1, Cp), 2)
    row = (t * TH - p) + lax.broadcasted_iota(jnp.int32, (ext, 1, 1), 0)
    keep = jnp.logical_and(lane < 3,
                           jnp.logical_and(row >= 0, row < H))      # (ext,1,Cp)
    img_lo = jnp.where(keep, conv2_lo + ximg_lo, 0.0)               # (ext,W,Cp)

    # ---------- conv3: one lane-banded im2col matmul ----------
    if p > 0:
        zcol = jnp.zeros((ext, p, Cp), f32)
        imgp = jnp.concatenate([zcol, img_lo, zcol], axis=1)        # (ext,W+2p,Cp)
    else:
        imgp = img_lo
    icol = None
    for ky in range(k):
        for kx in range(k):
            base = (ky * k + kx) * 3
            piece = imgp[ky:ky + TH, kx:kx + W, :]                  # (TH,W,Cp)
            piece = pltpu.roll(piece, base, 2) if base else piece
            icol = piece if icol is None else icol + piece
    # Bias lane: drives the sigmoid gate to exactly 1.0 on lanes [C:C+3] so
    # the epilogue FMA passes img straight through.
    icol = icol + jnp.where(lane == k * k * 3, 1.0, 0.0).astype(f32)
    acc3 = lax.dot_general(icol.astype(w3_ref.dtype), w3_ref[...], cdims,
                           preferred_element_type=f32)              # (TH,W,Cp)
    # acc3 lanes: [0:C] = conv3(img), [C:C+3] = 30.0 (bias), rest = 0.

    # ---------- epilogue: one full-width FMA produces both outputs ----------
    gate = jax.nn.sigmoid(acc3)                                     # EUP
    x_center = x_ext[p:p + TH]                                      # (TH,W,Cp)
    out = acc12[p:p + TH] * gate + x_center
    # lanes [0:C]   = conv1*sigmoid(conv3) + x      (= x1)
    # lanes [C:C+3] = conv2*1.0            + x_img  (= img)
    out_ref[0] = out.astype(out_ref.dtype)


def sam_forward(x, x_img, w1, w2, w3, *, tile_rows=None, vmem_limit_bytes=None):
    """SAM forward.  x: (B,H,W,C) NHWC; x_img: (B,H,W,3); weights HWIO.

    Returns (x1, img).  (Downstream consumers could keep the packed padded
    output and skip the final channel slices.)
    """
    B, H, W, C = x.shape
    k = w1.shape[0]
    p = k // 2
    dt = x.dtype

    Cp = _round_up(C + 3, LANE)          # x, x_img and pad share one lane block
    assert k * k * 3 + 1 <= Cp, "conv3 im2col path needs kernel_size <= 6"
    im2col_12 = (k * k * (C + 3) <= Cp)  # small n_feat -> single conv12 matmul

    # ---- generation-aware VMEM limit (~48 MiB on v7x, ~96 MiB on v5e/v6e)
    if vmem_limit_bytes is None:
        cap = 128 * 1024 * 1024
        try:
            get_info = getattr(pltpu, "get_tpu_info", None)
            if get_info is not None:
                cap = int(getattr(get_info(), "vmem_capacity_bytes", cap))
        except Exception:
            pass
        vmem_limit_bytes = min(3 * cap // 4, 100 * 1024 * 1024)

    itemsize = jnp.dtype(dt).itemsize
    Win = W + 2 * p

    # ---- row tile: largest multiple of 8 dividing H that fits the budget
    def vmem_estimate(th):
        rows_in, ext = th + 4 * p, th + 2 * p
        window = 2 * rows_in * Win * Cp * itemsize       # double-buffered input
        slabs = (3 * ext + 3 * th) * W * Cp * 4          # f32 working slabs
        outs = 2 * th * W * Cp * itemsize                # pipelined out blocks
        return window + slabs + outs

    if tile_rows is None:
        budget = max(vmem_limit_bytes // 2, 4 * 1024 * 1024)
        cand = [d for d in range(8, H + 1, 8) if H % d == 0] or [H]
        fit = [d for d in cand if vmem_estimate(d) <= budget]
        tile_rows = max(fit) if fit else cand[0]
    TH = tile_rows
    assert H % TH == 0, "tile_rows must divide H"
    n_tiles = H // TH

    Hin = H + 4 * p

    # ---- pre-pack: x -> lanes [0:C], x_img -> lanes [C:C+3], spatial halo 0.
    xin = jnp.zeros((B, Hin, Win, Cp), dt)
    xin = xin.at[:, 2 * p:2 * p + H, p:p + W, :C].set(x)
    xin = xin.at[:, 2 * p:2 * p + H, p:p + W, C:C + 3].set(x_img.astype(dt))

    # ---- fused conv1|conv2 weights
    if im2col_12:
        w12 = jnp.zeros((Cp, Cp), dt)
        for ky in range(k):
            for kx in range(k):
                base = (ky * k + kx) * (C + 3)
                w12 = w12.at[base:base + C, :C].set(w1[ky, kx].astype(dt))
                w12 = w12.at[base:base + C, C:C + 3].set(w2[ky, kx].astype(dt))
        w12_spec = pl.BlockSpec((Cp, Cp), lambda b, t: (0, 0))
    else:
        w12 = jnp.zeros((k, k, Cp, Cp), dt)
        w12 = w12.at[:, :, :C, :C].set(w1.astype(dt))
        w12 = w12.at[:, :, :C, C:C + 3].set(w2.astype(dt))
        w12_spec = pl.BlockSpec((k, k, Cp, Cp), lambda b, t: (0, 0, 0, 0))

    # ---- lane-banded conv3 weights + bias row (sigmoid saturation trick)
    w3p = jnp.zeros((Cp, Cp), dt)
    for ky in range(k):
        for kx in range(k):
            base = (ky * k + kx) * 3
            w3p = w3p.at[base:base + 3, :C].set(w3[ky, kx].astype(dt))
    w3p = w3p.at[k * k * 3, C:C + 3].set(30.0)

    kernel = functools.partial(
        _sam_kernel, TH=TH, H=H, W=W, C=C, Cp=Cp, k=k, p=p,
        n_tiles=n_tiles, im2col_12=im2col_12)

    out = pl.pallas_call(
        kernel,
        out_shape=jax.ShapeDtypeStruct((B, H, W, Cp), dt),
        grid_spec=pltpu.PrefetchScalarGridSpec(
            num_scalar_prefetch=0,
            grid=(B, n_tiles),
            in_specs=[
                pl.BlockSpec(memory_space=pl.ANY),         # packed input (HBM)
                w12_spec,
                pl.BlockSpec((Cp, Cp), lambda b, t: (0, 0)),
            ],
            out_specs=pl.BlockSpec((1, TH, W, Cp), lambda b, t: (b, t, 0, 0)),
            scratch_shapes=[
                pltpu.VMEM((2, TH + 4 * p, Win, Cp), dt),  # 2-deep halo window
                pltpu.SemaphoreType.DMA((2,)),
            ],
        ),
        compiler_params=pltpu.CompilerParams(
            # The row-tile axis must stay sequential for the cross-step DMA
            # prefetch chain; the batch axis stays parallel (v7x megacore).
            dimension_semantics=("parallel", "arbitrary"),
            vmem_limit_bytes=vmem_limit_bytes,
        ),
    )(xin, w12, w3p)

    return out[..., :C], out[..., C:C + 3]


def sam_reference(x, x_img, w1, w2, w3):
    """Pure-JAX reference (lax conv) for correctness checking."""
    dn = ('NHWC', 'HWIO', 'NHWC')
    c1 = lax.conv_general_dilated(x, w1, (1, 1), 'SAME', dimension_numbers=dn)
    c2 = lax.conv_general_dilated(x, w2, (1, 1), 'SAME', dimension_numbers=dn)
    img = c2 + x_img
    c3 = lax.conv_general_dilated(img, w3, (1, 1), 'SAME', dimension_numbers=dn)
    x2 = jax.nn.sigmoid(c3)
    return c1 * x2 + x, img


if __name__ == "__main__":
    key = jax.random.PRNGKey(0)
    B, C, H, W = 2, 4, 16, 16        # n_feat=4
    ksz = 3                          # kernel_size=3, bias=False

    k1, k2, k3, k4, k5 = jax.random.split(key, 5)
    # Construct in NCHW (matching the PyTorch convention), then transpose.
    x_nchw = jax.random.normal(k1, (B, C, H, W), jnp.float32)
    ximg_nchw = jax.random.normal(k2, (B, 3, H, W), jnp.float32)

    # Deterministic synthetic weights (HWIO).
    w1 = jax.random.normal(k3, (ksz, ksz, C, C), jnp.float32) * 0.1
    w2 = jax.random.normal(k4, (ksz, ksz, C, 3), jnp.float32) * 0.1
    w3 = jax.random.normal(k5, (ksz, ksz, 3, C), jnp.float32) * 0.1

    x = jnp.transpose(x_nchw, (0, 2, 3, 1))       # NHWC
    x_img = jnp.transpose(ximg_nchw, (0, 2, 3, 1))

    # tile_rows=8 -> 2 row tiles per image so the double-buffered DMA path
    # (prime + prefetch-next + wait) is actually exercised.
    x1_out, img_out = sam_forward(x, x_img, w1, w2, w3, tile_rows=8)
    jax.block_until_ready((x1_out, img_out))

    x1_gold, img_gold = sam_reference(x, x_img, w1, w2, w3)
    assert jnp.allclose(x1_out, x1_gold, atol=1e-4, rtol=1e-4), "x1 mismatch"
    assert jnp.allclose(img_out, img_gold, atol=1e-4, rtol=1e-4), "img mismatch"

    print("KERNEL_OK")
</pallas_src>

<mosaic_0001>
module attributes {stable_mosaic.version = 11 : i64} {
  func.func @_sam_kernel(%arg0: i32, %arg1: i32, %arg2: memref<2x20x18x128xf32, #tpu.memory_space<any>>, %arg3: memref<128x128xf32, #tpu.memory_space<vmem>>, %arg4: memref<128x128xf32, #tpu.memory_space<vmem>>, %arg5: memref<1x8x16x128xf32, #tpu.memory_space<vmem>>, %arg6: memref<2x12x18x128xf32, #tpu.memory_space<vmem>>, %arg7: memref<2x!tpu.dma_semaphore, #tpu.memory_space<semaphore_mem>>) attributes {dimension_semantics = [#tpu.dimension_semantics<parallel>, #tpu.dimension_semantics<arbitrary>], iteration_bounds = array<i64: 2, 2>, scalar_prefetch = 0 : i64, scratch_operands = 2 : i64, tpu.core_type = #tpu.core_type<tc>, window_params = [{}, {pipeline_mode = #tpu.pipeline_mode<synchronous>, transform_indices = @transform_1, window_bounds = array<i64: 128, 128>}, {pipeline_mode = #tpu.pipeline_mode<synchronous>, transform_indices = @transform_2, window_bounds = array<i64: 128, 128>}, {transform_indices = @transform_3, window_bounds = array<i64: 1, 8, 16, 128>}]} {
    %c0_i32 = arith.constant 0 : i32
    %0 = arith.cmpi eq, %arg1, %c0_i32 : i32
    %1 = arith.extui %0 : i1 to i32
    %c0_i32_0 = arith.constant 0 : i32
    %2 = arith.cmpi ne, %1, %c0_i32_0 : i32
    scf.if %2 {
      %c8_i32_90 = arith.constant 8 : i32
      %144 = arith.muli %arg1, %c8_i32_90 : i32
      %145 = tpu.assume_multiple %144, 8 : i32
      %c0_i32_91 = arith.constant 0 : i32
      %c0_i32_92 = arith.constant 0 : i32
      %c0_i32_93 = arith.constant 0 : i32
      %c0_i32_94 = arith.constant 0 : i32
      %146 = tpu.memref_slice %arg2[%arg0, %145, %c0_i32_93, %c0_i32_94] : memref<2x20x18x128xf32, #tpu.memory_space<any>> -> memref<1x12x18x128xf32, #tpu.memory_space<any>>
      %147 = tpu.memref_squeeze %146 : memref<1x12x18x128xf32, #tpu.memory_space<any>> -> memref<12x18x128xf32, #tpu.memory_space<any>>
      %c0_i32_95 = arith.constant 0 : i32
      %c0_i32_96 = arith.constant 0 : i32
      %c0_i32_97 = arith.constant 0 : i32
      %148 = tpu.memref_slice %arg6[%c0_i32_91, %c0_i32_95, %c0_i32_96, %c0_i32_97] : memref<2x12x18x128xf32, #tpu.memory_space<vmem>> -> memref<1x12x18x128xf32, #tpu.memory_space<vmem>>
      %149 = tpu.memref_squeeze %148 : memref<1x12x18x128xf32, #tpu.memory_space<vmem>> -> memref<12x18x128xf32, #tpu.memory_space<vmem>>
      %150 = tpu.memref_slice %arg7[%c0_i32_92] : memref<2x!tpu.dma_semaphore, #tpu.memory_space<semaphore_mem>> -> memref<1x!tpu.dma_semaphore, #tpu.memory_space<semaphore_mem>>
      %151 = tpu.memref_squeeze %150 : memref<1x!tpu.dma_semaphore, #tpu.memory_space<semaphore_mem>> -> memref<!tpu.dma_semaphore, #tpu.memory_space<semaphore_mem>>
      tpu.enqueue_dma source(%147 : memref<12x18x128xf32, #tpu.memory_space<any>>) target(%149 : memref<12x18x128xf32, #tpu.memory_space<vmem>>) target_semaphore(%151 : memref<!tpu.dma_semaphore, #tpu.memory_space<semaphore_mem>>)
    } else {
    }
    %c1_i32 = arith.constant 1 : i32
    %3 = arith.addi %arg1, %c1_i32 : i32
    %c2_i32 = arith.constant 2 : i32
    %4 = arith.cmpi slt, %3, %c2_i32 : i32
    %5 = arith.extui %4 : i1 to i32
    %c0_i32_1 = arith.constant 0 : i32
    %6 = arith.cmpi ne, %5, %c0_i32_1 : i32
    scf.if %6 {
      %c1_i32_90 = arith.constant 1 : i32
      %144 = arith.addi %arg1, %c1_i32_90 : i32
      %c1_i32_91 = arith.constant 1 : i32
      %145 = arith.addi %arg1, %c1_i32_91 : i32
      %c2_i32_92 = arith.constant 2 : i32
      %c0_i32_93 = arith.constant 0 : i32
      %146 = arith.cmpi eq, %c2_i32_92, %c0_i32_93 : i32
      %c1_i32_94 = arith.constant 1 : i32
      %147 = arith.select %146, %c1_i32_94, %c2_i32_92 : i32
      %148 = arith.remsi %145, %147 : i32
      %c0_i32_95 = arith.constant 0 : i32
      %149 = arith.cmpi ne, %148, %c0_i32_95 : i32
      %c0_i32_96 = arith.constant 0 : i32
      %150 = arith.cmpi slt, %148, %c0_i32_96 : i32
      %c0_i32_97 = arith.constant 0 : i32
      %151 = arith.cmpi slt, %147, %c0_i32_97 : i32
      %152 = arith.xori %150, %151 : i1
      %153 = arith.andi %152, %149 : i1
      %154 = arith.addi %148, %147 : i32
      %155 = arith.select %153, %154, %148 : i32
      %c8_i32_98 = arith.constant 8 : i32
      %156 = arith.muli %144, %c8_i32_98 : i32
      %157 = tpu.assume_multiple %156, 8 : i32
      %c0_i32_99 = arith.constant 0 : i32
      %c0_i32_100 = arith.constant 0 : i32
      %158 = tpu.memref_slice %arg2[%arg0, %157, %c0_i32_99, %c0_i32_100] : memref<2x20x18x128xf32, #tpu.memory_space<any>> -> memref<1x12x18x128xf32, #tpu.memory_space<any>>
      %159 = tpu.memref_squeeze %158 : memref<1x12x18x128xf32, #tpu.memory_space<any>> -> memref<12x18x128xf32, #tpu.memory_space<any>>
      %c0_i32_101 = arith.constant 0 : i32
      %c0_i32_102 = arith.constant 0 : i32
      %c0_i32_103 = arith.constant 0 : i32
      %160 = tpu.memref_slice %arg6[%155, %c0_i32_101, %c0_i32_102, %c0_i32_103] : memref<2x12x18x128xf32, #tpu.memory_space<vmem>> -> memref<1x12x18x128xf32, #tpu.memory_space<vmem>>
      %161 = tpu.memref_squeeze %160 : memref<1x12x18x128xf32, #tpu.memory_space<vmem>> -> memref<12x18x128xf32, #tpu.memory_space<vmem>>
      %162 = tpu.memref_slice %arg7[%155] : memref<2x!tpu.dma_semaphore, #tpu.memory_space<semaphore_mem>> -> memref<1x!tpu.dma_semaphore, #tpu.memory_space<semaphore_mem>>
      %163 = tpu.memref_squeeze %162 : memref<1x!tpu.dma_semaphore, #tpu.memory_space<semaphore_mem>> -> memref<!tpu.dma_semaphore, #tpu.memory_space<semaphore_mem>>
      tpu.enqueue_dma source(%159 : memref<12x18x128xf32, #tpu.memory_space<any>>) target(%161 : memref<12x18x128xf32, #tpu.memory_space<vmem>>) target_semaphore(%163 : memref<!tpu.dma_semaphore, #tpu.memory_space<semaphore_mem>>)
    } else {
    }
    %c2_i32_2 = arith.constant 2 : i32
    %c0_i32_3 = arith.constant 0 : i32
    %7 = arith.cmpi eq, %c2_i32_2, %c0_i32_3 : i32
    %c1_i32_4 = arith.constant 1 : i32
    %8 = arith.select %7, %c1_i32_4, %c2_i32_2 : i32
    %9 = arith.remsi %arg1, %8 : i32
    %c0_i32_5 = arith.constant 0 : i32
    %10 = arith.cmpi ne, %9, %c0_i32_5 : i32
    %c0_i32_6 = arith.constant 0 : i32
    %11 = arith.cmpi slt, %9, %c0_i32_6 : i32
    %c0_i32_7 = arith.constant 0 : i32
    %12 = arith.cmpi slt, %8, %c0_i32_7 : i32
    %13 = arith.xori %11, %12 : i1
    %14 = arith.andi %13, %10 : i1
    %15 = arith.addi %9, %8 : i32
    %16 = arith.select %14, %15, %9 : i32
    %c8_i32 = arith.constant 8 : i32
    %17 = arith.muli %arg1, %c8_i32 : i32
    %18 = tpu.assume_multiple %17, 8 : i32
    %c0_i32_8 = arith.constant 0 : i32
    %c0_i32_9 = arith.constant 0 : i32
    %19 = tpu.memref_slice %arg2[%arg0, %18, %c0_i32_8, %c0_i32_9] : memref<2x20x18x128xf32, #tpu.memory_space<any>> -> memref<1x12x18x128xf32, #tpu.memory_space<any>>
    %20 = tpu.memref_squeeze %19 : memref<1x12x18x128xf32, #tpu.memory_space<any>> -> memref<12x18x128xf32, #tpu.memory_space<any>>
    %c0_i32_10 = arith.constant 0 : i32
    %c0_i32_11 = arith.constant 0 : i32
    %c0_i32_12 = arith.constant 0 : i32
    %21 = tpu.memref_slice %arg6[%16, %c0_i32_10, %c0_i32_11, %c0_i32_12] : memref<2x12x18x128xf32, #tpu.memory_space<vmem>> -> memref<1x12x18x128xf32, #tpu.memory_space<vmem>>
    %22 = tpu.memref_squeeze %21 : memref<1x12x18x128xf32, #tpu.memory_space<vmem>> -> memref<12x18x128xf32, #tpu.memory_space<vmem>>
    %23 = tpu.memref_slice %arg7[%16] : memref<2x!tpu.dma_semaphore, #tpu.memory_space<semaphore_mem>> -> memref<1x!tpu.dma_semaphore, #tpu.memory_space<semaphore_mem>>
    %24 = tpu.memref_squeeze %23 : memref<1x!tpu.dma_semaphore, #tpu.memory_space<semaphore_mem>> -> memref<!tpu.dma_semaphore, #tpu.memory_space<semaphore_mem>>
    tpu.wait_dma2 semaphore(%24 : memref<!tpu.dma_semaphore, #tpu.memory_space<semaphore_mem>>) src(%20 : memref<12x18x128xf32, #tpu.memory_space<any>>) dst(%22 : memref<12x18x128xf32, #tpu.memory_space<vmem>>)
    %c0_i32_13 = arith.constant 0 : i32
    %c0_i32_14 = arith.constant 0 : i32
    %c0_i32_15 = arith.constant 0 : i32
    %25 = tpu.memref_slice %arg6[%16, %c0_i32_13, %c0_i32_14, %c0_i32_15] : memref<2x12x18x128xf32, #tpu.memory_space<vmem>> -> memref<1x12x18x128xf32, #tpu.memory_space<vmem>>
    %26 = tpu.memref_squeeze %25 : memref<1x12x18x128xf32, #tpu.memory_space<vmem>> -> memref<12x18x128xf32, #tpu.memory_space<vmem>>
    %c0 = arith.constant 0 : index
    %c0_16 = arith.constant 0 : index
    %c0_17 = arith.constant 0 : index
    %27 = vector.load %26[%c0, %c0_16, %c0_17] : memref<12x18x128xf32, #tpu.memory_space<vmem>>, vector<10x16x128xf32>
    %c0_i32_18 = arith.constant 0 : i32
    %c0_i32_19 = arith.constant 0 : i32
    %c0_i32_20 = arith.constant 0 : i32
    %28 = tpu.memref_slice %arg6[%16, %c0_i32_18, %c0_i32_19, %c0_i32_20] : memref<2x12x18x128xf32, #tpu.memory_space<vmem>> -> memref<1x12x18x128xf32, #tpu.memory_space<vmem>>
    %29 = tpu.memref_squeeze %28 : memref<1x12x18x128xf32, #tpu.memory_space<vmem>> -> memref<12x18x128xf32, #tpu.memory_space<vmem>>
    %c0_21 = arith.constant 0 : index
    %c1 = arith.constant 1 : index
    %c0_22 = arith.constant 0 : index
    %30 = vector.load %29[%c0_21, %c1, %c0_22] : memref<12x18x128xf32, #tpu.memory_space<vmem>>, vector<10x16x128xf32>
    %c7_i32 = arith.constant 7 : i32
    %31 = tpu.dynamic_rotate %30 by %c7_i32 dim 2 : vector<10x16x128xf32>, i32 -> vector<10x16x128xf32>
    %32 = arith.addf %27, %31 : vector<10x16x128xf32>
    %c0_i32_23 = arith.constant 0 : i32
    %c0_i32_24 = arith.constant 0 : i32
    %c0_i32_25 = arith.constant 0 : i32
    %33 = tpu.memref_slice %arg6[%16, %c0_i32_23, %c0_i32_24, %c0_i32_25] : memref<2x12x18x128xf32, #tpu.memory_space<vmem>> -> memref<1x12x18x128xf32, #tpu.memory_space<vmem>>
    %34 = tpu.memref_squeeze %33 : memref<1x12x18x128xf32, #tpu.memory_space<vmem>> -> memref<12x18x128xf32, #tpu.memory_space<vmem>>
    %c0_26 = arith.constant 0 : index
    %c2 = arith.constant 2 : index
    %c0_27 = arith.constant 0 : index
    %35 = vector.load %34[%c0_26, %c2, %c0_27] : memref<12x18x128xf32, #tpu.memory_space<vmem>>, vector<10x16x128xf32>
    %c14_i32 = arith.constant 14 : i32
    %36 = tpu.dynamic_rotate %35 by %c14_i32 dim 2 : vector<10x16x128xf32>, i32 -> vector<10x16x128xf32>
    %37 = arith.addf %32, %36 : vector<10x16x128xf32>
    %c0_i32_28 = arith.constant 0 : i32
    %c0_i32_29 = arith.constant 0 : i32
    %c0_i32_30 = arith.constant 0 : i32
    %38 = tpu.memref_slice %arg6[%16, %c0_i32_28, %c0_i32_29, %c0_i32_30] : memref<2x12x18x128xf32, #tpu.memory_space<vmem>> -> memref<1x12x18x128xf32, #tpu.memory_space<vmem>>
    %39 = tpu.memref_squeeze %38 : memref<1x12x18x128xf32, #tpu.memory_space<vmem>> -> memref<12x18x128xf32, #tpu.memory_space<vmem>>
    %c1_31 = arith.constant 1 : index
    %c0_32 = arith.constant 0 : index
    %c0_33 = arith.constant 0 : index
    %40 = vector.load %39[%c1_31, %c0_32, %c0_33] : memref<12x18x128xf32, #tpu.memory_space<vmem>>, vector<10x16x128xf32>
    %c21_i32 = arith.constant 21 : i32
    %41 = tpu.dynamic_rotate %40 by %c21_i32 dim 2 : vector<10x16x128xf32>, i32 -> vector<10x16x128xf32>
    %42 = arith.addf %37, %41 : vector<10x16x128xf32>
    %c0_i32_34 = arith.constant 0 : i32
    %c0_i32_35 = arith.constant 0 : i32
    %c0_i32_36 = arith.constant 0 : i32
    %43 = tpu.memref_slice %arg6[%16, %c0_i32_34, %c0_i32_35, %c0_i32_36] : memref<2x12x18x128xf32, #tpu.memory_space<vmem>> -> memref<1x12x18x128xf32, #tpu.memory_space<vmem>>
    %44 = tpu.memref_squeeze %43 : memref<1x12x18x128xf32, #tpu.memory_space<vmem>> -> memref<12x18x128xf32, #tpu.memory_space<vmem>>
    %c1_37 = arith.constant 1 : index
    %c1_38 = arith.constant 1 : index
    %c0_39 = arith.constant 0 : index
    %45 = vector.load %44[%c1_37, %c1_38, %c0_39] : memref<12x18x128xf32, #tpu.memory_space<vmem>>, vector<10x16x128xf32>
    %c28_i32 = arith.constant 28 : i32
    %46 = tpu.dynamic_rotate %45 by %c28_i32 dim 2 : vector<10x16x128xf32>, i32 -> vector<10x16x128xf32>
    %47 = arith.addf %42, %46 : vector<10x16x128xf32>
    %c0_i32_40 = arith.constant 0 : i32
    %c0_i32_41 = arith.constant 0 : i32
    %c0_i32_42 = arith.constant 0 : i32
    %48 = tpu.memref_slice %arg6[%16, %c0_i32_40, %c0_i32_41, %c0_i32_42] : memref<2x12x18x128xf32, #tpu.memory_space<vmem>> -> memref<1x12x18x128xf32, #tpu.memory_space<vmem>>
    %49 = tpu.memref_squeeze %48 : memref<1x12x18x128xf32, #tpu.memory_space<vmem>> -> memref<12x18x128xf32, #tpu.memory_space<vmem>>
    %c1_43 = arith.constant 1 : index
    %c2_44 = arith.constant 2 : index
    %c0_45 = arith.constant 0 : index
    %50 = vector.load %49[%c1_43, %c2_44, %c0_45] : memref<12x18x128xf32, #tpu.memory_space<vmem>>, vector<10x16x128xf32>
    %c35_i32 = arith.constant 35 : i32
    %51 = tpu.dynamic_rotate %50 by %c35_i32 dim 2 : vector<10x16x128xf32>, i32 -> vector<10x16x128xf32>
    %52 = arith.addf %47, %51 : vector<10x16x128xf32>
    %c0_i32_46 = arith.constant 0 : i32
    %c0_i32_47 = arith.constant 0 : i32
    %c0_i32_48 = arith.constant 0 : i32
    %53 = tpu.memref_slice %arg6[%16, %c0_i32_46, %c0_i32_47, %c0_i32_48] : memref<2x12x18x128xf32, #tpu.memory_space<vmem>> -> memref<1x12x18x128xf32, #tpu.memory_space<vmem>>
    %54 = tpu.memref_squeeze %53 : memref<1x12x18x128xf32, #tpu.memory_space<vmem>> -> memref<12x18x128xf32, #tpu.memory_space<vmem>>
    %c2_49 = arith.constant 2 : index
    %c0_50 = arith.constant 0 : index
    %c0_51 = arith.constant 0 : index
    %55 = vector.load %54[%c2_49, %c0_50, %c0_51] : memref<12x18x128xf32, #tpu.memory_space<vmem>>, vector<10x16x128xf32>
    %c42_i32 = arith.constant 42 : i32
    %56 = tpu.dynamic_rotate %55 by %c42_i32 dim 2 : vector<10x16x128xf32>, i32 -> vector<10x16x128xf32>
    %57 = arith.addf %52, %56 : vector<10x16x128xf32>
    %c0_i32_52 = arith.constant 0 : i32
    %c0_i32_53 = arith.constant 0 : i32
    %c0_i32_54 = arith.constant 0 : i32
    %58 = tpu.memref_slice %arg6[%16, %c0_i32_52, %c0_i32_53, %c0_i32_54] : memref<2x12x18x128xf32, #tpu.memory_space<vmem>> -> memref<1x12x18x128xf32, #tpu.memory_space<vmem>>
    %59 = tpu.memref_squeeze %58 : memref<1x12x18x128xf32, #tpu.memory_space<vmem>> -> memref<12x18x128xf32, #tpu.memory_space<vmem>>
    %c2_55 = arith.constant 2 : index
    %c1_56 = arith.constant 1 : index
    %c0_57 = arith.constant 0 : index
    %60 = vector.load %59[%c2_55, %c1_56, %c0_57] : memref<12x18x128xf32, #tpu.memory_space<vmem>>, vector<10x16x128xf32>
    %c49_i32 = arith.constant 49 : i32
    %61 = tpu.dynamic_rotate %60 by %c49_i32 dim 2 : vector<10x16x128xf32>, i32 -> vector<10x16x128xf32>
    %62 = arith.addf %57, %61 : vector<10x16x128xf32>
    %c0_i32_58 = arith.constant 0 : i32
    %c0_i32_59 = arith.constant 0 : i32
    %c0_i32_60 = arith.constant 0 : i32
    %63 = tpu.memref_slice %arg6[%16, %c0_i32_58, %c0_i32_59, %c0_i32_60] : memref<2x12x18x128xf32, #tpu.memory_space<vmem>> -> memref<1x12x18x128xf32, #tpu.memory_space<vmem>>
    %64 = tpu.memref_squeeze %63 : memref<1x12x18x128xf32, #tpu.memory_space<vmem>> -> memref<12x18x128xf32, #tpu.memory_space<vmem>>
    %c2_61 = arith.constant 2 : index
    %c2_62 = arith.constant 2 : index
    %c0_63 = arith.constant 0 : index
    %65 = vector.load %64[%c2_61, %c2_62, %c0_63] : memref<12x18x128xf32, #tpu.memory_space<vmem>>, vector<10x16x128xf32>
    %c56_i32 = arith.constant 56 : i32
    %66 = tpu.dynamic_rotate %65 by %c56_i32 dim 2 : vector<10x16x128xf32>, i32 -> vector<10x16x128xf32>
    %67 = arith.addf %62, %66 : vector<10x16x128xf32>
    %c0_64 = arith.constant 0 : index
    %c0_65 = arith.constant 0 : index
    %68 = vector.load %arg3[%c0_64, %c0_65] : memref<128x128xf32, #tpu.memory_space<vmem>>, vector<128x128xf32>
    %cst = arith.constant dense<0.000000e+00> : vector<10x16x128xf32>
    %69 = tpu.matmul %67, %68, %cst {dimension_numbers = #tpu.dot_dimension_numbers<[2], [0], [0, 1], [1], [0, 0, 0, 1, 1, 1], [], []>} : vector<10x16x128xf32>, vector<128x128xf32>, vector<10x16x128xf32> -> vector<10x16x128xf32>
    %c0_i32_66 = arith.constant 0 : i32
    %c0_i32_67 = arith.constant 0 : i32
    %c0_i32_68 = arith.constant 0 : i32
    %70 = tpu.memref_slice %arg6[%16, %c0_i32_66, %c0_i32_67, %c0_i32_68] : memref<2x12x18x128xf32, #tpu.memory_space<vmem>> -> memref<1x12x18x128xf32, #tpu.memory_space<vmem>>
    %71 = tpu.memref_squeeze %70 : memref<1x12x18x128xf32, #tpu.memory_space<vmem>> -> memref<12x18x128xf32, #tpu.memory_space<vmem>>
    %c1_69 = arith.constant 1 : index
    %c1_70 = arith.constant 1 : index
    %c0_71 = arith.constant 0 : index
    %72 = vector.load %71[%c1_69, %c1_70, %c0_71] : memref<12x18x128xf32, #tpu.memory_space<vmem>>, vector<10x16x128xf32>
    %c124_i32 = arith.constant 124 : i32
    %73 = tpu.dynamic_rotate %69 by %c124_i32 dim 2 : vector<10x16x128xf32>, i32 -> vector<10x16x128xf32>
    %c124_i32_72 = arith.constant 124 : i32
    %74 = tpu.dynamic_rotate %72 by %c124_i32_72 dim 2 : vector<10x16x128xf32>, i32 -> vector<10x16x128xf32>
    %75 = tpu.iota {dimensions = array<i32: 2>} : vector<1x1x128xi32>
    %c8_i32_73 = arith.constant 8 : i32
    %76 = arith.muli %arg1, %c8_i32_73 : i32
    %c1_i32_74 = arith.constant 1 : i32
    %77 = arith.subi %76, %c1_i32_74 : i32
    %78 = tpu.iota {dimensions = array<i32: 0>} : vector<10x1x1xi32>
    %79 = vector.broadcast %77 : i32 to vector<10x1x1xi32>
    %80 = arith.addi %79, %78 : vector<10x1x1xi32>
    %c3_i32 = arith.constant 3 : i32
    %81 = vector.broadcast %c3_i32 : i32 to vector<1x1x128xi32>
    %82 = arith.cmpi slt, %75, %81 : vector<1x1x128xi32>
    %c0_i32_75 = arith.constant 0 : i32
    %83 = vector.broadcast %c0_i32_75 : i32 to vector<10x1x1xi32>
    %84 = arith.cmpi sge, %80, %83 : vector<10x1x1xi32>
    %c16_i32 = arith.constant 16 : i32
    %85 = vector.broadcast %c16_i32 : i32 to vector<10x1x1xi32>
    %86 = arith.cmpi slt, %80, %85 : vector<10x1x1xi32>
    %87 = arith.andi %84, %86 : vector<10x1x1xi1>
    %88 = vector.broadcast %82 : vector<1x1x128xi1> to vector<10x1x128xi1>
    %89 = vector.broadcast %87 : vector<10x1x1xi1> to vector<10x1x128xi1>
    %90 = arith.andi %88, %89 : vector<10x1x128xi1>
    %91 = arith.addf %73, %74 : vector<10x16x128xf32>
    %cst_76 = arith.constant 0.000000e+00 : f32
    %92 = vector.shape_cast %90 : vector<10x1x128xi1> to vector<10x1x128xi1>
    %93 = vector.broadcast %92 : vector<10x1x128xi1> to vector<10x16x128xi1>
    %94 = vector.broadcast %cst_76 : f32 to vector<10x16x128xf32>
    %95 = arith.select %93, %91, %94 : vector<10x16x128xi1>, vector<10x16x128xf32>
    %cst_77 = arith.constant 0.000000e+00 : f32
    %96 = vector.broadcast %cst_77 : f32 to vector<10x1x128xf32>
    %97 = tpu.concatenate %96, %95, %96 in 1 : vector<10x1x128xf32>, vector<10x16x128xf32>, vector<10x1x128xf32> -> vector<10x18x128xf32>
    %98 = vector.extract_strided_slice %97 {offsets = [0, 0, 0], sizes = [8, 16, 128], strides = [1, 1, 1]} : vector<10x18x128xf32> to vector<8x16x128xf32>
    %99 = vector.extract_strided_slice %97 {offsets = [0, 1, 0], sizes = [8, 16, 128], strides = [1, 1, 1]} : vector<10x18x128xf32> to vector<8x16x128xf32>
    %c3_i32_78 = arith.constant 3 : i32
    %100 = tpu.dynamic_rotate %99 by %c3_i32_78 dim 2 : vector<8x16x128xf32>, i32 -> vector<8x16x128xf32>
    %101 = arith.addf %98, %100 : vector<8x16x128xf32>
    %102 = vector.extract_strided_slice %97 {offsets = [0, 2, 0], sizes = [8, 16, 128], strides = [1, 1, 1]} : vector<10x18x128xf32> to vector<8x16x128xf32>
    %c6_i32 = arith.constant 6 : i32
    %103 = tpu.dynamic_rotate %102 by %c6_i32 dim 2 : vector<8x16x128xf32>, i32 -> vector<8x16x128xf32>
    %104 = arith.addf %101, %103 : vector<8x16x128xf32>
    %105 = vector.extract_strided_slice %97 {offsets = [1, 0, 0], sizes = [8, 16, 128], strides = [1, 1, 1]} : vector<10x18x128xf32> to vector<8x16x128xf32>
    %c9_i32 = arith.constant 9 : i32
    %106 = tpu.dynamic_rotate %105 by %c9_i32 dim 2 : vector<8x16x128xf32>, i32 -> vector<8x16x128xf32>
    %107 = arith.addf %104, %106 : vector<8x16x128xf32>
    %108 = vector.extract_strided_slice %97 {offsets = [1, 1, 0], sizes = [8, 16, 128], strides = [1, 1, 1]} : vector<10x18x128xf32> to vector<8x16x128xf32>
    %c12_i32 = arith.constant 12 : i32
    %109 = tpu.dynamic_rotate %108 by %c12_i32 dim 2 : vector<8x16x128xf32>, i32 -> vector<8x16x128xf32>
    %110 = arith.addf %107, %109 : vector<8x16x128xf32>
    %111 = vector.extract_strided_slice %97 {offsets = [1, 2, 0], sizes = [8, 16, 128], strides = [1, 1, 1]} : vector<10x18x128xf32> to vector<8x16x128xf32>
    %c15_i32 = arith.constant 15 : i32
    %112 = tpu.dynamic_rotate %111 by %c15_i32 dim 2 : vector<8x16x128xf32>, i32 -> vector<8x16x128xf32>
    %113 = arith.addf %110, %112 : vector<8x16x128xf32>
    %114 = vector.extract_strided_slice %97 {offsets = [2, 0, 0], sizes = [8, 16, 128], strides = [1, 1, 1]} : vector<10x18x128xf32> to vector<8x16x128xf32>
    %c18_i32 = arith.constant 18 : i32
    %115 = tpu.dynamic_rotate %114 by %c18_i32 dim 2 : vector<8x16x128xf32>, i32 -> vector<8x16x128xf32>
    %116 = arith.addf %113, %115 : vector<8x16x128xf32>
    %117 = vector.extract_strided_slice %97 {offsets = [2, 1, 0], sizes = [8, 16, 128], strides = [1, 1, 1]} : vector<10x18x128xf32> to vector<8x16x128xf32>
    %c21_i32_79 = arith.constant 21 : i32
    %118 = tpu.dynamic_rotate %117 by %c21_i32_79 dim 2 : vector<8x16x128xf32>, i32 -> vector<8x16x128xf32>
    %119 = arith.addf %116, %118 : vector<8x16x128xf32>
    %120 = vector.extract_strided_slice %97 {offsets = [2, 2, 0], sizes = [8, 16, 128], strides = [1, 1, 1]} : vector<10x18x128xf32> to vector<8x16x128xf32>
    %c24_i32 = arith.constant 24 : i32
    %121 = tpu.dynamic_rotate %120 by %c24_i32 dim 2 : vector<8x16x128xf32>, i32 -> vector<8x16x128xf32>
    %122 = arith.addf %119, %121 : vector<8x16x128xf32>
    %c27_i32 = arith.constant 27 : i32
    %123 = vector.broadcast %c27_i32 : i32 to vector<1x1x128xi32>
    %124 = arith.cmpi eq, %75, %123 : vector<1x1x128xi32>
    %cst_80 = arith.constant 1.000000e+00 : f32
    %cst_81 = arith.constant 0.000000e+00 : f32
    %125 = vector.broadcast %cst_80 : f32 to vector<1x1x128xf32>
    %126 = vector.broadcast %cst_81 : f32 to vector<1x1x128xf32>
    %127 = arith.select %124, %125, %126 : vector<1x1x128xi1>, vector<1x1x128xf32>
    %128 = vector.broadcast %127 : vector<1x1x128xf32> to vector<8x16x128xf32>
    %129 = arith.addf %122, %128 : vector<8x16x128xf32>
    %c0_82 = arith.constant 0 : index
    %c0_83 = arith.constant 0 : index
    %130 = vector.load %arg4[%c0_82, %c0_83] : memref<128x128xf32, #tpu.memory_space<vmem>>, vector<128x128xf32>
    %cst_84 = arith.constant dense<0.000000e+00> : vector<8x16x128xf32>
    %131 = tpu.matmul %129, %130, %cst_84 {dimension_numbers = #tpu.dot_dimension_numbers<[2], [0], [0, 1], [1], [0, 0, 0, 1, 1, 1], [], []>} : vector<8x16x128xf32>, vector<128x128xf32>, vector<8x16x128xf32> -> vector<8x16x128xf32>
    %132 = arith.negf %131 : vector<8x16x128xf32>
    %133 = math.exp %132 : vector<8x16x128xf32>
    %cst_85 = arith.constant 1.000000e+00 : f32
    %134 = vector.broadcast %cst_85 : f32 to vector<8x16x128xf32>
    %135 = arith.addf %134, %133 : vector<8x16x128xf32>
    %136 = arith.divf %134, %135 : vector<8x16x128xf32>
    %137 = vector.extract_strided_slice %72 {offsets = [1, 0, 0], sizes = [8, 16, 128], strides = [1, 1, 1]} : vector<10x16x128xf32> to vector<8x16x128xf32>
    %138 = vector.extract_strided_slice %69 {offsets = [1, 0, 0], sizes = [8, 16, 128], strides = [1, 1, 1]} : vector<10x16x128xf32> to vector<8x16x128xf32>
    %139 = arith.mulf %138, %136 : vector<8x16x128xf32>
    %140 = arith.addf %139, %137 : vector<8x16x128xf32>
    %c0_86 = arith.constant 0 : index
    %c0_87 = arith.constant 0 : index
    %c0_88 = arith.constant 0 : index
    %c0_89 = arith.constant 0 : index
    %141 = vector.load %arg5[%c0_86, %c0_87, %c0_88, %c0_89] : memref<1x8x16x128xf32, #tpu.memory_space<vmem>>, vector<1x8x16x128xf32>
    %142 = vector.shape_cast %141 : vector<1x8x16x128xf32> to vector<8x16x128xf32>
    %143 = vector.shape_cast %140 : vector<8x16x128xf32> to vector<1x8x16x128xf32>
    tpu.vector_store %arg5[%c0_86, %c0_87, %c0_88, %c0_89], %143 {strides = array<i32>} : memref<1x8x16x128xf32, #tpu.memory_space<vmem>>, vector<1x8x16x128xf32>,
    return
  }
  func.func @transform_1(%arg0: i32, %arg1: i32) -> (i32, i32) {
    %c0_i32 = arith.constant 0 : i32
    %c0_i32_0 = arith.constant 0 : i32
    %c0_i32_1 = arith.constant 0 : i32
    return %c0_i32, %c0_i32_0 : i32, i32
  }
  func.func @transform_2(%arg0: i32, %arg1: i32) -> (i32, i32) {
    %c0_i32 = arith.constant 0 : i32
    %c0_i32_0 = arith.constant 0 : i32
    %c0_i32_1 = arith.constant 0 : i32
    return %c0_i32, %c0_i32_0 : i32, i32
  }
  func.func @transform_3(%arg0: i32, %arg1: i32) -> (i32, i32, i32, i32) {
    %c0_i32 = arith.constant 0 : i32
    %c0_i32_0 = arith.constant 0 : i32
    %c0_i32_1 = arith.constant 0 : i32
    return %arg0, %arg1, %c0_i32, %c0_i32_0 : i32, i32, i32, i32
  }
}

</mosaic_0001>

<bundles_post_ra>
// kernel: tpu_custom_call.1
= control target key start
LH: loop header
LB: loop body
LE: loop exit
PB: predicated region body
PF: predicated region fallthrough
CT: control target
= control target key end

     0   :  { %s5079_s0 = inlined_call_operand.hbm [shape: f32[2,20,18,128], index: 0, kind: input, shape index: {}]   ;;  %s5080_s1 = inlined_call_operand.hbm [shape: f32[128,128], index: 1, kind: input, shape index: {}]   ;;  %s5081_s2 = inlined_call_operand.hbm [shape: f32[128,128], index: 2, kind: input, shape index: {}]   ;;  %s5082_s3 = inlined_call_operand.hbm [shape: f32[2,16,16,128], index: 3, kind: output, shape index: {}]  }
   0x1   :  { %5121 = sst [smem:[#allocation38_spill]] %s5080_s1 }
   0x2   :  { %8 = vsyncpa [#allocation5], 0 }
   0x3   :  { %9 = vsyncpa [#allocation8], 0 }
   0x4   :  { %10 = vsyncpa [#allocation6], 0 }
   0x5   :  { %12 = vsyncpa [#allocation6 + $0x1], 0  ;;  %s3281_s12 = smov 0   ;;  %s3283_s13 = smov 0  }
   0x6   :  { %s3285_s14 = smov 0   ;;  %s3287_s15 = smov 0  }
   0x7   :  { %s3289_s16 = smov 0   ;;  %s3291_s17 = smov 0  }
   0x8   :  { %s3293_s18 = smov 0   ;;  %s3295_s19 = smov 0  }
   0x9 LB: > { %5122 = sst [smem:[#allocation16_spill]] %s3229_s18  ;;  %s2396_s20 = sadd.s32 4294967295, %s3233_s19   ;;  %s3233_s19 = sphi %s3295_s19, %s18_s19   ;;  %s3229_s18 = sphi %s3293_s18, %s5203_s18   ;;  %s3225_s17 = sphi %s3291_s17, %s5208_s17   ;;  %s3221_s16 = sphi %s3289_s16, %s5201_s16   ;;  %s3217_s15 = sphi %s3287_s15, %s5207_s15   ;;  %s3213_s14 = sphi %s3285_s14, %s5206_s14   ;;  %s3209_s13 = sphi %s3283_s13, %s5205_s13   ;;  %s3205_s12 = sphi %s3281_s12, %s5204_s12  }
   0xa   : > { %s2397_s21 = sadd.s32 4294967294, %s3233_s19   ;;  %s27_s22 = sadd.s32 1, %s3225_s17 }
   0xb   : > { %s30_s23 = sadd.s32 1, %s3229_s18  ;;  %p28_p0 = scmp.ge.s32.totalorder %s27_s22, 2 }
   0xc   : > { %s81_s24 = sadd.s32 1, %s3213_s14  ;;  %p91_p1 = scmp.ne.s32.totalorder %s3213_s14, %s3209_s13 }
   0xd   : > { %p92_p2 = scmp.eq.s32.totalorder %s2396_s20, 3  ;;  %s5210_s22 = smov (%p28_p0, %s27_s22), 0 }
   0xe   : > { %5123 = sst [smem:[#allocation17_spill]] %s5210_s22  ;;  %s5212_s23 = smov (!%p28_p0, %s30_s23), %s3229_s18 }
   0xf   : > { %s77_s25 = ssub.s32 %s3225_s17, %s5210_s22  ;;  %p3333_p3 = por %p92_p2, %p91_p1 }
  0x10   : > { %p32_p4 = scmp.ge.s32.totalorder %s5212_s23, 2  ;;  %p97_p5 = scmp.ne.s32.totalorder %s3209_s13, %s3205_s12 }
  0x11   : > { %s5124_s26 = scalar_select %p3333_p3, 1, 0 }
  0x12   : > { %p98_p6 = scmp.eq.s32.totalorder %s2397_s21, 3  ;;  %p2398_p7 = scmp.ge.s32.totalorder %s3233_s19, 1 }
  0x13   : > { %s5214_s23 = smov (%p32_p4, %s5212_s23), 0  ;;  %p105_p9 = scmp.lt.s32.totalorder %s3233_s19, 5 }
  0x14   : > { %5125 = sst [smem:[#allocation18_spill]] %s5214_s23  ;;  %p3342_p8 = por %p98_p6, %p97_p5 }
  0x15   : > { %s76_s28 = ssub.s32 %s3229_s18, %s5214_s23  ;;  %p3349_p10 = pnand %p2398_p7, %p105_p9 }
  0x16   : > { %s5126_s27 = scalar_select %p3342_p8, 1, 0 }
  0x17   : > { %s78_s29 = sor.u32 %s77_s25, %s76_s28  ;;  %p3353_p12 = scmp.eq.s32.totalorder %s2396_s20, 0 }
  0x18   : > { %s5127_s30 = scalar_select %p3349_p10, 1, 0 }
  0x19   : > { %p79_p11 = scmp.eq.s32.totalorder %s78_s29, 0  ;;  %p2829_p13 = pneg %p3349_p10 }
  0x1a   : > { %s5128_s4 = scalar_select %p3353_p12, 1, 0 }
  0x1b   : > { %s3360_s5 = scalar_select %p79_p11, %s3213_s14, %s81_s24  }
  0x1c   : > { %s3235_s6 = smov [#allocation4]   ;;  %p3364_p0 = pnand %p3353_p12, %p2829_p13 }
  0x1d   : > { %s117_s7 = sshll.u32 %s3235_s6, 4  ;;  %s5130_s1 = sld [smem:[#allocation38_spill]]  ;;  %s118_s7 = int_to_ptr.vmem [resolvable:$true] %s117_s7 }
  0x1e   : > { %p3018_p2 = pneg %p3364_p0 }
  0x23   : > { %s3016_s11 = scalar_lea.hbm %s5130_s1, 2048 }
  0x24   : > { %p3017_p1 = scmp.ne.s32.totalorder %s5130_s1, %s3016_s11  ;;  %p3023_p6 = scmp.lt.u32.totalorder %s3016_s11, %s5130_s1 }
  0x26   : > { %p3019_p4 = pnand %p3018_p2, %p3017_p1 }
  0x28   : > { %p3020_p5 = pneg %p3019_p4 }
  0x2a   : > { %p3025_p7 = pnand %p3023_p6, %p3020_p5 }
  0x2c   : > { %3028 = shalt.err (!%p3025_p7)
}
  0x2d   : > { %s3029_s28 = scalar_lea.vmem %s118_s7, 2048  ;;  %p3037_p8 = scmp.lt.s32.totalorder %s118_s7, %s118_s7 }
  0x2e   : > { %p3030_p9 = scmp.ne.s32.totalorder %s118_s7, %s3029_s28  ;;  %p3038_p3 = scmp.lt.s32.totalorder %s3029_s28, %s3029_s28 }
  0x30   : > { %p3032_p11 = pnand %p3030_p9, %p3018_p2  ;;  %p3039_p12 = por %p3038_p3, %p3037_p8 }
  0x32   : > { %p3033_p13 = pneg %p3032_p11 }
  0x34   : > { %p3040_p10 = pnand %p3039_p12, %p3033_p13 }
  0x36   : > { %3043 = shalt.err (!%p3040_p10)
}
  0x37   : > { %s3236_s29 = smov 128   ;;  %s3237_s6 = smov 8  }
  0x38   : > { %2832 = dma.hbm_to_vmem [thread:$0]  (!%p3364_p0), %s5130_s1, 2048, %s118_s7, [#allocation5], %s3236_s29, %s3236_s29, %s3237_s6  }
  0x39   : > { %s3238_s11 = smov [#allocation7]   ;;  %s3044_s25 = scalar_lea.hbm %s5081_s2, 2048 }
  0x3a   : > { %s130_s20 = sshll.u32 %s3238_s11, 4  ;;  %p3045_p3 = scmp.ne.s32.totalorder %s5081_s2, %s3044_s25  ;;  %s131_s20 = int_to_ptr.vmem [resolvable:$true] %s130_s20 }
  0x3b   : > { %p3051_p12 = scmp.lt.u32.totalorder %s3044_s25, %s5081_s2 }
  0x3c   : > { %p3047_p8 = pnand %p3045_p3, %p3018_p2 }
  0x3e   : > { %p3048_p10 = pneg %p3047_p8 }
  0x40   : > { %p3053_p1 = pnand %p3051_p12, %p3048_p10 }
  0x42   : > { %3056 = shalt.err (!%p3053_p1)
}
  0x43   : > { %s3057_s7 = scalar_lea.vmem %s131_s20, 2048  ;;  %p3065_p7 = scmp.lt.s32.totalorder %s131_s20, %s131_s20 }
  0x44   : > { %p3058_p4 = scmp.ne.s32.totalorder %s131_s20, %s3057_s7  ;;  %p3066_p9 = scmp.lt.s32.totalorder %s3057_s7, %s3057_s7 }
  0x46   : > { %p3060_p5 = pnand %p3058_p4, %p3018_p2  ;;  %p3067_p11 = por %p3066_p9, %p3065_p7 }
  0x48   : > { %p3061_p6 = pneg %p3060_p5 }
  0x4a   : > { %p3068_p13 = pnand %p3067_p11, %p3061_p6 }
  0x4c   : > { %3071 = shalt.err (!%p3068_p13)
}
  0x4d   : > { %2835 = dma.hbm_to_vmem [thread:$0]  (!%p3364_p0), %s5081_s2, 2048, %s131_s20, [#allocation8], %s3236_s29, %s3236_s29, %s3237_s6  }
  0x4e   : > { %p5131_p3 = scmp.ne.s32.totalorder %s5127_s30, 0 }
  0x50   : > { %146 = sbr.rel (%p5131_p3) target bundleno = 1447 (0x5a7), region = 28 }
  0x57   : > { %p5132_p8 = scmp.ne.s32.totalorder %s5128_s4, 0 }
  0x59   : > { %3190 = dma.done.wait (%p5132_p8), [#allocation5], 2048  }
  0x5a   : > { %3192 = vsyncadd (%p5132_p8), [#allocation5], 4294965248 }
  0x5b   : > { %3194 = dma.done.wait (%p5132_p8), [#allocation8], 2048  }
  0x5c   : > { %3196 = vsyncadd (%p5132_p8), [#allocation8], 4294965248  ;;  %s5090_s18 = sand.u32 1, %s3209_s13   ;;  %p2844_p0 = scmp.eq.s32.totalorder %s3217_s15, 0 }
  0x5d   : > { %s3423_s22 = sshll.u32 %s5090_s18, 7  ;;  %s2407_s30 = smul.u32 192, %s3217_s15 }
  0x5e   : > { %s174_s8 = smul.u32 480, %s3221_s16  ;;  %s3239_s29 = smov [#allocation2]  }
  0x5f   : > { %s179_s6 = sshll.u32 %s3239_s29, 4  ;;  %s3436_s24 = sadd.s32 1, %s3217_s15  ;;  %s3428_s6 = int_to_ptr.vmem [resolvable:$true] %s179_s6 }
  0x60   : > { %s175_s10 = sadd.s32 %s2407_s30, %s174_s8  ;;  %s5095_s23 = scalar_lea.hbm %s5079_s0, 15360 }
  0x61   : > { %s2408_s4 = sshll.u32 %s175_s10, 4 }
  0x62   : > { %s3433_s21 = scalar_lea.hbm %s5079_s0, %s2408_s4 }
  0x63   : > { %s3072_s25 = scalar_lea.hbm %s3433_s21, 3456  ;;  %p3077_p1 = scmp.lt.u32.totalorder %s3433_s21, %s5079_s0 }
  0x64   : > { %p3073_p2 = scmp.ne.s32.totalorder %s3433_s21, %s3072_s25  ;;  %p3078_p4 = scmp.lt.u32.totalorder %s5095_s23, %s3072_s25 }
  0x65   : > { %p3080_p6 = scmp.lt.u32.totalorder %s3072_s25, %s3433_s21 }
  0x66   : > { %p3074_p10 = pnand %p3073_p2, %p2844_p0  ;;  %p3079_p5 = por %p3078_p4, %p3077_p1 }
  0x68   : > { %p3075_p12 = pneg %p3074_p10  ;;  %p3081_p7 = por %p3080_p6, %p3079_p5 }
  0x6a   : > { %p3082_p9 = pnand %p3081_p7, %p3075_p12 }
  0x6c   : > { %3085 = shalt.err (!%p3082_p9)  }
  0x6d   : > { %s3086_s10 = scalar_lea.vmem %s3428_s6, 3456  ;;  %s5091_s4 = scalar_lea.vmem %s3428_s6, 9216 }
  0x6e   : > { %p3087_p11 = scmp.ne.s32.totalorder %s3428_s6, %s3086_s10  ;;  %p3093_p8 = scmp.lt.s32.totalorder %s3428_s6, %s3428_s6 }
  0x6f   : > { %p3094_p2 = scmp.lt.s32.totalorder %s5091_s4, %s3086_s10 }
  0x70   : > { %p3088_p13 = pnand %p3087_p11, %p2844_p0 }
  0x71   : > { %p3095_p10 = por %p3094_p2, %p3093_p8 }
  0x72   : > { %p3089_p3 = pneg %p3088_p13 }
  0x74   : > { %p3096_p1 = pnand %p3095_p10, %p3089_p3 }
  0x76   : > { %3099 = shalt.err (!%p3096_p1)  }
  0x77   : > { %s5092_s11 = smov 384   ;;  %s5093_s20 = smov 18  }
  0x78   : > { %2824 = dma.hbm_to_vmem [thread:$0]  (%p2844_p0), %s3433_s21, 3456, %s3428_s6, [#allocation3], %s5092_s11, %s5092_s11, %s5093_s20 }
  0x79   : > { %s3471_s25 = scalar_lea.hbm %s3433_s21, 3072  ;;  %p188_p12 = scmp.lt.s32.totalorder %s3436_s24, 0 }
  0x7a   : > { %s189_s28 = ssub.s32 0, %s3436_s24  ;;  %p214_p4 = scmp.lt.s32.totalorder %s3217_s15, 0 }
  0x7b   : > { %s2410_s7 = smin.u32 %s189_s28, %s3436_s24  ;;  %s215_s9 = ssub.s32 0, %s3217_s15 }
  0x7c   : > { %s191_s30 = sand.u32 1, %s2410_s7   ;;  %s2414_s8 = smin.u32 %s3217_s15, %s215_s9 }
  0x7d   : > { %s192_s29 = ssub.s32 0, %s191_s30  ;;  %s217_s10 = sand.u32 1, %s2414_s8  }
  0x7e   : > { %s5216_s29 = smov (!%p188_p12, %s192_s29), %s191_s30  ;;  %s218_s18 = ssub.s32 0, %s217_s10 }
  0x7f   : > { %p2412_p5 = scmp.lt.s32.totalorder %s5216_s29, 0  ;;  %s198_s11 = sadd.s32 2, %s5216_s29 }
  0x80   : > { %s5218_s18 = smov (!%p214_p4, %s218_s18), %s217_s10  ;;  %p2845_p6 = scmp.lt.s32.totalorder %s3436_s24, 2 }
  0x81   : > { %s5220_s11 = smov (!%p2412_p5, %s198_s11), %s5216_s29  ;;  %p2416_p0 = scmp.lt.s32.totalorder %s5218_s18, 0 }
  0x82   : > { %s224_s28 = sadd.s32 2, %s5218_s18  ;;  %s206_s7 = smul.u32 288, %s5220_s11 }
  0x83   : > { %s5222_s28 = smov (!%p2416_p0, %s224_s28), %s5218_s18  ;;  %s208_s4 = scalar_lea.sflag [#allocation3], %s5220_s11 }
  0x84   : > { %s207_s9 = scalar_lea.vmem [#allocation2], %s206_s7  ;;  %s227_s8 = smul.u32 288, %s5222_s28 }
  0x85   : > { %s210_s30 = sshll.u32 %s207_s9, 4  ;;  %s3128_s20 = scalar_lea.hbm %s3433_s21, 6528  ;;  %s211_s30 = int_to_ptr.vmem [resolvable:$true] %s210_s30 }
  0x86   : > { %p3101_p7 = scmp.ne.s32.totalorder %s3471_s25, %s3128_s20  ;;  %p3105_p13 = scmp.lt.u32.totalorder %s3471_s25, %s5079_s0 }
  0x87   : > { %s5133_s18 = scalar_lea.hbm %s5079_s0, 15360  ;;  %p3108_p2 = scmp.lt.u32.totalorder %s3128_s20, %s3471_s25 }
  0x88   : > { %p3102_p9 = pnand %p3101_p7, %p2845_p6  ;;  %p3106_p3 = scmp.lt.u32.totalorder %s5133_s18, %s3128_s20 }
  0x8a   : > { %p3103_p11 = pneg %p3102_p9  ;;  %p3107_p8 = por %p3106_p3, %p3105_p13 }
  0x8c   : > { %p3109_p10 = por %p3108_p2, %p3107_p8 }
  0x8e   : > { %p3110_p1 = pnand %p3109_p10, %p3103_p11 }
  0x90   : > { %3113 = shalt.err (!%p3110_p1)  }
  0x91   : > { %s3114_s11 = scalar_lea.vmem %s211_s30, 3456  ;;  %p3121_p0 = scmp.lt.s32.totalorder %s211_s30, %s3428_s6 }
  0x92   : > { %p3115_p12 = scmp.ne.s32.totalorder %s211_s30, %s3114_s11  ;;  %s5134_s21 = scalar_lea.vmem %s3428_s6, 9216 }
  0x93   : > { %p3122_p7 = scmp.lt.s32.totalorder %s5134_s21, %s3114_s11 }
  0x94   : > { %p3116_p4 = pnand %p3115_p12, %p2845_p6 }
  0x95   : > { %p3123_p9 = por %p3122_p7, %p3121_p0 }
  0x96   : > { %p3117_p5 = pneg %p3116_p4 }
  0x98   : > { %p3124_p3 = pnand %p3123_p9, %p3117_p5 }
  0x9a   : > { %3127 = shalt.err (!%p3124_p3)  }
  0x9b   : > { %s5135_s1 = smov 18   ;;  %s5136_s23 = smov 384  }
  0x9c   : > { %2826 = dma.hbm_to_vmem [thread:$0]  (%p2845_p6), %s3471_s25, 3456, %s211_s30, %s208_s4, %s5136_s23, %s5136_s23, %s5135_s1 }
  0x9d   : > { %s3513_s20 = scalar_lea.vmem [#allocation9], %s3423_s22  ;;  %s3515_s7 = scalar_lea.vmem [#allocation2], %s227_s8 }
  0x9e   : > { %s229_s9 = scalar_lea.sflag [#allocation3], %s5222_s28 }
  0x9f   : > { %3197 = dma.done.wait %s229_s9, 3456 }
  0xa0   : > { %3198 = vsyncadd %s229_s9, 4294963840  ;;  %v334_v0 = vld [vmem:[%s3515_s7 + $0x2] sm:$0xff]  ;;  %s3242_s6 = smov 14   ;;  %s3243_s22 = smov 7   ;;  %v335_v2 = vld [vmem:[%s3515_s7 + $0xa] sm:$0xff]  ;;  %vm1313_vm8 = vcmask 1040384  }
  0xa1   : > { %v254_v1 = vld [vmem:[%s3515_s7 + $0x1] sm:$0xff]  ;;  %354 = vrot.lane.b32.xlu1 %v334_v0, %s3242_s6  ;;  %v255_v3 = vld [vmem:[%s3515_s7 + $0x9] sm:$0xff]  ;;  %v3527_v4 = vld [vmem:[%s3515_s7 + $0x18] sm:$0xff]  ;;  %s3244_s24 = smov 21   ;;  %s3245_s4 = smov 28   ;;  %vm1410_vm10 = vcmask 1046528  }
  0xa2   : > { %274 = vrot.lane.b32.xlu0 %v254_v1, %s3243_s22  ;;  %v3530_v5 = vld [vmem:[%s3515_s7 + $0x19] sm:$0xff]  ;;  %v3540_v7 = vld [vmem:[%s3515_s7 + $0x21] sm:$0xff]  ;;  %v3555_v10 = vld [vmem:[%s3515_s7 + $0x30] sm:$0xff]  ;;  %s3246_s25 = smov 35   ;;  %s3247_s28 = smov 42   ;;  %vm1515_vm11 = vcmask 1045504  }
  0xa3   : > { %v3537_v6 = vld [vmem:[%s3515_s7 + $0x20] sm:$0xff]  ;;  %v3558_v11 = vld [vmem:[%s3515_s7 + $0x31] sm:$0xff]  ;;  %v897_v15 = vld [vmem:[#allocation4 + $0x8] sm:$0xff]  ;;  %s3248_s30 = smov 49   ;;  %s3249_s8 = smov 56  }
  0xa4   : > { %v336_v8 = vld [vmem:[%s3515_s7 + $0x1a] sm:$0xff]  ;;  %v337_v9 = vld [vmem:[%s3515_s7 + $0x22] sm:$0xff]  ;;  %v338_v17 = vld [vmem:[%s3515_s7 + $0x32] sm:$0xff]  ;;  %s3250_s29 = smov 124   ;;  %s5164_s10 = sshll.u32 %s3217_s15, 3 }
  0xa5   : > { %356 = vrot.lane.b32.xlu1 %v335_v2, %s3242_s6  ;;  %v3565_v12 = vld [vmem:[%s3515_s7 + $0x39] sm:$0xff]  ;;  %v898_v18 = vld [vmem:[#allocation4 + $0x10] sm:$0xff]  ;;  %v901_v23 = vld [vmem:[#allocation4 + $0x28] sm:$0xff]  ;;  %s2538_s18 = sadd.s32 4294967295, %s5164_s10  ;;  %s3251_s11 = smov 3  }
  0xa6   : > { %276 = vrot.lane.b32.xlu0 %v255_v3, %s3243_s22  ;;  %v3571_v13 = vld [vmem:[%s3515_s7 + $0x38] sm:$0xff]  ;;  %v896_v14 = vld [vmem:[#allocation4] sm:$0xff]  ;;  %v902_v25 = vld [vmem:[#allocation4 + $0x30] sm:$0xff]  ;;  %s3252_s21 = smov 6   ;;  %s3253_s23 = smov 9  }
  0xa7   : > { %v2751_v16 = vpack.c.bf16 %v897_v15, %v896_v14  ;;  %v899_v19 = vld [vmem:[#allocation4 + $0x18] sm:$0xff]  ;;  %v900_v22 = vld [vmem:[#allocation4 + $0x20] sm:$0xff]  ;;  %v3589_v28 = vld [vmem:[%s3515_s7 + $0x48] sm:$0xff]  ;;  %s3254_s9 = smov 12   ;;  %p5199_p11 = scmp.ne.s32.totalorder %s5124_s26, 0 }
  0xa8   : > { %v2755_v20 = vpack.c.bf16 %v899_v19, %v898_v18  ;;  %v339_v21 = vld [vmem:[%s3515_s7 + $0x3a] sm:$0xff]  ;;  %v2759_v24 = vpack.c.bf16 %v901_v23, %v900_v22  ;;  %v3592_v29 = vld [vmem:[%s3515_s7 + $0x49] sm:$0xff]  ;;  %v3605_v37 = vld [vmem:[%s3515_s7 + $0x51] sm:$0xff] }
  0xa9   : > { %435 = vrot.lane.b32.xlu1 %v3527_v4, %s3244_s24  ;;  %2752 = vmatprep.subr.bf16.mxu0 %v2751_v16  ;;  %v903_v26 = vld [vmem:[#allocation4 + $0x38] sm:$0xff]  ;;  %v904_v30 = vld [vmem:[#allocation4 + $0x40] sm:$0xff]  ;;  %v905_v31 = vld [vmem:[#allocation4 + $0x48] sm:$0xff] }
  0xaa   : > { %278 = vrot.lane.b32.xlu0 %v3530_v5, %s3243_s22  ;;  %2754 = vmatpush3.bf16.msra.mxu0 %v2751_v16  ;;  %v2763_v27 = vpack.c.bf16 %v903_v26, %v902_v25  ;;  %v2767_v32 = vpack.c.bf16 %v905_v31, %v904_v30  ;;  %v906_v33 = vld [vmem:[#allocation4 + $0x50] sm:$0xff]  ;;  %v907_v34 = vld [vmem:[#allocation4 + $0x58] sm:$0xff]  ;;  %v908_v38 = vld [vmem:[#allocation4 + $0x60] sm:$0xff] }
  0xab   : > { %2756 = vmatprep.subr.bf16.mxu0 %v2755_v20  ;;  %v2771_v35 = vpack.c.bf16 %v907_v34, %v906_v33  ;;  %v3602_v36 = vld [vmem:[%s3515_s7 + $0x50] sm:$0xff]  ;;  %v909_v39 = vld [vmem:[#allocation4 + $0x68] sm:$0xff]  ;;  %v911_v42 = vld [vmem:[#allocation4 + $0x78] sm:$0xff] }
  0xac   : > { %v2775_v40 = vpack.c.bf16 %v909_v39, %v908_v38  ;;  %v910_v41 = vld [vmem:[#allocation4 + $0x70] sm:$0xff]  ;;  %v3629_v46 = vld [vmem:[%s3515_s7 + $0x60] sm:$0xff]  ;;  %v3642_v48 = vld [vmem:[%s3515_s7 + $0x68] sm:$0xff] }
  0xad   : > { %437 = vrot.lane.b32.xlu1 %v3537_v6, %s3244_s24  ;;  %v2779_v43 = vpack.c.bf16 %v911_v42, %v910_v41  ;;  %v340_v44 = vld [vmem:[%s3515_s7 + $0x4a] sm:$0xff]  ;;  %v341_v45 = vld [vmem:[%s3515_s7 + $0x52] sm:$0xff]  ;;  %v3632_v47 = vld [vmem:[%s3515_s7 + $0x61] sm:$0xff] }
  0xae   : > { %280 = vrot.lane.b32.xlu0 %v3540_v7, %s3243_s22  ;;  %2758 = vmatpush3.bf16.msra.mxu0 %v2755_v20  ;;  %v3645_v49 = vld [vmem:[%s3515_s7 + $0x69] sm:$0xff]  ;;  %v3669_v52 = vld [vmem:[%s3515_s7 + $0x78] sm:$0xff]  ;;  %v3686_v56 = vld [vmem:[%s3515_s7 + $0x80] sm:$0xff] }
  0xaf   : > { %2760 = vmatprep.subr.bf16.mxu0 %v2759_v24  ;;  %v342_v50 = vld [vmem:[%s3515_s7 + $0x62] sm:$0xff]  ;;  %v343_v51 = vld [vmem:[%s3515_s7 + $0x6a] sm:$0xff]  ;;  %v3672_v53 = vld [vmem:[%s3515_s7 + $0x79] sm:$0xff] }
  0xb0   : > { %5137 = vst [vmem:[#allocation19_spill] sm:$0xff] %v3672_v53  ;;  %v3689_v57 = vld [vmem:[%s3515_s7 + $0x81] sm:$0xff]  ;;  %v3735_v16 = vld [vmem:[%s3515_s7 + $0x90] sm:$0xff]  ;;  %v3752_v22 = vld [vmem:[%s3515_s7 + $0x98] sm:$0xff] }
  0xb1   : > { %515 = vrot.lane.b32.xlu1 %v3530_v5, %s3245_s4  ;;  %v344_v62 = vld [vmem:[%s3515_s7 + $0x7a] sm:$0xff]  ;;  %v345_v3 = vld [vmem:[%s3515_s7 + $0x82] sm:$0xff]  ;;  %5138 = vst [vmem:[#allocation20_spill] sm:$0xff] %v3735_v16  ;;  %5139 = vst [vmem:[#allocation21_spill] sm:$0xff] %v3752_v22 }
  0xb2   : > { %358 = vrot.lane.b32.xlu0 %v336_v8, %s3242_s6  ;;  %2762 = vmatpush3.bf16.msra.mxu0 %v2759_v24  ;;  %v3755_v23 = vld [vmem:[%s3515_s7 + $0x99] sm:$0xff] }
  0xb3   : > { %2764 = vmatprep.subr.bf16.mxu0 %v2763_v27  ;;  %v3771_v30 = vld [vmem:[%s3515_s7 + $0x92] sm:$0xff]  ;;  %v3788_v38 = vld [vmem:[%s3515_s7 + $0x9a] sm:$0xff] }
  0xb5   : > { %517 = vrot.lane.b32.xlu1 %v3540_v7, %s3245_s4 }
  0xb6   : > { %360 = vrot.lane.b32.xlu0 %v337_v9, %s3242_s6  ;;  %2766 = vmatpush3.bf16.msra.mxu0 %v2763_v27 }
  0xb7   : > { %2768 = vmatprep.subr.bf16.mxu0 %v2767_v32 }
  0xb9   : > { %439 = vrot.lane.b32.xlu1 %v3555_v10, %s3244_s24 }
  0xba   : > { %282 = vrot.lane.b32.xlu0 %v3558_v11, %s3243_s22  ;;  %2770 = vmatpush3.bf16.msra.mxu0 %v2767_v32 }
  0xbb   : > { %2772 = vmatprep.subr.bf16.mxu0 %v2771_v35 }
  0xbd   : > { %284 = vrot.lane.b32.xlu1 %v3565_v12, %s3243_s22 }
  0xbe   : > { %595 = vrot.lane.b32.xlu0 %v336_v8, %s3246_s25  ;;  %2774 = vmatpush3.bf16.msra.mxu0 %v2771_v35  ;;  %v234_v35 = vld [vmem:[%s3515_s7] sm:$0xff] }
  0xbf   : > { %2776 = vmatprep.subr.bf16.mxu0 %v2775_v40 }
  0xc1   : > { %597 = vrot.lane.b32.xlu1 %v337_v9, %s3246_s25 }
  0xc2   : > { %441 = vrot.lane.b32.xlu0 %v3571_v13, %s3244_s24  ;;  %2778 = vmatpush3.bf16.msra.mxu0 %v2775_v40 }
  0xc3   : > { %2780 = vmatprep.subr.bf16.mxu0 %v2779_v43 }
  0xc5   : > { %519 = vrot.lane.b32.xlu1 %v3558_v11, %s3245_s4 }
  0xc6   : > { %362 = vrot.lane.b32.xlu0 %v338_v17, %s3242_s6  ;;  %2782 = vmatpush3.bf16.msra.mxu0 %v2779_v43 }
  0xc9   : > { %364 = vrot.lane.b32.xlu1 %v339_v21, %s3242_s6 }
  0xca   : > { %676 = vrot.lane.b32.xlu0 %v3555_v10, %s3247_s28 }
  0xcd   : > { %678 = vrot.lane.b32.xlu1 %v3571_v13, %s3247_s28 }
  0xce   : > { %521 = vrot.lane.b32.xlu0 %v3565_v12, %s3245_s4 }
  0xd1   : > { %443 = vrot.lane.b32.xlu1 %v3589_v28, %s3244_s24 }
  0xd2   : > { %286 = vrot.lane.b32.xlu0 %v3592_v29, %s3243_s22 }
  0xd5   : > { %756 = vrot.lane.b32.xlu1 %v3558_v11, %s3248_s30 }
  0xd6   : > { %599 = vrot.lane.b32.xlu0 %v338_v17, %s3246_s25 }
  0xd9   : > { %445 = vrot.lane.b32.xlu1 %v3602_v36, %s3244_s24 }
  0xda   : > { %288 = vrot.lane.b32.xlu0 %v3605_v37, %s3243_s22 }
  0xdd   : > { %758 = vrot.lane.b32.xlu1 %v3565_v12, %s3248_s30 }
  0xde   : > { %601 = vrot.lane.b32.xlu0 %v339_v21, %s3246_s25 }
  0xe1   : > { %523 = vrot.lane.b32.xlu1 %v3592_v29, %s3245_s4 }
  0xe2   : > { %366 = vrot.lane.b32.xlu0 %v340_v44, %s3242_s6 }
  0xe5   : > { %836 = vrot.lane.b32.xlu1 %v338_v17, %s3249_s8  ;;  %v3738_v17 = vld [vmem:[%s3515_s7 + $0x91] sm:$0xff] }
  0xe6   : > { %680 = vrot.lane.b32.xlu0 %v3589_v28, %s3247_s28 }
  0xe9   : > { %525 = vrot.lane.b32.xlu1 %v3605_v37, %s3245_s4 }
  0xea   : > { %368 = vrot.lane.b32.xlu0 %v341_v45, %s3242_s6 }
  0xed   : > { %838 = vrot.lane.b32.xlu1 %v339_v21, %s3249_s8 }
  0xee   : > { %682 = vrot.lane.b32.xlu0 %v3602_v36, %s3247_s28 }
  0xf1   : > { %447 = vrot.lane.b32.xlu1 %v3629_v46, %s3244_s24 }
  0xf2   : > { %290 = vrot.lane.b32.xlu0 %v3632_v47, %s3243_s22 }
  0xf5   : > { %760 = vrot.lane.b32.xlu1 %v3592_v29, %s3248_s30 }
  0xf6   : > { %603 = vrot.lane.b32.xlu0 %v340_v44, %s3246_s25 }
  0xf9   : > { %449 = vrot.lane.b32.xlu1 %v3642_v48, %s3244_s24 }
  0xfa   : > { %292 = vrot.lane.b32.xlu0 %v3645_v49, %s3243_s22 }
  0xfd   : > { %762 = vrot.lane.b32.xlu1 %v3605_v37, %s3248_s30 }
  0xfe   : > { %605 = vrot.lane.b32.xlu0 %v341_v45, %s3246_s25 }
 0x101   : > { %527 = vrot.lane.b32.xlu1 %v3632_v47, %s3245_s4 }
 0x102   : > { %370 = vrot.lane.b32.xlu0 %v342_v50, %s3242_s6 }
 0x105   : > { %840 = vrot.lane.b32.xlu1 %v340_v44, %s3249_s8 }
 0x106   : > { %684 = vrot.lane.b32.xlu0 %v3629_v46, %s3247_s28 }
 0x109   : > { %529 = vrot.lane.b32.xlu1 %v3645_v49, %s3245_s4 }
 0x10a   : > { %372 = vrot.lane.b32.xlu0 %v343_v51, %s3242_s6 }
 0x10d   : > { %842 = vrot.lane.b32.xlu1 %v341_v45, %s3249_s8  ;;  %v235_v45 = vld [vmem:[%s3515_s7 + $0x8] sm:$0xff] }
 0x10e   : > { %686 = vrot.lane.b32.xlu0 %v3642_v48, %s3247_s28 }
 0x111   : > { %451 = vrot.lane.b32.xlu1 %v3669_v52, %s3244_s24 }
 0x112   : > { %294 = vrot.lane.b32.xlu0 %v3672_v53, %s3243_s22 }
 0x113   : > { %v3678_v54 = vpop.permute.xlu1 %354 }
 0x114   : > { %v3680_v55 = vpop.permute.xlu0 %274 }
 0x115   : > { %764 = vrot.lane.b32.xlu1 %v3632_v47, %s3248_s30  ;;  %v314_v41 = vadd.f32 %v3680_v55, %v234_v35  ;;  %v3811_v55 = vld [vmem:[%s3515_s7 + $0xa9] sm:$0xff] }
 0x116   : > { %607 = vrot.lane.b32.xlu0 %v342_v50, %s3246_s25 }
 0x117   : > { %v3691_v58 = vpop.permute.xlu1 %356  ;;  %v394_v44 = vadd.f32 %v3678_v54, %v314_v41 }
 0x118   : > { %v3693_v59 = vpop.permute.xlu0 %276 }
 0x119   : > { %453 = vrot.lane.b32.xlu1 %v3686_v56, %s3244_s24 }
 0x11a   : > { %296 = vrot.lane.b32.xlu0 %v3689_v57, %s3243_s22 }
 0x11b   : > { %v3699_v60 = vpop.permute.xlu1 %435 }
 0x11c   : > { %v3701_v61 = vpop.permute.xlu0 %278 }
 0x11d   : > { %766 = vrot.lane.b32.xlu1 %v3645_v49, %s3248_s30 }
 0x11e   : > { %609 = vrot.lane.b32.xlu0 %v343_v51, %s3246_s25 }
 0x11f   : > { %v3707_v63 = vpop.permute.xlu1 %437 }
 0x120   : > { %v3709_v0 = vpop.permute.xlu0 %280 }
 0x121   : > { %531 = vrot.lane.b32.xlu1 %v3672_v53, %s3245_s4 }
 0x122   : > { %374 = vrot.lane.b32.xlu0 %v344_v62, %s3242_s6 }
 0x123   : > { %v516_v1 = vpop.permute.xlu1 %515 }
 0x124   : > { %v3714_v2 = vpop.permute.xlu0 %358 }
 0x125   : > { %844 = vrot.lane.b32.xlu1 %v342_v50, %s3249_s8  ;;  %v475_v50 = vadd.f32 %v3699_v60, %v394_v44 }
 0x126   : > { %688 = vrot.lane.b32.xlu0 %v3669_v52, %s3247_s28 }
 0x127   : > { %v3720_v8 = vpop.permute.xlu1 %517  ;;  %v555_v54 = vadd.f32 %v516_v1, %v475_v50 }
 0x128   : > { %v3722_v9 = vpop.permute.xlu0 %360 }
 0x129   : > { %533 = vrot.lane.b32.xlu1 %v3689_v57, %s3245_s4 }
 0x12a   : > { %376 = vrot.lane.b32.xlu0 %v345_v3, %s3242_s6 }
 0x12b   : > { %v3727_v14 = vpop.permute.xlu1 %439 }
 0x12c   : > { %v3729_v15 = vpop.permute.xlu0 %282 }
 0x12d   : > { %846 = vrot.lane.b32.xlu1 %v343_v51, %s3249_s8  ;;  %v3808_v51 = vld [vmem:[%s3515_s7 + $0xa8] sm:$0xff] }
 0x12e   : > { %690 = vrot.lane.b32.xlu0 %v3686_v56, %s3247_s28 }
 0x12f   : > { %v3740_v18 = vpop.permute.xlu1 %284 }
 0x130   : > { %v596_v19 = vpop.permute.xlu0 %595 }
 0x131   : > { %455 = vrot.lane.b32.xlu1 %v3735_v16, %s3244_s24 }
 0x132   : > { %298 = vrot.lane.b32.xlu0 %v3738_v17, %s3243_s22 }
 0x133   : > { %v598_v20 = vpop.permute.xlu1 %597 }
 0x134   : > { %v3746_v21 = vpop.permute.xlu0 %441 }
 0x135   : > { %768 = vrot.lane.b32.xlu1 %v3672_v53, %s3248_s30 }
 0x136   : > { %611 = vrot.lane.b32.xlu0 %v344_v62, %s3246_s25 }
 0x137   : > { %v3757_v24 = vpop.permute.xlu1 %519 }
 0x138   : > { %v3759_v25 = vpop.permute.xlu0 %362 }
 0x139   : > { %457 = vrot.lane.b32.xlu1 %v3752_v22, %s3244_s24 }
 0x13a   : > { %300 = vrot.lane.b32.xlu0 %v3755_v23, %s3243_s22 }
 0x13b   : > { %v3765_v26 = vpop.permute.xlu1 %364 }
 0x13c   : > { %v677_v27 = vpop.permute.xlu0 %676 }
 0x13d   : > { %770 = vrot.lane.b32.xlu1 %v3689_v57, %s3248_s30 }
 0x13e   : > { %613 = vrot.lane.b32.xlu0 %v345_v3, %s3246_s25 }
 0x13f   : > { %v679_v31 = vpop.permute.xlu1 %678 }
 0x140   : > { %v3773_v32 = vpop.permute.xlu0 %521 }
 0x141   : > { %535 = vrot.lane.b32.xlu1 %v3738_v17, %s3245_s4 }
 0x142   : > { %378 = vrot.lane.b32.xlu0 %v3771_v30, %s3242_s6 }
 0x143   : > { %v3779_v33 = vpop.permute.xlu1 %443 }
 0x144   : > { %v3781_v34 = vpop.permute.xlu0 %286 }
 0x145   : > { %848 = vrot.lane.b32.xlu1 %v344_v62, %s3249_s8 }
 0x146   : > { %692 = vrot.lane.b32.xlu0 %v3735_v16, %s3247_s28  ;;  %v315_v16 = vadd.f32 %v3693_v59, %v235_v45  ;;  %v3831_v45 = vld [vmem:[%s3515_s7 + $0xb0] sm:$0xff] }
 0x147   : > { %v757_v39 = vpop.permute.xlu1 %756  ;;  %5140 = vst [vmem:[#allocation22_spill] sm:$0xff] %v3831_v45 }
 0x148   : > { %v3790_v40 = vpop.permute.xlu0 %599  ;;  %v395_v44 = vadd.f32 %v3691_v58, %v315_v16 }
 0x149   : > { %537 = vrot.lane.b32.xlu1 %v3755_v23, %s3245_s4 }
 0x14a   : > { %380 = vrot.lane.b32.xlu0 %v3788_v38, %s3242_s6  ;;  %v476_v59 = vadd.f32 %v3707_v63, %v395_v44 }
 0x14b   : > { %v3797_v42 = vpop.permute.xlu1 %445 }
 0x14c   : > { %v3799_v43 = vpop.permute.xlu0 %288  ;;  %v556_v53 = vadd.f32 %v3720_v8, %v476_v59 }
 0x14d   : > { %850 = vrot.lane.b32.xlu1 %v345_v3, %s3249_s8  ;;  %v635_v3 = vadd.f32 %v596_v19, %v555_v54  ;;  %v3834_v19 = vld [vmem:[%s3515_s7 + $0xb1] sm:$0xff] }
 0x14e   : > { %694 = vrot.lane.b32.xlu0 %v3752_v22, %s3247_s28  ;;  %v636_v16 = vadd.f32 %v598_v20, %v556_v53 }
 0x14f   : > { %v759_v62 = vpop.permute.xlu1 %758  ;;  %v716_v22 = vadd.f32 %v677_v27, %v635_v3 }
 0x150   : > { %v3813_v35 = vpop.permute.xlu0 %601  ;;  %v717_v27 = vadd.f32 %v679_v31, %v636_v16  ;;  %v349_v31 = vld [vmem:[%s3515_s7 + $0xb2] sm:$0xff] }
 0x151   : > { %459 = vrot.lane.b32.xlu1 %v3808_v51, %s3244_s24  ;;  %v796_v1 = vadd.f32 %v757_v39, %v716_v22  ;;  %v348_v39 = vld [vmem:[%s3515_s7 + $0xaa] sm:$0xff] }
 0x152   : > { %302 = vrot.lane.b32.xlu0 %v3811_v55, %s3243_s22  ;;  %v797_v8 = vadd.f32 %v759_v62, %v717_v27 }
 0x153   : > { %v3820_v60 = vpop.permute.xlu1 %523 }
 0x154   : > { %v3822_v41 = vpop.permute.xlu0 %366 }
 0x155   : > { %772 = vrot.lane.b32.xlu1 %v3738_v17, %s3248_s30 }
 0x156   : > { %615 = vrot.lane.b32.xlu0 %v3771_v30, %s3246_s25 }
 0x157   : > { %v837_v50 = vpop.permute.xlu1 %836 }
 0x158   : > { %v681_v54 = vpop.permute.xlu0 %680  ;;  %v876_v58 = vadd.f32 %v837_v50, %v796_v1  ;;  %v316_v50 = vadd.f32 %v3527_v4, %v3701_v61  ;;  %v317_v61 = vadd.f32 %v3537_v6, %v3709_v0 }
 0x159   : > { %461 = vrot.lane.b32.xlu1 %v3831_v45, %s3244_s24 }
 0x15a   : > { %304 = vrot.lane.b32.xlu0 %v3834_v19, %s3243_s22  ;;  %2665 = vmatprep.mubr.f32.mxu0 %v876_v58 }
 0x15b   : > { %v3841_v63 = vpop.permute.xlu1 %525 }
 0x15c   : > { %v3843_v22 = vpop.permute.xlu0 %368 }
 0x15d   : > { %774 = vrot.lane.b32.xlu1 %v3755_v23, %s3248_s30 }
 0x15e   : > { %617 = vrot.lane.b32.xlu0 %v3788_v38, %s3246_s25 }
 0x15f   : > { %v839_v3 = vpop.permute.xlu1 %838 }
 0x160   : > { %v683_v44 = vpop.permute.xlu0 %682  ;;  %v877_v59 = vadd.f32 %v839_v3, %v797_v8  ;;  %v3880_v8 = vld [vmem:[%s3515_s7 + $0xc0] sm:$0xff] }
 0x161   : > { %539 = vrot.lane.b32.xlu1 %v3811_v55, %s3245_s4 }
 0x162   : > { %382 = vrot.lane.b32.xlu0 %v348_v39, %s3242_s6  ;;  %2666 = vmatmul.mubr.f32.vlgmr.msra.gmra.mrb[0].mxu0 %v877_v59 }
 0x163   : > { %v3853_v53 = vpop.permute.xlu1 %447 }
 0x164   : > { %v3855_v20 = vpop.permute.xlu0 %290 }
 0x165   : > { %852 = vrot.lane.b32.xlu1 %v3771_v30, %s3249_s8  ;;  %v396_v30 = vadd.f32 %v3714_v2, %v316_v50 }
 0x166   : > { %696 = vrot.lane.b32.xlu0 %v3808_v51, %s3247_s28 }
 0x167   : > { %v761_v62 = vpop.permute.xlu1 %760  ;;  %v477_v27 = vadd.f32 %v3727_v14, %v396_v30  ;;  %v397_v30 = vadd.f32 %v3722_v9, %v317_v61 }
 0x168   : > { %v3862_v1 = vpop.permute.xlu0 %603 }
 0x169   : > { %541 = vrot.lane.b32.xlu1 %v3834_v19, %s3245_s4  ;;  %v557_v4 = vadd.f32 %v3757_v24, %v477_v27  ;;  %v478_v6 = vadd.f32 %v3746_v21, %v397_v30 }
 0x16a   : > { %384 = vrot.lane.b32.xlu0 %v349_v31, %s3242_s6 }
 0x16b   : > { %v3869_v58 = vpop.permute.xlu1 %449  ;;  %v637_v2 = vadd.f32 %v3790_v40, %v557_v4  ;;  %v558_v4 = vadd.f32 %v3773_v32, %v478_v6 }
 0x16c   : > { %v3871_v16 = vpop.permute.xlu0 %292 }
 0x16d   : > { %854 = vrot.lane.b32.xlu1 %v3788_v38, %s3249_s8  ;;  %v3892_v38 = vld [vmem:[%s3515_s7 + $0xc8] sm:$0xff]  ;;  %v718_v24 = vadd.f32 %v681_v54, %v637_v2  ;;  %v638_v9 = vadd.f32 %v3813_v35, %v558_v4 }
 0x16e   : > { %698 = vrot.lane.b32.xlu0 %v3831_v45, %s3247_s28  ;;  %5141 = vst [vmem:[#allocation23_spill] sm:$0xff] %v3892_v38  ;;  %v3910_v54 = vld [vmem:[%s3515_s7 + $0xc1] sm:$0xff]  ;;  %v3924_v35 = vld [vmem:[%s3515_s7 + $0xc9] sm:$0xff] }
 0x16f   : > { %v763_v3 = vpop.permute.xlu1 %762  ;;  %v798_v0 = vadd.f32 %v761_v62, %v718_v24  ;;  %v719_v62 = vadd.f32 %v683_v44, %v638_v9 }
 0x170   : > { %v3882_v59 = vpop.permute.xlu0 %605 }
 0x171   : > { %619 = vrot.lane.b32.xlu1 %v348_v39, %s3246_s25  ;;  %v799_v32 = vadd.f32 %v763_v3, %v719_v62 }
 0x172   : > { %463 = vrot.lane.b32.xlu0 %v3880_v8, %s3244_s24 }
 0x173   : > { %v3894_v14 = vpop.permute.xlu1 %527 }
 0x174   : > { %v3896_v50 = vpop.permute.xlu0 %370 }
 0x175   : > { %465 = vrot.lane.b32.xlu1 %v3892_v38, %s3244_s24 }
 0x176   : > { %776 = vrot.lane.b32.xlu0 %v3811_v55, %s3248_s30 }
 0x177   : > { %v841_v40 = vpop.permute.xlu1 %840 }
 0x178   : > { %v685_v27 = vpop.permute.xlu0 %684  ;;  %v878_v45 = vadd.f32 %v841_v40, %v798_v0  ;;  %v2472_v0 = vld [vmem:[%s3515_s7 + $0xc2] sm:$0xff] }
 0x179   : > { %778 = vrot.lane.b32.xlu1 %v3834_v19, %s3248_s30 }
 0x17a   : > { %621 = vrot.lane.b32.xlu0 %v349_v31, %s3246_s25  ;;  %2668 = vmatprep.mubr.f32.mxu0 %v878_v45 }
 0x17b   : > { %v3912_v61 = vpop.permute.xlu1 %529 }
 0x17c   : > { %v3914_v21 = vpop.permute.xlu0 %372 }
 0x17d   : > { %543 = vrot.lane.b32.xlu1 %v3910_v54, %s3245_s4 }
 0x17e   : > { %306 = vrot.lane.b32.xlu0 %v3910_v54, %s3243_s22 }
 0x17f   : > { %v843_v2 = vpop.permute.xlu1 %842 }
 0x180   : > { %v687_v30 = vpop.permute.xlu0 %686  ;;  %v879_v24 = vadd.f32 %v843_v2, %v799_v32 }
 0x181   : > { %856 = vrot.lane.b32.xlu1 %v348_v39, %s3249_s8  ;;  %v318_v39 = vadd.f32 %v3555_v10, %v3729_v15  ;;  %v319_v15 = vadd.f32 %v3571_v13, %v3740_v18 }
 0x182   : > { %700 = vrot.lane.b32.xlu0 %v3880_v8, %s3247_s28  ;;  %2669 = vmatmul.mubr.f32.gmra.mrb[2].mxu0 %v879_v24 }
 0x183   : > { %v3926_v45 = vpop.permute.xlu1 %451  ;;  %v398_v9 = vadd.f32 %v3759_v25, %v318_v39  ;;  %v399_v39 = vadd.f32 %v3765_v26, %v319_v15 }
 0x184   : > { %v3928_v44 = vpop.permute.xlu0 %294 }
 0x185   : > { %545 = vrot.lane.b32.xlu1 %v3924_v35, %s3245_s4  ;;  %v479_v62 = vadd.f32 %v3779_v33, %v398_v9 }
 0x186   : > { %308 = vrot.lane.b32.xlu0 %v3924_v35, %s3243_s22 }
 0x187   : > { %v765_v3 = vpop.permute.xlu1 %764  ;;  %v559_v10 = vadd.f32 %v3820_v60, %v479_v62  ;;  %v480_v60 = vadd.f32 %v3797_v42, %v399_v39 }
 0x188   : > { %v3934_v6 = vpop.permute.xlu0 %607 }
 0x189   : > { %858 = vrot.lane.b32.xlu1 %v349_v31, %s3249_s8  ;;  %v351_v31 = vld [vmem:[%s3515_s7 + $0xca] sm:$0xff]  ;;  %v639_v25 = vadd.f32 %v3862_v1, %v559_v10  ;;  %v560_v1 = vadd.f32 %v3841_v63, %v480_v60 }
 0x18a   : > { %702 = vrot.lane.b32.xlu0 %v3892_v38, %s3247_s28  ;;  %v3970_v38 = vld [vmem:[%s3515_s7 + $0xd8] sm:$0xff] }
 0x18b   : > { %v3942_v40 = vpop.permute.xlu1 %453  ;;  %v720_v9 = vadd.f32 %v685_v27, %v639_v25  ;;  %v640_v26 = vadd.f32 %v3882_v59, %v560_v1  ;;  %v3979_v27 = vld [vmem:[%s3515_s7 + $0xe0] sm:$0xff] }
 0x18c   : > { %v3944_v4 = vpop.permute.xlu0 %296  ;;  %v3992_v59 = vld [vmem:[%s3515_s7 + $0xd9] sm:$0xff] }
 0x18d   : > { %623 = vrot.lane.b32.xlu1 %v2472_v0, %s3246_s25  ;;  %v800_v62 = vadd.f32 %v765_v3, %v720_v9  ;;  %v721_v15 = vadd.f32 %v687_v30, %v640_v26  ;;  %5142 = vst [vmem:[#allocation24_spill] sm:$0xff] %v3992_v59 }
 0x18e   : > { %386 = vrot.lane.b32.xlu0 %v2472_v0, %s3242_s6 }
 0x18f   : > { %v767_v32 = vpop.permute.xlu1 %766 }
 0x190   : > { %v3951_v2 = vpop.permute.xlu0 %609  ;;  %v801_v63 = vadd.f32 %v767_v32, %v721_v15  ;;  %v2474_v15 = vld [vmem:[%s3515_s7 + $0xda] sm:$0xff] }
 0x191   : > { %388 = vrot.lane.b32.xlu1 %v351_v31, %s3242_s6 }
 0x192   : > { %780 = vrot.lane.b32.xlu0 %v3910_v54, %s3248_s30 }
 0x193   : > { %v3960_v24 = vpop.permute.xlu1 %531 }
 0x194   : > { %v3962_v33 = vpop.permute.xlu0 %374 }
 0x195   : > { %782 = vrot.lane.b32.xlu1 %v3924_v35, %s3248_s30 }
 0x196   : > { %625 = vrot.lane.b32.xlu0 %v351_v31, %s3246_s25 }
 0x197   : > { %v845_v13 = vpop.permute.xlu1 %844 }
 0x198   : > { %v689_v18 = vpop.permute.xlu0 %688  ;;  %v880_v10 = vadd.f32 %v845_v13, %v800_v62  ;;  %v320_v62 = vadd.f32 %v3589_v28, %v3781_v34  ;;  %v321_v34 = vadd.f32 %v3602_v36, %v3799_v43 }
 0x199   : > { %704 = vrot.lane.b32.xlu1 %v3970_v38, %s3247_s28 }
 0x19a   : > { %467 = vrot.lane.b32.xlu0 %v3970_v38, %s3244_s24  ;;  %2671 = vmatprep.mubr.f32.mxu0 %v880_v10  ;;  %v400_v10 = vadd.f32 %v3822_v41, %v320_v62 }
 0x19b   : > { %v3981_v42 = vpop.permute.xlu1 %533 }
 0x19c   : > { %v3983_v3 = vpop.permute.xlu0 %376  ;;  %v481_v26 = vadd.f32 %v3853_v53, %v400_v10  ;;  %v401_v10 = vadd.f32 %v3843_v22, %v321_v34 }
 0x19d   : > { %469 = vrot.lane.b32.xlu1 %v3979_v27, %s3244_s24 }
 0x19e   : > { %860 = vrot.lane.b32.xlu0 %v2472_v0, %s3249_s8  ;;  %v4003_v0 = vld [vmem:[%s3515_s7 + $0xe1] sm:$0xff]  ;;  %v561_v28 = vadd.f32 %v3894_v14, %v481_v26  ;;  %v482_v14 = vadd.f32 %v3869_v58, %v401_v10 }
 0x19f   : > { %v847_v25 = vpop.permute.xlu1 %846 }
 0x1a0   : > { %v691_v39 = vpop.permute.xlu0 %690  ;;  %v881_v9 = vadd.f32 %v847_v25, %v801_v63  ;;  %v641_v41 = vadd.f32 %v3934_v6, %v561_v28  ;;  %v562_v6 = vadd.f32 %v3912_v61, %v482_v14 }
 0x1a1   : > { %862 = vrot.lane.b32.xlu1 %v351_v31, %s3249_s8 }
 0x1a2   : > { %706 = vrot.lane.b32.xlu0 %v3979_v27, %s3247_s28  ;;  %2672 = vmatmul.mubr.f32.gmra.mrb[4].mxu0 %v881_v9  ;;  %v353_v9 = vld [vmem:[%s3515_s7 + $0xe2] sm:$0xff]  ;;  %v642_v22 = vadd.f32 %v3951_v2, %v562_v6  ;;  %v4056_v2 = vld [vmem:[%s3515_s7 + $0xf1] sm:$0xff] }
 0x1a3   : > { %v3994_v60 = vpop.permute.xlu1 %455  ;;  %5143 = vst [vmem:[#allocation25_spill] sm:$0xff] %v4056_v2  ;;  %v2534_v6 = vld [vmem:[%s3515_s7 + $0xf2] sm:$0xff] }
 0x1a4   : > { %v3996_v30 = vpop.permute.xlu0 %298  ;;  %v723_v58 = vadd.f32 %v691_v39, %v642_v22 }
 0x1a5   : > { %547 = vrot.lane.b32.xlu1 %v3992_v59, %s3245_s4 }
 0x1a6   : > { %310 = vrot.lane.b32.xlu0 %v3992_v59, %s3243_s22 }
 0x1a7   : > { %v769_v31 = vpop.permute.xlu1 %768 }
 0x1a8   : > { %v4005_v32 = vpop.permute.xlu0 %611 }
 0x1a9   : > { %312 = vrot.lane.b32.xlu1 %v4003_v0, %s3243_s22  ;;  %s3256_s22 = smov 24  }
 0x1aa   : > { %784 = vrot.lane.b32.xlu0 %v3992_v59, %s3248_s30  ;;  %v722_v59 = vadd.f32 %v689_v18, %v641_v41  ;;  %v2494_v18 = vld [vmem:[%s3515_s7 + $0xf0] sm:$0xff] }
 0x1ab   : > { %v4013_v13 = vpop.permute.xlu1 %457 }
 0x1ac   : > { %v4015_v1 = vpop.permute.xlu0 %300  ;;  %v802_v26 = vadd.f32 %v769_v31, %v722_v59  ;;  %v2495_v59 = vld [vmem:[%s3515_s7 + $0xf8] sm:$0xff] }
 0x1ad   : > { %786 = vrot.lane.b32.xlu1 %v4003_v0, %s3248_s30 }
 0x1ae   : > { %549 = vrot.lane.b32.xlu0 %v4003_v0, %s3245_s4 }
 0x1af   : > { %v771_v63 = vpop.permute.xlu1 %770 }
 0x1b0   : > { %v4024_v25 = vpop.permute.xlu0 %613  ;;  %v803_v61 = vadd.f32 %v771_v63, %v723_v58  ;;  %v4067_v63 = vld [vmem:[%s3515_s7 + $0xf9] sm:$0xff] }
 0x1b1   : > { %627 = vrot.lane.b32.xlu1 %v2474_v15, %s3246_s25  ;;  %5144 = vst [vmem:[#allocation26_spill] sm:$0xff] %v4067_v63 }
 0x1b2   : > { %390 = vrot.lane.b32.xlu0 %v2474_v15, %s3242_s6 }
 0x1b3   : > { %v4033_v62 = vpop.permute.xlu1 %535 }
 0x1b4   : > { %v4035_v53 = vpop.permute.xlu0 %378 }
 0x1b5   : > { %392 = vrot.lane.b32.xlu1 %v353_v9, %s3242_s6  ;;  %s3255_s6 = smov 15  }
 0x1b6   : > { %864 = vrot.lane.b32.xlu0 %v2474_v15, %s3249_s8 }
 0x1b7   : > { %v849_v36 = vpop.permute.xlu1 %848 }
 0x1b8   : > { %v693_v43 = vpop.permute.xlu0 %692  ;;  %v882_v28 = vadd.f32 %v849_v36, %v802_v26  ;;  %v322_v36 = vadd.f32 %v3629_v46, %v3855_v20  ;;  %v323_v20 = vadd.f32 %v3642_v48, %v3871_v16  ;;  %v2517_v16 = vld [vmem:[%s3515_s7 + $0x111] sm:$0xff] }
 0x1b9   : > { %866 = vrot.lane.b32.xlu1 %v353_v9, %s3249_s8 }
 0x1ba   : > { %629 = vrot.lane.b32.xlu0 %v353_v9, %s3246_s25  ;;  %2674 = vmatprep.mubr.f32.mxu0 %v882_v28 }
 0x1bb   : > { %v4046_v34 = vpop.permute.xlu1 %537 }
 0x1bc   : > { %v4048_v15 = vpop.permute.xlu0 %380 }
 0x1bd   : > { %708 = vrot.lane.b32.xlu1 %v2494_v18, %s3247_s28 }
 0x1be   : > { %471 = vrot.lane.b32.xlu0 %v2494_v18, %s3244_s24  ;;  %v402_v18 = vadd.f32 %v3896_v50, %v322_v36  ;;  %v2496_v36 = vld [vmem:[%s3515_s7 + $0x108] sm:$0xff] }
 0x1bf   : > { %v851_v31 = vpop.permute.xlu1 %850 }
 0x1c0   : > { %v695_v41 = vpop.permute.xlu0 %694  ;;  %v883_v9 = vadd.f32 %v851_v31, %v803_v61  ;;  %v483_v58 = vadd.f32 %v3926_v45, %v402_v18  ;;  %v2535_v61 = vld [vmem:[%s3515_s7 + $0xfa] sm:$0xff]  ;;  %v403_v18 = vadd.f32 %v3914_v21, %v323_v20  ;;  %v2536_v20 = vld [vmem:[%s3515_s7 + $0x10a] sm:$0xff] }
 0x1c1   : > { %710 = vrot.lane.b32.xlu1 %v2495_v59, %s3247_s28 }
 0x1c2   : > { %473 = vrot.lane.b32.xlu0 %v2495_v59, %s3244_s24  ;;  %2675 = vmatmul.mubr.f32.gmra.mrb[6].mxu0 %v883_v9  ;;  %v563_v46 = vadd.f32 %v3960_v24, %v483_v58  ;;  %v2497_v9 = vld [vmem:[%s3515_s7 + $0x110] sm:$0xff]  ;;  %v484_v58 = vadd.f32 %v3942_v40, %v403_v18 }
 0x1c3   : > { %v4058_v10 = vpop.permute.xlu1 %459 }
 0x1c4   : > { %v4060_v39 = vpop.permute.xlu0 %302  ;;  %v643_v50 = vadd.f32 %v4005_v32, %v563_v46  ;;  %v2516_v32 = vld [vmem:[%s3515_s7 + $0x109] sm:$0xff] }
 0x1c5   : > { %788 = vrot.lane.b32.xlu1 %v4056_v2, %s3248_s30 }
 0x1c6   : > { %551 = vrot.lane.b32.xlu0 %v4056_v2, %s3245_s4  ;;  %v724_v24 = vadd.f32 %v693_v43, %v643_v50  ;;  %v564_v2 = vadd.f32 %v3981_v42, %v484_v58  ;;  %v2537_v43 = vld [vmem:[%s3515_s7 + $0x112] sm:$0xff] }
 0x1c7   : > { %v773_v14 = vpop.permute.xlu1 %772 }
 0x1c8   : > { %v4069_v26 = vpop.permute.xlu0 %615  ;;  %v804_v48 = vadd.f32 %v773_v14, %v724_v24  ;;  %v644_v21 = vadd.f32 %v4024_v25, %v564_v2 }
 0x1c9   : > { %790 = vrot.lane.b32.xlu1 %v4067_v63, %s3248_s30 }
 0x1ca   : > { %553 = vrot.lane.b32.xlu0 %v4067_v63, %s3245_s4  ;;  %v725_v14 = vadd.f32 %v695_v41, %v644_v21  ;;  %v324_v41 = vadd.f32 %v3669_v52, %v3928_v44  ;;  %v325_v52 = vadd.f32 %v3686_v56, %v3944_v4 }
 0x1cb   : > { %v4078_v28 = vpop.permute.xlu1 %461 }
 0x1cc   : > { %v4080_v22 = vpop.permute.xlu0 %304 }
 0x1cd   : > { %868 = vrot.lane.b32.xlu1 %v2534_v6, %s3249_s8 }
 0x1ce   : > { %631 = vrot.lane.b32.xlu0 %v2534_v6, %s3246_s25 }
 0x1cf   : > { %v775_v59 = vpop.permute.xlu1 %774 }
 0x1d0   : > { %v4087_v31 = vpop.permute.xlu0 %617  ;;  %v805_v42 = vadd.f32 %v775_v59, %v725_v14 }
 0x1d1   : > { %870 = vrot.lane.b32.xlu1 %v2535_v61, %s3249_s8 }
 0x1d2   : > { %633 = vrot.lane.b32.xlu0 %v2535_v61, %s3246_s25 }
 0x1d3   : > { %v4097_v45 = vpop.permute.xlu1 %539 }
 0x1d4   : > { %v4099_v6 = vpop.permute.xlu0 %382 }
 0x1d5   : > { %714 = vrot.lane.b32.xlu1 %v2497_v9, %s3247_s28 }
 0x1d6   : > { %712 = vrot.lane.b32.xlu0 %v2496_v36, %s3247_s28  ;;  %s2280_s28 = sshll.u32 %s3513_s20, 4  ;;  %s5020_s28 = int_to_ptr.vmem [resolvable:$true] %s2280_s28 }
 0x1d7   : > { %v853_v61 = vpop.permute.xlu1 %852  ;;  %s3129_s10 = scalar_lea.vmem %s5020_s28, 2048 }
 0x1d8   : > { %v697_v46 = vpop.permute.xlu0 %696  ;;  %v884_v63 = vadd.f32 %v853_v61, %v804_v48  ;;  %v5146_v61 = vld [vmem:[#allocation20_spill] sm:$0xff]  ;;  %p3130_p6 = scmp.ne.s32.totalorder %s5020_s28, %s3129_s10 }
 0x1d9   : > { %794 = vrot.lane.b32.xlu1 %v2517_v16, %s3248_s30 }
 0x1da   : > { %792 = vrot.lane.b32.xlu0 %v2516_v32, %s3248_s30  ;;  %2677 = vmatprep.mubr.f32.mxu0 %v884_v63  ;;  %p3131_p13 = pnand %p3130_p6, %p5199_p11 }
 0x1db   : > { %v4113_v50 = vpop.permute.xlu1 %541 }
 0x1dc   : > { %v4115_v40 = vpop.permute.xlu0 %384  ;;  %p3132_p8 = pneg %p3131_p13 }
 0x1dd   : > { %874 = vrot.lane.b32.xlu1 %v2537_v43, %s3249_s8  ;;  %v5147_v43 = vld [vmem:[#allocation21_spill] sm:$0xff] }
 0x1de   : > { %872 = vrot.lane.b32.xlu0 %v2536_v20, %s3249_s8  ;;  %v327_v20 = vadd.f32 %v5147_v43, %v4015_v1  ;;  %s5198_s8 = sand.u32 1, %s3209_s13  }
 0x1df   : > { %v855_v9 = vpop.permute.xlu1 %854 }
 0x1e0   : > { %v699_v36 = vpop.permute.xlu0 %698  ;;  %v885_v18 = vadd.f32 %v855_v9, %v805_v42 }
 0x1e1   : > { %1119 = vrot.lane.b32.xlu1 %v3540_v7, %s3250_s29  ;;  %v404_v7 = vadd.f32 %v3962_v33, %v324_v41  ;;  %v405_v33 = vadd.f32 %v3983_v3, %v325_v52 }
 0x1e2   : > { %1117 = vrot.lane.b32.xlu0 %v3530_v5, %s3250_s29  ;;  %2678 = vmatmul.mubr.f32.gmra.mrb[8].mxu0 %v885_v18 }
 0x1e3   : > { %v620_v25 = vpop.permute.xlu1 %619  ;;  %v485_v5 = vadd.f32 %v3994_v60, %v404_v7 }
 0x1e4   : > { %v4123_v2 = vpop.permute.xlu0 %463 }
 0x1e5   : > { %1123 = vrot.lane.b32.xlu1 %v3565_v12, %s3250_s29 }
 0x1e6   : > { %1121 = vrot.lane.b32.xlu0 %v3558_v11, %s3250_s29  ;;  %v565_v11 = vadd.f32 %v4033_v62, %v485_v5 }
 0x1e7   : > { %v4131_v63 = vpop.permute.xlu1 %465 }
 0x1e8   : > { %v777_v59 = vpop.permute.xlu0 %776 }
 0x1e9   : > { %1127 = vrot.lane.b32.xlu1 %v3605_v37, %s3250_s29  ;;  %v645_v37 = vadd.f32 %v4069_v26, %v565_v11 }
 0x1ea   : > { %1125 = vrot.lane.b32.xlu0 %v3592_v29, %s3250_s29 }
 0x1eb   : > { %v779_v12 = vpop.permute.xlu1 %778  ;;  %v726_v60 = vadd.f32 %v697_v46, %v645_v37 }
 0x1ec   : > { %v622_v24 = vpop.permute.xlu0 %621 }
 0x1ed   : > { %1131 = vrot.lane.b32.xlu1 %v3645_v49, %s3250_s29  ;;  %v5145_v49 = vld [vmem:[#allocation19_spill] sm:$0xff]  ;;  %v806_v62 = vadd.f32 %v777_v59, %v726_v60 }
 0x1ee   : > { %1129 = vrot.lane.b32.xlu0 %v3632_v47, %s3250_s29  ;;  %v486_v47 = vadd.f32 %v4013_v13, %v405_v33 }
 0x1ef   : > { %v4147_v44 = vpop.permute.xlu1 %543 }
 0x1f0   : > { %v4149_v29 = vpop.permute.xlu0 %306  ;;  %v566_v4 = vadd.f32 %v4046_v34, %v486_v47 }
 0x1f1   : > { %1135 = vrot.lane.b32.xlu1 %v3689_v57, %s3250_s29 }
 0x1f2   : > { %1133 = vrot.lane.b32.xlu0 %v5145_v49, %s3250_s29  ;;  %v646_v3 = vadd.f32 %v4087_v31, %v566_v4  ;;  %v5148_v49 = vld [vmem:[#allocation22_spill] sm:$0xff] }
 0x1f3   : > { %v857_v58 = vpop.permute.xlu1 %856  ;;  %v329_v47 = vadd.f32 %v5148_v49, %v4080_v22 }
 0x1f4   : > { %v701_v56 = vpop.permute.xlu0 %700  ;;  %v886_v26 = vadd.f32 %v857_v58, %v806_v62  ;;  %v727_v16 = vadd.f32 %v699_v36, %v646_v3 }
 0x1f5   : > { %1139 = vrot.lane.b32.xlu1 %v3755_v23, %s3250_s29  ;;  %v409_v4 = vadd.f32 %v4115_v40, %v329_v47 }
 0x1f6   : > { %1137 = vrot.lane.b32.xlu0 %v3738_v17, %s3250_s29  ;;  %2680 = vmatprep.mubr.f32.mxu0 %v886_v26  ;;  %v807_v13 = vadd.f32 %v779_v12, %v727_v16 }
 0x1f7   : > { %v546_v57 = vpop.permute.xlu1 %545  ;;  %v490_v3 = vadd.f32 %v4131_v63, %v409_v4  ;;  %v330_v63 = vadd.f32 %v3880_v8, %v4149_v29 }
 0x1f8   : > { %v4163_v48 = vpop.permute.xlu0 %308 }
 0x1f9   : > { %1143 = vrot.lane.b32.xlu1 %v3834_v19, %s3250_s29  ;;  %v326_v19 = vadd.f32 %v5146_v61, %v3996_v30 }
 0x1fa   : > { %1141 = vrot.lane.b32.xlu0 %v3811_v55, %s3250_s29 }
 0x1fb   : > { %v859_v34 = vpop.permute.xlu1 %858  ;;  %v406_v21 = vadd.f32 %v4035_v53, %v326_v19 }
 0x1fc   : > { %v703_v32 = vpop.permute.xlu0 %702  ;;  %v887_v23 = vadd.f32 %v859_v34, %v807_v13 }
 0x1fd   : > { %1147 = vrot.lane.b32.xlu1 %v3924_v35, %s3250_s29  ;;  %v487_v35 = vadd.f32 %v4058_v10, %v406_v21 }
 0x1fe   : > { %1145 = vrot.lane.b32.xlu0 %v3910_v54, %s3250_s29  ;;  %2681 = vmatmul.mubr.f32.gmra.mrb[10].mxu0 %v887_v23  ;;  %v407_v54 = vadd.f32 %v4048_v15, %v327_v20 }
 0x1ff   : > { %v624_v17 = vpop.permute.xlu1 %623  ;;  %v567_v9 = vadd.f32 %v4097_v45, %v487_v35 }
 0x200   : > { %v4173_v31 = vpop.permute.xlu0 %386  ;;  %v488_v36 = vadd.f32 %v4078_v28, %v407_v54 }
 0x201   : > { %v647_v18 = vadd.f32 %v620_v25, %v567_v9  ;;  %v328_v25 = vadd.f32 %v3808_v51, %v4060_v39  ;;  %v570_v39 = vadd.f32 %v546_v57, %v490_v3  ;;  %v410_v20 = vadd.f32 %v4173_v31, %v330_v63 }
 0x202   : > { %v568_v59 = vadd.f32 %v4113_v50, %v488_v36 }
 0x203   : > { %v4177_v46 = vpop.permute.xlu1 %388  ;;  %v728_v7 = vadd.f32 %v701_v56, %v647_v18 }
 0x204   : > { %v781_v55 = vpop.permute.xlu0 %780  ;;  %v648_v53 = vadd.f32 %v622_v24, %v568_v59  ;;  %v408_v24 = vadd.f32 %v4099_v6, %v328_v25 }
 0x205   : > { %v808_v5 = vadd.f32 %v781_v55, %v728_v7 }
 0x206   : > { %v729_v11 = vadd.f32 %v703_v32, %v648_v53  ;;  %v489_v62 = vadd.f32 %v4123_v2, %v408_v24 }
 0x207   : > { %v783_v14 = vpop.permute.xlu1 %782 }
 0x208   : > { %v626_v42 = vpop.permute.xlu0 %625  ;;  %v809_v52 = vadd.f32 %v783_v14, %v729_v11  ;;  %v569_v26 = vadd.f32 %v4147_v44, %v489_v62  ;;  %v5149_v14 = vld [vmem:[#allocation23_spill] sm:$0xff] }
 0x209   : > { %v650_v32 = vadd.f32 %v626_v42, %v570_v39  ;;  %v331_v42 = vadd.f32 %v5149_v14, %v4163_v48 }
 0x20a   : > { %v649_v16 = vadd.f32 %v624_v17, %v569_v26 }
 0x20b   : > { %v705_v30 = vpop.permute.xlu1 %704 }
 0x20c   : > { %v468_v41 = vpop.permute.xlu0 %467  ;;  %v730_v34 = vadd.f32 %v705_v30, %v649_v16  ;;  %v411_v30 = vadd.f32 %v4177_v46, %v331_v42 }
 0x20d   : > { %v491_v54 = vadd.f32 %v468_v41, %v410_v20 }
 0x20f   : > { %v470_v12 = vpop.permute.xlu1 %469 }
 0x210   : > { %v861_v1 = vpop.permute.xlu0 %860  ;;  %v492_v8 = vadd.f32 %v470_v12, %v411_v30 }
 0x211   : > { %v888_v10 = vadd.f32 %v861_v1, %v808_v5 }
 0x213   : > { %2683 = vmatprep.mubr.f32.mxu0 %v888_v10  ;;  %v863_v37 = vpop.permute.xlu1 %862 }
 0x214   : > { %v707_v15 = vpop.permute.xlu0 %706  ;;  %v889_v33 = vadd.f32 %v863_v37, %v809_v52 }
 0x215   : > { %v731_v22 = vadd.f32 %v707_v15, %v650_v32 }
 0x216   : > { %2684 = vmatmul.mubr.f32.gmra.mrb[12].mxu0 %v889_v33 }
 0x217   : > { %v548_v45 = vpop.permute.xlu1 %547 }
 0x218   : > { %v311_v28 = vpop.permute.xlu0 %310  ;;  %v571_v59 = vadd.f32 %v548_v45, %v491_v54 }
 0x219   : > { %v332_v37 = vadd.f32 %v3970_v38, %v311_v28 }
 0x21b   : > { %v313_v60 = vpop.permute.xlu1 %312 }
 0x21c   : > { %v785_v50 = vpop.permute.xlu0 %784  ;;  %v333_v15 = vadd.f32 %v3979_v27, %v313_v60 }
 0x21d   : > { %v810_v6 = vadd.f32 %v785_v50, %v730_v34 }
 0x21f   : > { %v787_v58 = vpop.permute.xlu1 %786 }
 0x220   : > { %v550_v56 = vpop.permute.xlu0 %549  ;;  %v811_v2 = vadd.f32 %v787_v58, %v731_v22 }
 0x221   : > { %v572_v31 = vadd.f32 %v550_v56, %v492_v8 }
 0x223   : > { %v628_v13 = vpop.permute.xlu1 %627 }
 0x224   : > { %v391_v51 = vpop.permute.xlu0 %390  ;;  %v651_v29 = vadd.f32 %v628_v13, %v571_v59 }
 0x225   : > { %v412_v12 = vadd.f32 %v391_v51, %v332_v37 }
 0x227   : > { %v393_v23 = vpop.permute.xlu1 %392 }
 0x228   : > { %v865_v61 = vpop.permute.xlu0 %864  ;;  %v413_v25 = vadd.f32 %v393_v23, %v333_v15 }
 0x229   : > { %v890_v19 = vadd.f32 %v865_v61, %v810_v6 }
 0x22b   : > { %2686 = vmatprep.mubr.f32.mxu0 %v890_v19  ;;  %v867_v55 = vpop.permute.xlu1 %866 }
 0x22c   : > { %v630_v21 = vpop.permute.xlu0 %629  ;;  %v891_v40 = vadd.f32 %v867_v55, %v811_v2 }
 0x22d   : > { %v652_v1 = vadd.f32 %v630_v21, %v572_v31  ;;  %v1157_v31 = vlaneseq }
 0x22e   : > { %2687 = vmatmul.mubr.f32.gmra.mrb[14].mxu0 %v891_v40 }
 0x22f   : > { %v709_v44 = vpop.permute.xlu1 %708 }
 0x230   : > { %v472_v43 = vpop.permute.xlu0 %471  ;;  %v732_v5 = vadd.f32 %v709_v44, %v651_v29 }
 0x231   : > { %v493_v24 = vadd.f32 %v472_v43, %v412_v12 }
 0x233   : > { %v711_v17 = vpop.permute.xlu1 %710 }
 0x234   : > { %v474_v57 = vpop.permute.xlu0 %473  ;;  %v733_v10 = vadd.f32 %v711_v17, %v652_v1  ;;  %v4288_v1 = vstv %s2538_s18  ;;  %s3258_s18 = smov [#allocation9]  }
 0x235   : > { %v2667_v35 = vpop.f32.mrb[0].mxu0  ;;  %v494_v49 = vadd.f32 %v474_v57, %v413_v25  ;;  %vm1171_vm0 = vcmp.ge.s32.totalorder %v4288_v1, 0  ;;  %vm1181_vm1 = vcmp.lt.s32.totalorder %v4288_v1, 16 }
 0x236   : > { %1079 = vrot.lane.b32.xlu1 %v2667_v35, %s3250_s29  ;;  %v978_v9 = vpop.f32.mrb[1].mxu0  ;;  %vm1191_vm3 = vmand %vm1171_vm0, %vm1181_vm1 }
 0x237   : > { %v789_v36 = vpop.permute.xlu1 %788  ;;  %1077 = vrot.lane.b32.xlu0 %v978_v9, %s3250_s29 }
 0x238   : > { %v552_v18 = vpop.permute.xlu0 %551  ;;  %v812_v11 = vadd.f32 %v789_v36, %v732_v5 }
 0x239   : > { %v573_v58 = vadd.f32 %v552_v18, %v493_v24 }
 0x23b   : > { %v791_v7 = vpop.permute.xlu1 %790 }
 0x23c   : > { %v554_v53 = vpop.permute.xlu0 %553  ;;  %v813_v33 = vadd.f32 %v791_v7, %v733_v10 }
 0x23d   : > { %v574_v56 = vadd.f32 %v554_v53, %v494_v49 }
 0x23f   : > { %v869_v48 = vpop.permute.xlu1 %868 }
 0x240   : > { %v632_v41 = vpop.permute.xlu0 %631  ;;  %v892_v52 = vadd.f32 %v869_v48, %v812_v11  ;;  %v4290_v11 = vand.u32 127, %v1157_v31 }
 0x241   : > { %v653_v4 = vadd.f32 %v632_v41, %v573_v58 }
 0x242   : > { %2689 = vmatprep.mubr.f32.mxu0 %v892_v52  ;;  %vm1170_vm2 = vcmp.lt.s32.totalorder %v4290_v11, 3 }
 0x243   : > { %v871_v46 = vpop.permute.xlu1 %870  ;;  %vm1223_vm4 = vmand %vm1170_vm2, %vm1191_vm3 }
 0x244   : > { %v634_v45 = vpop.permute.xlu0 %633  ;;  %v893_v50 = vadd.f32 %v871_v46, %v813_v33  ;;  %v1161_v33 = vadd.s32 1, %v4288_v1  ;;  %v5167_v46 = vld [vmem:[#allocation24_spill] sm:$0xff] }
 0x245   : > { %v654_v26 = vadd.f32 %v634_v45, %v574_v56 }
 0x246   : > { %2690 = vmatmul.mubr.f32.gmra.mrb[16].mxu0 %v893_v50  ;;  %vm1172_vm5 = vcmp.ge.s32.totalorder %v1161_v33, 0  ;;  %vm1182_vm6 = vcmp.lt.s32.totalorder %v1161_v33, 16 }
 0x247   : > { %v715_v47 = vpop.permute.xlu1 %714  ;;  %vm1192_vm7 = vmand %vm1172_vm5, %vm1182_vm6 }
 0x248   : > { %v713_v62 = vpop.permute.xlu0 %712  ;;  %v735_v28 = vadd.f32 %v715_v47, %v654_v26  ;;  %vm4312_vm9 = vmand %vm1170_vm2, %vm1192_vm7 }
 0x249   : > { %v734_v27 = vadd.f32 %v713_v62, %v653_v4 }
 0x24b   : > { %v795_v3 = vpop.permute.xlu1 %794 }
 0x24c   : > { %v793_v38 = vpop.permute.xlu0 %792  ;;  %v815_v60 = vadd.f32 %v795_v3, %v735_v28 }
 0x24d   : > { %v814_v16 = vadd.f32 %v793_v38, %v734_v27 }
 0x24f   : > { %v875_v13 = vpop.permute.xlu1 %874 }
 0x250   : > { %v873_v39 = vpop.permute.xlu0 %872  ;;  %v895_v51 = vadd.f32 %v875_v13, %v815_v60 }
 0x251   : > { %v894_v34 = vadd.f32 %v873_v39, %v814_v16  ;;  %v5170_v16 = vld [vmem:[#allocation26_spill] sm:$0xff] }
 0x253   : > { %2692 = vmatprep.mubr.f32.mxu0 %v894_v34  ;;  %v1120_v44 = vpop.permute.xlu1 %1119  ;;  %v5171_v34 = vld [vmem:[#allocation25_spill] sm:$0xff] }
 0x254   : > { %2693 = vmatmul.mubr.f32.gmra.mrb[18].mxu0 %v895_v51  ;;  %v1118_v43 = vpop.permute.xlu0 %1117 }
 0x255   : > { %v4206_v32 = vpop.f32.mrb[2].mxu0 }
 0x256   : > { %5150 = vst [vmem:[#allocation19_spill] sm:$0xff] %v4206_v32  ;;  %1083 = vrot.lane.b32.xlu1 %v4206_v32, %s3250_s29  ;;  %v4210_v6 = vpop.f32.mrb[3].mxu0 }
 0x257   : > { %5151 = vst [vmem:[#allocation20_spill] sm:$0xff] %v4210_v6  ;;  %1081 = vrot.lane.b32.xlu0 %v4210_v6, %s3250_s29  ;;  %v1124_v57 = vpop.permute.xlu1 %1123 }
 0x258   : > { %v1122_v20 = vpop.permute.xlu0 %1121 }
 0x25b   : > { %v4254_v35 = vpop.permute.xlu1 %1127 }
 0x25c   : > { %v4256_v14 = vpop.permute.xlu0 %1125 }
 0x25f   : > { %v4258_v42 = vpop.permute.xlu1 %1131 }
 0x260   : > { %v4260_v54 = vpop.permute.xlu0 %1129 }
 0x263   : > { %v4262_v9 = vpop.permute.xlu1 %1135 }
 0x264   : > { %v4264_v36 = vpop.permute.xlu0 %1133 }
 0x267   : > { %v4274_v59 = vpop.permute.xlu1 %1139 }
 0x268   : > { %v4276_v8 = vpop.permute.xlu0 %1137 }
 0x26b   : > { %v4278_v29 = vpop.permute.xlu1 %1143 }
 0x26c   : > { %v4280_v7 = vpop.permute.xlu0 %1141 }
 0x26f   : > { %v4284_v53 = vpop.permute.xlu1 %1147 }
 0x270   : > { %v4286_v5 = vpop.permute.xlu0 %1145 }
 0x275   : > { %v4214_v23 = vpop.f32.mrb[4].mxu0 }
 0x276   : > { %5152 = vst [vmem:[#allocation21_spill] sm:$0xff] %v4214_v23  ;;  %1087 = vrot.lane.b32.xlu1 %v4214_v23, %s3250_s29  ;;  %v4218_v61 = vpop.f32.mrb[5].mxu0 }
 0x277   : > { %5153 = vst [vmem:[#allocation22_spill] sm:$0xff] %v4218_v61  ;;  %1085 = vrot.lane.b32.xlu0 %v4218_v61, %s3250_s29 }
 0x295   : > { %v4222_v22 = vpop.f32.mrb[6].mxu0 }
 0x296   : > { %5154 = vst [vmem:[#allocation23_spill] sm:$0xff] %v4222_v22  ;;  %1091 = vrot.lane.b32.xlu1 %v4222_v22, %s3250_s29  ;;  %v4226_v19 = vpop.f32.mrb[7].mxu0 }
 0x297   : > { %5155 = vst [vmem:[#allocation27_spill] sm:$0xff] %v4226_v19  ;;  %1089 = vrot.lane.b32.xlu0 %v4226_v19, %s3250_s29 }
 0x2a8   : > { %v1080_v48 = vpop.permute.xlu1 %1079 }
 0x2a9   : > { %v1078_v41 = vpop.permute.xlu0 %1077  ;;  %v1234_v37 = vadd.f32 %v1120_v44, %v1080_v48 }
 0x2aa   : > { %v1233_v15 = vadd.f32 %v1118_v43, %v1078_v41 }
 0x2ab   : > { %v1274_v45 = vsel %vm1223_vm4, %v1234_v37, 0.0 }
 0x2ac   : > { %v1273_v12 = vsel %vm1223_vm4, %v1233_v15, 0.0  ;;  %v1315_v24 = vrot.slane %v1274_v45, 7 }
 0x2ad   : > { %v1314_v49 = vrot.slane %v1273_v12, 7  ;;  %v1162_v12 = vadd.s32 2, %v4288_v1 }
 0x2ae   : > { %v1384_v56 = vsel %vm1313_vm8, %v1315_v24, 0.0 }
 0x2af   : > { %v4318_v4 = vsel %vm1313_vm8, %v1314_v49, %v1315_v24  ;;  %v4322_v3 = vsel %vm1313_vm8, 0.0, %v1314_v49  ;;  %v1414_v27 = vrot.slane %v1384_v56, 1  ;;  %v1519_v44 = vrot.slane %v1384_v56, 2 }
 0x2b0   : > { %v1412_v60 = vrot.slane %v4318_v4, 1  ;;  %v1411_v13 = vrot.slane %v4322_v3, 1  ;;  %v1516_v31 = vrot.slane %v4322_v3, 2  ;;  %vm1173_vm12 = vcmp.ge.s32.totalorder %v1162_v12, 0 }
 0x2b1   : > { %vm1183_vm13 = vcmp.lt.s32.totalorder %v1162_v12, 16 }
 0x2b2   : > { %v1415_v43 = vsel %vm1410_vm10, %v1412_v60, %v1414_v27  ;;  %vm1193_vm14 = vmand %vm1173_vm12, %vm1183_vm13  ;;  %v1969_v27 = vld [vmem:[#allocation7 + $0x58] sm:$0xff] }
 0x2b3   : > { %vm4370_vm15 = vmand %vm1170_vm2, %vm1193_vm14 }
 0x2b5   : > { %v4230_v2 = vpop.f32.mrb[8].mxu0 }
 0x2b6   : > { %5156 = vst [vmem:[#allocation28_spill] sm:$0xff] %v4230_v2  ;;  %1095 = vrot.lane.b32.xlu1 %v4230_v2, %s3250_s29  ;;  %v4234_v55 = vpop.f32.mrb[9].mxu0 }
 0x2b7   : > { %5157 = vst [vmem:[#allocation29_spill] sm:$0xff] %v4234_v55  ;;  %1093 = vrot.lane.b32.xlu0 %v4234_v55, %s3250_s29  ;;  %v1167_v55 = vadd.s32 7, %v4288_v1 }
 0x2c8   : > { %v1084_v25 = vpop.permute.xlu1 %1083 }
 0x2c9   : > { %v1082_v50 = vpop.permute.xlu0 %1081  ;;  %v1236_v47 = vadd.f32 %v1124_v57, %v1084_v25  ;;  %v1517_v57 = vrot.slane %v4318_v4, 2 }
 0x2ca   : > { %v1235_v62 = vadd.f32 %v1122_v20, %v1082_v50  ;;  %v1413_v20 = vsel %vm1410_vm10, %v1411_v13, %v1412_v60 }
 0x2cb   : > { %v1276_v38 = vsel %vm4312_vm9, %v1236_v47, 0.0  ;;  %v1520_v37 = vsel %vm1515_vm11, %v1517_v57, %v1519_v44  ;;  %v1518_v15 = vsel %vm1515_vm11, %v1516_v31, %v1517_v57  ;;  %v1962_v57 = vld [vmem:[#allocation7 + $0x20] sm:$0xff] }
 0x2cc   : > { %v1275_v28 = vsel %vm4312_vm9, %v1235_v62, 0.0  ;;  %v1318_v39 = vrot.slane %v1276_v38, 7  ;;  %v1958_v38 = vld [vmem:[#allocation7] sm:$0xff] }
 0x2cd   : > { %v1317_v51 = vrot.slane %v1275_v28, 7  ;;  %v1959_v28 = vld [vmem:[#allocation7 + $0x8] sm:$0xff] }
 0x2ce   : > { %v1385_v45 = vsel %vm1313_vm8, %v1318_v39, 0.0 }
 0x2cf   : > { %v4341_v48 = vsel %vm1313_vm8, %v1317_v51, %v1318_v39  ;;  %v4345_v41 = vsel %vm1313_vm8, 0.0, %v1317_v51  ;;  %v1419_v25 = vrot.slane %v1385_v45, 1  ;;  %v1960_v39 = vld [vmem:[#allocation7 + $0x10] sm:$0xff]  ;;  %v1961_v51 = vld [vmem:[#allocation7 + $0x18] sm:$0xff] }
 0x2d0   : > { %v1416_v33 = vrot.slane %v4345_v41, 1  ;;  %v1521_v24 = vrot.slane %v4345_v41, 2  ;;  %v1522_v47 = vrot.slane %v4341_v48, 2 }
 0x2d1   : > { %v4238_v21 = vpop.f32.mrb[10].mxu0 }
 0x2d2   : > { %5158 = vst [vmem:[#allocation30_spill] sm:$0xff] %v4238_v21  ;;  %1099 = vrot.lane.b32.xlu1 %v4238_v21, %s3250_s29  ;;  %v4242_v40 = vpop.f32.mrb[11].mxu0 }
 0x2d3   : > { %5159 = vst [vmem:[#allocation31_spill] sm:$0xff] %v4242_v40  ;;  %1097 = vrot.lane.b32.xlu0 %v4242_v40, %s3250_s29 }
 0x2e8   : > { %v1088_v58 = vpop.permute.xlu1 %1087 }
 0x2e9   : > { %v4246_v63 = vpop.f32.mrb[12].mxu0  ;;  %v1086_v62 = vpop.permute.xlu0 %1085  ;;  %v1238_v60 = vadd.f32 %v4254_v35, %v1088_v58  ;;  %v2787_v35 = vpack.c.bf16 %v1961_v51, %v1960_v39  ;;  %v1971_v39 = vld [vmem:[#allocation7 + $0x68] sm:$0xff] }
 0x2ea   : > { %5160 = vst [vmem:[#allocation32_spill] sm:$0xff] %v4246_v63  ;;  %1103 = vrot.lane.b32.xlu1 %v4246_v63, %s3250_s29  ;;  %v4250_v17 = vpop.f32.mrb[13].mxu0  ;;  %v1237_v56 = vadd.f32 %v4256_v14, %v1086_v62 }
 0x2eb   : > { %5161 = vst [vmem:[#allocation33_spill] sm:$0xff] %v4250_v17  ;;  %1101 = vrot.lane.b32.xlu0 %v4250_v17, %s3250_s29 }
 0x2ec   : > { %v1277_v14 = vsel %vm4370_vm15, %v1237_v56, 0.0 }
 0x2ed   : > { %v1320_v44 = vrot.slane %v1277_v14, 7 }
 0x301   : > { %v4266_v18 = vpop.f32.mrb[14].mxu0 }
 0x302   : > { %5162 = vst [vmem:[#allocation34_spill] sm:$0xff] %v4266_v18  ;;  %1107 = vrot.lane.b32.xlu1 %v4266_v18, %s3250_s29  ;;  %v4270_v30 = vpop.f32.mrb[15].mxu0 }
 0x303   : > { %5163 = vst [vmem:[#allocation35_spill] sm:$0xff] %v4270_v30  ;;  %1105 = vrot.lane.b32.xlu0 %v4270_v30, %s3250_s29 }
 0x319   : > { %v4294_v10 = vpop.f32.mrb[16].mxu0 }
 0x31a   : > { %5165 = vst [vmem:[#allocation36_spill] sm:$0xff] %v4294_v10  ;;  %1111 = vrot.lane.b32.xlu1 %v4294_v10, %s3250_s29  ;;  %v4299_v52 = vpop.f32.mrb[17].mxu0 }
 0x31b   : > { %5166 = vst [vmem:[#allocation37_spill] sm:$0xff] %v4299_v52  ;;  %1109 = vrot.lane.b32.xlu0 %v4299_v52, %s3250_s29 }
 0x31e   : > { %1151 = vrot.lane.b32.xlu1 %v4003_v0, %s3250_s29 }
 0x31f   : > { %1149 = vrot.lane.b32.xlu0 %v5167_v46, %s3250_s29  ;;  %v1417_v46 = vrot.slane %v4341_v48, 1 }
 0x321   : > { %v1418_v50 = vsel %vm1410_vm10, %v1416_v33, %v1417_v46  ;;  %v1420_v49 = vsel %vm1410_vm10, %v1417_v46, %v1419_v25  ;;  %v1964_v46 = vld [vmem:[#allocation7 + $0x30] sm:$0xff] }
 0x327   : > { %v2694_v0 = vpop.f32.mrb[18].mxu0 }
 0x328   : > { %1115 = vrot.lane.b32.xlu1 %v2694_v0, %s3250_s29  ;;  %v1068_v26 = vpop.f32.mrb[19].mxu0  ;;  %v1524_v0 = vrot.slane %v1385_v45, 2  ;;  %v1965_v45 = vld [vmem:[#allocation7 + $0x38] sm:$0xff] }
 0x329   : > { %1113 = vrot.lane.b32.xlu0 %v1068_v26, %s3250_s29  ;;  %v1523_v26 = vsel %vm1515_vm11, %v1521_v24, %v1522_v47  ;;  %v2795_v12 = vpack.c.bf16 %v1965_v45, %v1964_v46 }
 0x32a   : > { %v1525_v13 = vsel %vm1515_vm11, %v1522_v47, %v1524_v0  ;;  %v1967_v47 = vld [vmem:[#allocation7 + $0x48] sm:$0xff]  ;;  %v1163_v0 = vadd.s32 3, %v4288_v1 }
 0x32c   : > { %1155 = vrot.lane.b32.xlu1 %v5170_v16, %s3250_s29  ;;  %v2783_v16 = vpack.c.bf16 %v1959_v28, %v1958_v38  ;;  %v1968_v28 = vld [vmem:[#allocation7 + $0x50] sm:$0xff]  ;;  %vm1174_vm0 = vcmp.ge.s32.totalorder %v1163_v0, 0  ;;  %vm1184_vm1 = vcmp.lt.s32.totalorder %v1163_v0, 16 }
 0x32d   : > { %1153 = vrot.lane.b32.xlu0 %v5171_v34, %s3250_s29  ;;  %v1278_v34 = vsel %vm4370_vm15, %v1238_v60, 0.0  ;;  %v2803_v60 = vpack.c.bf16 %v1969_v27, %v1968_v28  ;;  %vm1194_vm3 = vmand %vm1174_vm0, %vm1184_vm1  ;;  %s5027_s29 = scalar_lea.sflag [#allocation6], %s5198_s8 }
 0x32e   : > { %2784 = vmatprep.subr.bf16.mxu1 %v2783_v16  ;;  %vm1226_vm4 = vmand %vm1170_vm2, %vm1194_vm3 }
 0x32f   : > { %2786 = vmatpush3.bf16.msra.mxu1 %v2783_v16 }
 0x330   : > { %1469 = vrot.lane.b32.xlu1 %v1415_v43, %s3251_s11  ;;  %2788 = vmatprep.subr.bf16.mxu1 %v2787_v35  ;;  %v1321_v43 = vrot.slane %v1278_v34, 7  ;;  %v1090_v34 = vpop.permute.xlu0 %1089 }
 0x331   : > { %1467 = vrot.lane.b32.xlu0 %v1413_v20, %s3251_s11  ;;  %v1963_v20 = vld [vmem:[#allocation7 + $0x28] sm:$0xff] }
 0x332   : > { %v2791_v31 = vpack.c.bf16 %v1963_v20, %v1962_v57  ;;  %v4392_v33 = vsel %vm1313_vm8, %v1320_v44, %v1321_v43  ;;  %v1973_v57 = vld [vmem:[#allocation7 + $0x78] sm:$0xff]  ;;  %v1239_v20 = vadd.f32 %v4260_v54, %v1090_v34 }
 0x333   : > { %2790 = vmatpush3.bf16.msra.mxu1 %v2787_v35  ;;  %v1527_v38 = vrot.slane %v4392_v33, 2  ;;  %v1092_v35 = vpop.permute.xlu1 %1091 }
 0x334   : > { %1574 = vrot.lane.b32.xlu1 %v1520_v37, %s3252_s21  ;;  %v4386_v37 = vsel %vm1313_vm8, 0.0, %v1320_v44  ;;  %2792 = vmatprep.subr.bf16.mxu1 %v2791_v31  ;;  %v1279_v46 = vsel %vm1226_vm4, %v1239_v20, 0.0 }
 0x335   : > { %1572 = vrot.lane.b32.xlu0 %v1518_v15, %s3252_s21  ;;  %v1386_v15 = vsel %vm1313_vm8, %v1321_v43, 0.0  ;;  %v1421_v24 = vrot.slane %v4386_v37, 1  ;;  %v1972_v43 = vld [vmem:[#allocation7 + $0x70] sm:$0xff] }
 0x336   : > { %v1424_v25 = vrot.slane %v1386_v15, 1  ;;  %v1529_v16 = vrot.slane %v1386_v15, 2  ;;  %v1240_v15 = vadd.f32 %v4258_v42, %v1092_v35 }
 0x337   : > { %2794 = vmatpush3.bf16.msra.mxu1 %v2791_v31  ;;  %v2811_v31 = vpack.c.bf16 %v1973_v57, %v1972_v43  ;;  %v1096_v0 = vpop.permute.xlu1 %1095 }
 0x338   : > { %1620 = vrot.lane.b32.xlu1 %v4345_v41, %s3253_s23  ;;  %2796 = vmatprep.subr.bf16.mxu1 %v2795_v12  ;;  %v1530_v44 = vsel %vm1515_vm11, %v1527_v38, %v1529_v16  ;;  %v1280_v45 = vsel %vm1226_vm4, %v1240_v15, 0.0  ;;  %v1242_v27 = vadd.f32 %v4262_v9, %v1096_v0 }
 0x339   : > { %1471 = vrot.lane.b32.xlu0 %v1418_v50, %s3251_s11  ;;  %v1324_v54 = vrot.slane %v1280_v45, 7 }
 0x33b   : > { %2798 = vmatpush3.bf16.msra.mxu1 %v2795_v12  ;;  %v1323_v12 = vrot.slane %v1279_v46, 7 }
 0x33c   : > { %1622 = vrot.lane.b32.xlu1 %v4341_v48, %s3253_s23 }
 0x33d   : > { %1473 = vrot.lane.b32.xlu0 %v1420_v49, %s3251_s11  ;;  %v4430_v42 = vsel %vm1313_vm8, %v1323_v12, %v1324_v54 }
 0x33e   : > { %v1532_v28 = vrot.slane %v4430_v42, 2 }
 0x340   : > { %1677 = vrot.lane.b32.xlu1 %v1418_v50, %s3254_s9  ;;  %v1422_v50 = vrot.slane %v4392_v33, 1 }
 0x341   : > { %1576 = vrot.lane.b32.xlu0 %v1523_v26, %s3252_s21 }
 0x342   : > { %v1425_v58 = vsel %vm1410_vm10, %v1422_v50, %v1424_v25  ;;  %v1423_v56 = vsel %vm1410_vm10, %v1421_v24, %v1422_v50  ;;  %v4425_v25 = vsel %vm1313_vm8, 0.0, %v1323_v12  ;;  %v1427_v24 = vrot.slane %v4430_v42, 1 }
 0x343   : > { %v1426_v50 = vrot.slane %v4425_v25, 1 }
 0x344   : > { %1679 = vrot.lane.b32.xlu1 %v1420_v49, %s3254_s9  ;;  %v1966_v49 = vld [vmem:[#allocation7 + $0x40] sm:$0xff] }
 0x345   : > { %1578 = vrot.lane.b32.xlu0 %v1525_v13, %s3252_s21  ;;  %v2799_v62 = vpack.c.bf16 %v1967_v47, %v1966_v49  ;;  %v1387_v49 = vsel %vm1313_vm8, %v1324_v54, 0.0  ;;  %v1164_v47 = vadd.s32 4, %v4288_v1 }
 0x346   : > { %v1534_v16 = vrot.slane %v1387_v49, 2 }
 0x347   : > { %2800 = vmatprep.subr.bf16.mxu1 %v2799_v62  ;;  %vm1175_vm5 = vcmp.ge.s32.totalorder %v1164_v47, 0  ;;  %vm1185_vm6 = vcmp.lt.s32.totalorder %v1164_v47, 16 }
 0x348   : > { %1734 = vrot.lane.b32.xlu1 %v1525_v13, %s3255_s6  ;;  %2802 = vmatpush3.bf16.msra.mxu1 %v2799_v62  ;;  %v1970_v13 = vld [vmem:[#allocation7 + $0x60] sm:$0xff]  ;;  %v1429_v62 = vrot.slane %v1387_v49, 1  ;;  %vm1195_vm7 = vmand %vm1175_vm5, %vm1185_vm6  ;;  %vm1178_vm5 = vcmp.ge.s32.totalorder %v1167_v55, 0  ;;  %vm1188_vm6 = vcmp.lt.s32.totalorder %v1167_v55, 16 }
 0x349   : > { %1732 = vrot.lane.b32.xlu0 %v1523_v26, %s3255_s6  ;;  %v1526_v26 = vrot.slane %v4386_v37, 2  ;;  %2804 = vmatprep.subr.bf16.mxu1 %v2803_v60  ;;  %v2807_v51 = vpack.c.bf16 %v1971_v39, %v1970_v13  ;;  %vm1227_vm9 = vmand %vm1170_vm2, %vm1195_vm7 }
 0x34a   : > { %v1282_v13 = vsel %vm1227_vm9, %v1242_v27, 0.0  ;;  %vm1198_vm7 = vmand %vm1178_vm5, %vm1188_vm6 }
 0x34b   : > { %v1528_v14 = vsel %vm1515_vm11, %v1526_v26, %v1527_v38  ;;  %v1430_v26 = vsel %vm1410_vm10, %v1427_v24, %v1429_v62  ;;  %v1531_v38 = vrot.slane %v4425_v25, 2  ;;  %v1327_v34 = vrot.slane %v1282_v13, 7 }
 0x34c   : > { %1624 = vrot.lane.b32.xlu1 %v4386_v37, %s3253_s23  ;;  %2806 = vmatpush3.bf16.msra.mxu1 %v2803_v60 }
 0x34d   : > { %1626 = vrot.lane.b32.xlu0 %v4392_v33, %s3253_s23  ;;  %2808 = vmatprep.subr.bf16.mxu1 %v2807_v51  ;;  %v1388_v20 = vsel %vm1313_vm8, %v1327_v34, 0.0 }
 0x34e   : > { %v1434_v46 = vrot.slane %v1388_v20, 1 }
 0x350   : > { %1782 = vrot.lane.b32.xlu1 %v4392_v33, %s5135_s1  ;;  %2810 = vmatpush3.bf16.msra.mxu1 %v2807_v51  ;;  %v1535_v51 = vsel %vm1515_vm11, %v1532_v28, %v1534_v16 }
 0x351   : > { %1780 = vrot.lane.b32.xlu0 %v4386_v37, %s5135_s1  ;;  %2812 = vmatprep.subr.bf16.mxu1 %v2811_v31 }
 0x354   : > { %1477 = vrot.lane.b32.xlu1 %v1425_v58, %s3251_s11  ;;  %2814 = vmatpush3.bf16.msra.mxu1 %v2811_v31  ;;  %v1165_v31 = vadd.s32 5, %v4288_v1 }
 0x355   : > { %1475 = vrot.lane.b32.xlu0 %v1423_v56, %s3251_s11 }
 0x356   : > { %vm1176_vm12 = vcmp.ge.s32.totalorder %v1165_v31, 0  ;;  %vm1186_vm13 = vcmp.lt.s32.totalorder %v1165_v31, 16 }
 0x357   : > { %vm1196_vm14 = vmand %vm1176_vm12, %vm1186_vm13  ;;  %vm1940_vm12 = vcmp.eq.s32.totalorder %v4290_v11, 27 }
 0x358   : > { %1681 = vrot.lane.b32.xlu1 %v1423_v56, %s3254_s9  ;;  %vm1228_vm15 = vmand %vm1170_vm2, %vm1196_vm14 }
 0x359   : > { %1580 = vrot.lane.b32.xlu0 %v1528_v14, %s3252_s21 }
 0x35c   : > { %1582 = vrot.lane.b32.xlu1 %v1530_v44, %s3252_s21 }
 0x35d   : > { %1683 = vrot.lane.b32.xlu0 %v1425_v58, %s3254_s9 }
 0x360   : > { %1837 = vrot.lane.b32.xlu1 %v1423_v56, %s3244_s24  ;;  %v1094_v56 = vpop.permute.xlu0 %1093 }
 0x361   : > { %1736 = vrot.lane.b32.xlu0 %v1528_v14, %s3255_s6  ;;  %v1241_v60 = vadd.f32 %v4264_v36, %v1094_v56 }
 0x363   : > { %v1281_v39 = vsel %vm1227_vm9, %v1241_v60, 0.0  ;;  %v1539_v60 = vrot.slane %v1388_v20, 2  ;;  %vm4655_vm9 = vmand %vm1170_vm2, %vm1198_vm7 }
 0x364   : > { %1839 = vrot.lane.b32.xlu1 %v1425_v58, %s3244_s24  ;;  %v1428_v58 = vsel %vm1410_vm10, %v1426_v50, %v1427_v24  ;;  %v1326_v9 = vrot.slane %v1281_v39, 7  ;;  %v1098_v15 = vpop.permute.xlu0 %1097 }
 0x365   : > { %1738 = vrot.lane.b32.xlu0 %v1530_v44, %s3255_s6  ;;  %v1243_v0 = vadd.f32 %v4276_v8, %v1098_v15 }
 0x366   : > { %v4462_v36 = vsel %vm1313_vm8, 0.0, %v1326_v9  ;;  %v4465_v35 = vsel %vm1313_vm8, %v1326_v9, %v1327_v34 }
 0x367   : > { %v1431_v43 = vrot.slane %v4462_v36, 1  ;;  %v1432_v57 = vrot.slane %v4465_v35, 1  ;;  %v1536_v49 = vrot.slane %v4462_v36, 2  ;;  %v1537_v47 = vrot.slane %v4465_v35, 2 }
 0x368   : > { %1892 = vrot.lane.b32.xlu1 %v1528_v14, %s3256_s22  ;;  %v1533_v14 = vsel %vm1515_vm11, %v1531_v38, %v1532_v28  ;;  %v4479_v54 = vpop.permute.xlu0 %1101  ;;  %v1283_v27 = vsel %vm1228_vm15, %v1243_v0, 0.0 }
 0x369   : > { %1784 = vrot.lane.b32.xlu0 %v4425_v25, %s5135_s1  ;;  %v1433_v12 = vsel %vm1410_vm10, %v1431_v43, %v1432_v57  ;;  %v1435_v24 = vsel %vm1410_vm10, %v1432_v57, %v1434_v46  ;;  %v1329_v8 = vrot.slane %v1283_v27, 7  ;;  %v1540_v39 = vsel %vm1515_vm11, %v1537_v47, %v1539_v60 }
 0x36c   : > { %1894 = vrot.lane.b32.xlu1 %v1530_v44, %s3256_s22  ;;  %v1100_v44 = vpop.permute.xlu1 %1099 }
 0x36d   : > { %1786 = vrot.lane.b32.xlu0 %v4430_v42, %s5135_s1 }
 0x370   : > { %1628 = vrot.lane.b32.xlu1 %v4425_v25, %s3253_s23  ;;  %v4474_v45 = vpop.permute.xlu1 %1103 }
 0x371   : > { %1479 = vrot.lane.b32.xlu0 %v1428_v58, %s3251_s11 }
 0x374   : > { %1630 = vrot.lane.b32.xlu1 %v4430_v42, %s3253_s23  ;;  %v4482_v50 = vpop.permute.xlu1 %1107 }
 0x375   : > { %1481 = vrot.lane.b32.xlu0 %v1430_v26, %s3251_s11  ;;  %v4488_v62 = vpop.permute.xlu0 %1105 }
 0x378   : > { %1685 = vrot.lane.b32.xlu1 %v1428_v58, %s3254_s9 }
 0x379   : > { %1584 = vrot.lane.b32.xlu0 %v1533_v14, %s3252_s21 }
 0x37c   : > { %1687 = vrot.lane.b32.xlu1 %v1430_v26, %s3254_s9 }
 0x37d   : > { %1586 = vrot.lane.b32.xlu0 %v1535_v51, %s3252_s21 }
 0x380   : > { %1841 = vrot.lane.b32.xlu1 %v1428_v58, %s3244_s24  ;;  %v1244_v58 = vadd.f32 %v4274_v59, %v1100_v44 }
 0x381   : > { %1740 = vrot.lane.b32.xlu0 %v1533_v14, %s3255_s6 }
 0x382   : > { %v1284_v28 = vsel %vm1228_vm15, %v1244_v58, 0.0  ;;  %v1166_v58 = vadd.s32 6, %v4288_v1 }
 0x383   : > { %v1330_v59 = vrot.slane %v1284_v28, 7 }
 0x384   : > { %1632 = vrot.lane.b32.xlu1 %v4462_v36, %s3253_s23  ;;  %vm1177_vm0 = vcmp.ge.s32.totalorder %v1166_v58, 0  ;;  %vm1187_vm1 = vcmp.lt.s32.totalorder %v1166_v58, 16 }
 0x385   : > { %1742 = vrot.lane.b32.xlu0 %v1535_v51, %s3255_s6  ;;  %v4512_v34 = vsel %vm1313_vm8, %v1329_v8, %v1330_v59  ;;  %v1389_v46 = vsel %vm1313_vm8, %v1330_v59, 0.0  ;;  %vm1197_vm3 = vmand %vm1177_vm0, %vm1187_vm1 }
 0x386   : > { %5174 = vst [vmem:[#allocation24_spill] sm:$0xff] %v4512_v34  ;;  %v1437_v57 = vrot.slane %v4512_v34, 1  ;;  %vm1229_vm4 = vmand %vm1170_vm2, %vm1197_vm3 }
 0x388   : > { %1634 = vrot.lane.b32.xlu1 %v4465_v35, %s3253_s23 }
 0x389   : > { %1483 = vrot.lane.b32.xlu0 %v1433_v12, %s3251_s11 }
 0x38c   : > { %1843 = vrot.lane.b32.xlu1 %v1430_v26, %s3244_s24  ;;  %v4495_v56 = vpop.permute.xlu1 %1111  ;;  %v1538_v26 = vsel %vm1515_vm11, %v1536_v49, %v1537_v47  ;;  %v1439_v47 = vrot.slane %v1389_v46, 1 }
 0x38d   : > { %1485 = vrot.lane.b32.xlu0 %v1435_v24, %s3251_s11  ;;  %v4499_v38 = vpop.permute.xlu0 %1109 }
 0x38e   : > { %v4550_v27 = vsel %vm1410_vm10, %v1437_v57, %v1439_v47 }
 0x390   : > { %1689 = vrot.lane.b32.xlu1 %v1433_v12, %s3254_s9  ;;  %v4505_v16 = vpop.permute.xlu1 %1151 }
 0x391   : > { %1588 = vrot.lane.b32.xlu0 %v1538_v26, %s3252_s21  ;;  %v4507_v13 = vpop.permute.xlu0 %1149 }
 0x394   : > { %1896 = vrot.lane.b32.xlu1 %v1533_v14, %s3256_s22  ;;  %v4516_v14 = vsel %vm1313_vm8, 0.0, %v1329_v8  ;;  %v1542_v8 = vrot.slane %v4512_v34, 2 }
 0x395   : > { %1788 = vrot.lane.b32.xlu0 %v4462_v36, %s5135_s1  ;;  %v1436_v43 = vrot.slane %v4516_v14, 1  ;;  %v1541_v59 = vrot.slane %v4516_v14, 2 }
 0x397   : > { %v1438_v15 = vsel %vm1410_vm10, %v1436_v43, %v1437_v57  ;;  %v1246_v43 = vadd.f32 %v4278_v29, %v4474_v45  ;;  %v1245_v57 = vadd.f32 %v4280_v7, %v4479_v54  ;;  %v1544_v7 = vrot.slane %v1389_v46, 2 }
 0x398   : > { %1691 = vrot.lane.b32.xlu1 %v1435_v24, %s3254_s9 }
 0x399   : > { %1590 = vrot.lane.b32.xlu0 %v1540_v39, %s3252_s21  ;;  %v1286_v52 = vsel %vm1229_vm4, %v1246_v43, 0.0  ;;  %v1285_v29 = vsel %vm1229_vm4, %v1245_v57, 0.0  ;;  %v4590_v43 = vsel %vm1515_vm11, %v1542_v8, %v1544_v7 }
 0x39a   : > { %v4518_v9 = vpop.permute.xlu1 %1115  ;;  %v1333_v54 = vrot.slane %v1286_v52, 7  ;;  %v1332_v30 = vrot.slane %v1285_v29, 7 }
 0x39b   : > { %v4520_v44 = vpop.permute.xlu0 %1113 }
 0x39c   : > { %1898 = vrot.lane.b32.xlu1 %v1535_v51, %s3256_s22  ;;  %v4593_v57 = vsel %vm1313_vm8, %v1332_v30, %v1333_v54  ;;  %v4598_v52 = vsel %vm1313_vm8, 0.0, %v1332_v30  ;;  %v1390_v63 = vsel %vm1313_vm8, %v1333_v54, 0.0 }
 0x39d   : > { %1790 = vrot.lane.b32.xlu0 %v4465_v35, %s5135_s1  ;;  %v1441_v29 = vrot.slane %v4598_v52, 1  ;;  %v1442_v17 = vrot.slane %v4593_v57, 1  ;;  %v1444_v21 = vrot.slane %v1390_v63, 1  ;;  %v1546_v61 = vrot.slane %v4598_v52, 2 }
 0x39e   : > { %v4527_v20 = vpop.permute.xlu1 %1155 }
 0x39f   : > { %v4529_v31 = vpop.permute.xlu0 %1153  ;;  %v4614_v30 = vsel %vm1410_vm10, %v1441_v29, %v1442_v17  ;;  %v4630_v54 = vsel %vm1410_vm10, %v1442_v17, %v1444_v21  ;;  %v1547_v21 = vrot.slane %v4593_v57, 2  ;;  %v1248_v17 = vadd.f32 %v4284_v53, %v4482_v50 }
 0x3a0   : > { %1636 = vrot.lane.b32.xlu1 %v4516_v14, %s3253_s23 }
 0x3a1   : > { %1487 = vrot.lane.b32.xlu0 %v1438_v15, %s3251_s11  ;;  %v1288_v50 = vsel %vm4655_vm9, %v1248_v17, 0.0 }
 0x3a2   : > { %v4536_v51 = vpop.permute.xlu1 %1469 }
 0x3a3   : > { %v4538_v49 = vpop.permute.xlu0 %1467  ;;  %v1500_v53 = vadd.f32 %v4536_v51, %v4318_v4  ;;  %v1336_v4 = vrot.slane %v1288_v50, 7 }
 0x3a4   : > { %1845 = vrot.lane.b32.xlu1 %v1433_v12, %s3244_s24  ;;  %v1499_v29 = vadd.f32 %v4538_v49, %v4322_v3  ;;  %v1247_v3 = vadd.f32 %v4286_v5, %v4488_v62 }
 0x3a5   : > { %1744 = vrot.lane.b32.xlu0 %v1538_v26, %s3255_s6 }
 0x3a6   : > { %v4543_v0 = vpop.permute.xlu1 %1574  ;;  %v1287_v62 = vsel %vm4655_vm9, %v1247_v3, 0.0 }
 0x3a7   : > { %v4545_v28 = vpop.permute.xlu0 %1572  ;;  %v1605_v6 = vadd.f32 %v4543_v0, %v1500_v53  ;;  %v1335_v51 = vrot.slane %v1287_v62, 7 }
 0x3a8   : > { %1638 = vrot.lane.b32.xlu1 %v4512_v34, %s3253_s23  ;;  %v1604_v55 = vadd.f32 %v4545_v28, %v1499_v29  ;;  %v4664_v28 = vsel %vm1515_vm11, %v1546_v61, %v1547_v21 }
 0x3a9   : > { %1489 = vrot.lane.b32.xlu0 %v4550_v27, %s3251_s11 }
 0x3aa   : > { %v4554_v12 = vpop.permute.xlu1 %1620 }
 0x3ab   : > { %v4556_v60 = vpop.permute.xlu0 %1471  ;;  %v1652_v5 = vadd.f32 %v4554_v12, %v1604_v55 }
 0x3ac   : > { %1847 = vrot.lane.b32.xlu1 %v1435_v24, %s3244_s24  ;;  %v4574_v24 = vsel %vm1515_vm11, %v1541_v59, %v1542_v8 }
 0x3ad   : > { %1746 = vrot.lane.b32.xlu0 %v1540_v39, %s3255_s6 }
 0x3ae   : > { %v4566_v47 = vpop.permute.xlu1 %1622 }
 0x3af   : > { %v4570_v58 = vpop.permute.xlu0 %1473  ;;  %v1653_v12 = vadd.f32 %v4566_v47, %v1605_v6  ;;  %v4693_v6 = vsel %vm1313_vm8, %v1335_v51, %v1336_v4 }
 0x3b0   : > { %1693 = vrot.lane.b32.xlu1 %v1438_v15, %s3254_s9 }
 0x3b1   : > { %1592 = vrot.lane.b32.xlu0 %v4574_v24, %s3252_s21 }
 0x3b2   : > { %v1678_v45 = vpop.permute.xlu1 %1677 }
 0x3b3   : > { %v4578_v10 = vpop.permute.xlu0 %1576  ;;  %v1709_v32 = vadd.f32 %v1678_v45, %v1652_v5 }
 0x3b4   : > { %1900 = vrot.lane.b32.xlu1 %v1538_v26, %s3256_s22 }
 0x3b5   : > { %1792 = vrot.lane.b32.xlu0 %v4516_v14, %s5135_s1 }
 0x3b6   : > { %v4583_v18 = vpop.permute.xlu1 %1679 }
 0x3b7   : > { %v4585_v59 = vpop.permute.xlu0 %1578  ;;  %v1710_v0 = vadd.f32 %v4583_v18, %v1653_v12  ;;  %v4699_v18 = vsel %vm1313_vm8, 0.0, %v1335_v51  ;;  %v1391_v51 = vsel %vm1313_vm8, %v1336_v4, 0.0 }
 0x3b8   : > { %1695 = vrot.lane.b32.xlu1 %v4550_v27, %s3254_s9 }
 0x3b9   : > { %1594 = vrot.lane.b32.xlu0 %v4590_v43, %s3252_s21 }
 0x3ba   : > { %v4600_v26 = vpop.permute.xlu1 %1734 }
 0x3bb   : > { %v1733_v46 = vpop.permute.xlu0 %1732 }
 0x3bc   : > { %1902 = vrot.lane.b32.xlu1 %v1540_v39, %s3256_s22  ;;  %v1764_v55 = vadd.f32 %v1733_v46, %v1709_v32  ;;  %v1765_v32 = vadd.f32 %v4600_v26, %v1710_v0  ;;  %v1446_v26 = vrot.slane %v4699_v18, 1  ;;  %v1449_v0 = vrot.slane %v1391_v51, 1 }
 0x3bd   : > { %1794 = vrot.lane.b32.xlu0 %v4512_v34, %s5135_s1  ;;  %v1549_v34 = vrot.slane %v1390_v63, 2 }
 0x3be   : > { %v4607_v8 = vpop.permute.xlu1 %1624 }
 0x3bf   : > { %v4609_v7 = vpop.permute.xlu0 %1626  ;;  %v4690_v63 = vsel %vm1515_vm11, %v1547_v21, %v1549_v34  ;;  %v1447_v21 = vrot.slane %v4693_v6, 1 }
 0x3c0   : > { %1640 = vrot.lane.b32.xlu1 %v4598_v52, %s3253_s23 }
 0x3c1   : > { %1491 = vrot.lane.b32.xlu0 %v4614_v30, %s3251_s11  ;;  %v4734_v4 = vsel %vm1410_vm10, %v1447_v21, %v1449_v0 }
 0x3c2   : > { %v1783_v39 = vpop.permute.xlu1 %1782 }
 0x3c3   : > { %v1781_v40 = vpop.permute.xlu0 %1780 }
 0x3c4   : > { %1849 = vrot.lane.b32.xlu1 %v1438_v15, %s3244_s24  ;;  %v1812_v45 = vadd.f32 %v1781_v40, %v1764_v55  ;;  %v3257_v40 = vmov 0.0  }
 0x3c5   : > { %1748 = vrot.lane.b32.xlu0 %v4574_v24, %s3255_s6 }
 0x3c6   : > { %v4623_v2 = vpop.permute.xlu1 %1477 }
 0x3c7   : > { %v4625_v19 = vpop.permute.xlu0 %1475 }
 0x3c8   : > { %1642 = vrot.lane.b32.xlu1 %v4593_v57, %s3253_s23  ;;  %v1503_v11 = vadd.f32 %v4625_v19, %v4386_v37 }
 0x3c9   : > { %1493 = vrot.lane.b32.xlu0 %v4630_v54, %s3251_s11 }
 0x3ca   : > { %v4634_v15 = vpop.permute.xlu1 %1681 }
 0x3cb   : > { %v4638_v22 = vpop.permute.xlu0 %1580 }
 0x3cc   : > { %1851 = vrot.lane.b32.xlu1 %v4550_v27, %s3244_s24  ;;  %v1813_v27 = vadd.f32 %v1783_v39, %v1765_v32 }
 0x3cd   : > { %1750 = vrot.lane.b32.xlu0 %v4590_v43, %s3255_s6 }
 0x3ce   : > { %v4651_v49 = vpop.permute.xlu1 %1582 }
 0x3cf   : > { %v4659_v23 = vpop.permute.xlu0 %1683 }
 0x3d0   : > { %1697 = vrot.lane.b32.xlu1 %v4614_v30, %s3254_s9 }
 0x3d1   : > { %1596 = vrot.lane.b32.xlu0 %v4664_v28, %s3252_s21 }
 0x3d2   : > { %v1838_v29 = vpop.permute.xlu1 %1837 }
 0x3d3   : > { %v4676_v61 = vpop.permute.xlu0 %1736  ;;  %v1869_v47 = vadd.f32 %v1838_v29, %v1812_v45 }
 0x3d4   : > { %1904 = vrot.lane.b32.xlu1 %v4574_v24, %s3256_s22  ;;  %v4701_v24 = vsel %vm1940_vm12, 1.0, %v3257_v40 }
 0x3d5   : > { %1796 = vrot.lane.b32.xlu0 %v4598_v52, %s5135_s1 }
 0x3d6   : > { %v1840_v17 = vpop.permute.xlu1 %1839 }
 0x3d7   : > { %v4685_v3 = vpop.permute.xlu0 %1738  ;;  %v1870_v5 = vadd.f32 %v1840_v17, %v1813_v27 }
 0x3d8   : > { %1699 = vrot.lane.b32.xlu1 %v4630_v54, %s3254_s9 }
 0x3d9   : > { %1598 = vrot.lane.b32.xlu0 %v4690_v63, %s3252_s21 }
 0x3da   : > { %v1893_v46 = vpop.permute.xlu1 %1892 }
 0x3db   : > { %v1924_v53 = vadd.f32 %v1893_v46, %v1869_v47  ;;  %v4703_v34 = vpop.permute.xlu0 %1784  ;;  %v1168_v46 = vadd.s32 8, %v4288_v1 }
 0x3dc   : > { %1906 = vrot.lane.b32.xlu1 %v4590_v43, %s3256_s22  ;;  %v4717_v43 = vsel %vm1410_vm10, %v1446_v26, %v1447_v21  ;;  %v1552_v26 = vrot.slane %v4693_v6, 2 }
 0x3dd   : > { %1798 = vrot.lane.b32.xlu0 %v4593_v57, %s5135_s1  ;;  %v1942_v50 = vadd.f32 %v4701_v24, %v1924_v53  ;;  %v1551_v53 = vrot.slane %v4699_v18, 2  ;;  %vm1179_vm13 = vcmp.ge.s32.totalorder %v1168_v46, 0  ;;  %vm1189_vm14 = vcmp.lt.s32.totalorder %v1168_v46, 16 }
 0x3de   : > { %v1895_v62 = vpop.permute.xlu1 %1894  ;;  %vm1199_vm15 = vmand %vm1179_vm13, %vm1189_vm14 }
 0x3df   : > { %v1925_v29 = vadd.f32 %v1895_v62, %v1870_v5  ;;  %2727 = vmatprep.mubr.f32.mxu1 %v1942_v50  ;;  %v4712_v39 = vpop.permute.xlu0 %1786  ;;  %vm4768_vm0 = vmand %vm1170_vm2, %vm1199_vm15 }
 0x3e0   : > { %1644 = vrot.lane.b32.xlu1 %v4699_v18, %s3253_s23 }
 0x3e1   : > { %v1943_v12 = vadd.f32 %v4701_v24, %v1925_v29  ;;  %1495 = vrot.lane.b32.xlu0 %v4717_v43, %s3251_s11 }
 0x3e2   : > { %v4723_v55 = vpop.permute.xlu1 %1628 }
 0x3e3   : > { %2728 = vmatmul.mubr.f32.vlgmr.msra.gmra.mrb[0].mxu1 %v1943_v12  ;;  %v1480_v17 = vpop.permute.xlu0 %1479  ;;  %v1249_v12 = vadd.f32 %v4507_v13, %v4499_v38 }
 0x3e4   : > { %1853 = vrot.lane.b32.xlu1 %v4614_v30, %s3244_s24  ;;  %v1505_v47 = vadd.f32 %v1480_v17, %v4425_v25 }
 0x3e5   : > { %1752 = vrot.lane.b32.xlu0 %v4664_v28, %s3255_s6  ;;  %v1289_v13 = vsel %vm4768_vm0, %v1249_v12, 0.0 }
 0x3e6   : > { %v4729_v45 = vpop.permute.xlu1 %1630 }
 0x3e7   : > { %v1482_v32 = vpop.permute.xlu0 %1481 }
 0x3e8   : > { %1646 = vrot.lane.b32.xlu1 %v4693_v6, %s3253_s23  ;;  %v1506_v21 = vadd.f32 %v1482_v32, %v4430_v42  ;;  %v1554_v42 = vrot.slane %v1391_v51, 2  ;;  %v1501_v51 = vadd.f32 %v4556_v60, %v4345_v41 }
 0x3e9   : > { %1497 = vrot.lane.b32.xlu0 %v4734_v4, %s3251_s11  ;;  %s3133_s11 = sshll.u32 %s3258_s18, 4  ;;  %s3134_s11 = int_to_ptr.vmem [resolvable:$false] %s3133_s11 }
 0x3ea   : > { %v4739_v40 = vpop.permute.xlu1 %1685  ;;  %v4781_v38 = vsel %vm1515_vm11, %v1552_v26, %v1554_v42  ;;  %v1606_v46 = vadd.f32 %v4578_v10, %v1501_v51  ;;  %p3136_p2 = scmp.lt.s32.totalorder %s5020_s28, %s3134_s11 }
 0x3eb   : > { %v1585_v30 = vpop.permute.xlu0 %1584 }
 0x3ec   : > { %v1610_v27 = vadd.f32 %v1585_v30, %v1505_v47  ;;  %1855 = vrot.lane.b32.xlu1 %v4630_v54, %s3244_s24  ;;  %v4754_v54 = vsel %vm1515_vm11, %v1551_v53, %v1552_v26  ;;  %v1338_v53 = vrot.slane %v1289_v13, 7  ;;  %v1654_v26 = vadd.f32 %v4607_v8, %v1606_v46 }
 0x3ed   : > { %1754 = vrot.lane.b32.xlu0 %v4690_v63, %s3255_s6 }
 0x3ee   : > { %v4749_v5 = vpop.permute.xlu1 %1687 }
 0x3ef   : > { %v1587_v25 = vpop.permute.xlu0 %1586 }
 0x3f0   : > { %v1611_v50 = vadd.f32 %v1587_v25, %v1506_v21  ;;  %1701 = vrot.lane.b32.xlu1 %v4717_v43, %s3254_s9  ;;  %v1711_v21 = vadd.f32 %v4634_v15, %v1654_v26  ;;  %v4803_v25 = vsel %vm1313_vm8, 0.0, %v1338_v53 }
 0x3f1   : > { %1600 = vrot.lane.b32.xlu0 %v4754_v54, %s3252_s21  ;;  %v1670_v51 = vrot.slane %v4803_v25, 1 }
 0x3f2   : > { %v1842_v62 = vpop.permute.xlu1 %1841 }
 0x3f3   : > { %v4758_v29 = vpop.permute.xlu0 %1740 }
 0x3f4   : > { %1908 = vrot.lane.b32.xlu1 %v4664_v28, %s3256_s22  ;;  %v1250_v28 = vadd.f32 %v4505_v16, %v4495_v56 }
 0x3f5   : > { %1800 = vrot.lane.b32.xlu0 %v4699_v18, %s5135_s1 }
 0x3f6   : > { %v1633_v0 = vpop.permute.xlu1 %1632  ;;  %v1290_v16 = vsel %vm4768_vm0, %v1250_v28, 0.0 }
 0x3f7   : > { %v4772_v32 = vadd.f32 %v1633_v0, %v1610_v27  ;;  %v4774_v47 = vpop.permute.xlu0 %1742  ;;  %v1339_v60 = vrot.slane %v1290_v16, 7 }
 0x3f8   : > { %1703 = vrot.lane.b32.xlu1 %v4734_v4, %s3254_s9 }
 0x3f9   : > { %1602 = vrot.lane.b32.xlu0 %v4781_v38, %s3252_s21  ;;  %v4816_v0 = vsel %vm1313_vm8, %v1338_v53, %v1339_v60  ;;  %v1169_v53 = vadd.s32 9, %v4288_v1  ;;  %s3135_s21 = scalar_lea.vmem %s3134_s11, 4096 }
 0x3fa   : > { %v1635_v30 = vpop.permute.xlu1 %1634  ;;  %p3137_p10 = scmp.lt.s32.totalorder %s3135_s21, %s3129_s10 }
 0x3fb   : > { %v4790_v27 = vadd.f32 %v1635_v30, %v1611_v50  ;;  %v1484_v56 = vpop.permute.xlu0 %1483  ;;  %v1502_v50 = vadd.f32 %v4570_v58, %v4341_v48  ;;  %v1671_v30 = vrot.slane %v4816_v0, 1  ;;  %vm1180_vm1 = vcmp.ge.s32.totalorder %v1169_v53, 0 }
 0x3fc   : > { %1910 = vrot.lane.b32.xlu1 %v4690_v63, %s3256_s22  ;;  %v1766_v63 = vadd.f32 %v4676_v61, %v1711_v21  ;;  %v1507_v8 = vadd.f32 %v1484_v56, %v4462_v36  ;;  %vm1190_vm3 = vcmp.lt.s32.totalorder %v1169_v53, 16  ;;  %p3138_p1 = por %p3137_p10, %p3136_p2 }
 0x3fd   : > { %1802 = vrot.lane.b32.xlu0 %v4693_v6, %s5135_s1  ;;  %v1607_v15 = vadd.f32 %v4585_v59, %v1502_v50  ;;  %vm1200_vm4 = vmand %vm1180_vm1, %vm1190_vm3 }
 0x3fe   : > { %v1844_v41 = vpop.permute.xlu1 %1843  ;;  %v1814_v12 = vadd.f32 %v4703_v34, %v1766_v63  ;;  %v1392_v34 = vsel %vm1313_vm8, %v1339_v60, 0.0  ;;  %v1725_v63 = vrot.slane %v4803_v25, 2  ;;  %vm4865_vm5 = vmand %vm1170_vm2, %vm1200_vm4  ;;  %p3139_p12 = pnand %p3138_p1, %p3132_p8 }
 0x3ff   : > { %v1486_v10 = vpop.permute.xlu0 %1485  ;;  %v1655_v48 = vadd.f32 %v4609_v7, %v1607_v15  ;;  %v1673_v46 = vrot.slane %v1392_v34, 1  ;;  %v1252_v15 = vadd.f32 %v4527_v20, %v4518_v9 }
 0x400   : > { %1756 = vrot.lane.b32.xlu1 %v4754_v54, %s3255_s6  ;;  %v1871_v58 = vadd.f32 %v1842_v62, %v1814_v12  ;;  %v1251_v12 = vadd.f32 %v4529_v31, %v4520_v44 }
 0x401   : > { %1648 = vrot.lane.b32.xlu0 %v4803_v25, %s3253_s23  ;;  %v1712_v61 = vadd.f32 %v4659_v23, %v1655_v48  ;;  %v1508_v23 = vadd.f32 %v1486_v10, %v4465_v35  ;;  %v1674_v10 = vsel %vm1410_vm10, %v1671_v30, %v1673_v46  ;;  %v1292_v44 = vsel %vm4865_vm5, %v1252_v15, 0.0 }
 0x402   : > { %v4811_v42 = vpop.permute.xlu1 %1689  ;;  %v1291_v20 = vsel %vm4865_vm5, %v1251_v12, 0.0 }
 0x403   : > { %v1589_v17 = vpop.permute.xlu0 %1588  ;;  %v1767_v7 = vadd.f32 %v4685_v3, %v1712_v61  ;;  %v1672_v3 = vsel %vm1410_vm10, %v1670_v51, %v1671_v30  ;;  %v1341_v61 = vrot.slane %v1291_v20, 7 }
 0x404   : > { %v1612_v28 = vadd.f32 %v1589_v17, %v1507_v8  ;;  %1650 = vrot.lane.b32.xlu1 %v4816_v0, %s3253_s23  ;;  %v1726_v8 = vrot.slane %v4816_v0, 2 }
 0x405   : > { %1857 = vrot.lane.b32.xlu0 %v4717_v43, %s3244_s24  ;;  %v1815_v56 = vadd.f32 %v4712_v39, %v1767_v7  ;;  %v1383_v51 = vsel %vm1313_vm8, 0.0, %v1341_v61  ;;  %v1504_v7 = vadd.f32 %v4623_v2, %v4392_v33 }
 0x406   : > { %v1897_v36 = vpop.permute.xlu1 %1896  ;;  %v1727_v9 = vsel %vm1515_vm11, %v1725_v63, %v1726_v8 }
 0x407   : > { %v1926_v59 = vadd.f32 %v1897_v36, %v1871_v58  ;;  %v4824_v13 = vpop.permute.xlu0 %1788  ;;  %v1342_v58 = vrot.slane %v1292_v44, 7  ;;  %v1609_v46 = vadd.f32 %v4651_v49, %v1504_v7 }
 0x408   : > { %1859 = vrot.lane.b32.xlu1 %v4734_v4, %s3244_s24  ;;  %v1872_v4 = vadd.f32 %v1844_v41, %v1815_v56 }
 0x409   : > { %v1944_v62 = vadd.f32 %v4701_v24, %v1926_v59  ;;  %1758 = vrot.lane.b32.xlu0 %v4781_v38, %s3255_s6  ;;  %v1343_v30 = vsel %vm1313_vm8, %v1341_v61, %v1342_v58  ;;  %v1657_v2 = vadd.f32 %v4729_v45, %v1609_v46 }
 0x40a   : > { %v4836_v43 = vpop.permute.xlu1 %1691  ;;  %v1831_v53 = vrot.slane %v1343_v30, 1 }
 0x40b   : > { %2730 = vmatprep.mubr.f32.mxu1 %v1944_v62  ;;  %v1591_v16 = vpop.permute.xlu0 %1590 }
 0x40c   : > { %v1613_v26 = vadd.f32 %v1591_v16, %v1508_v23  ;;  %1804 = vrot.lane.b32.xlu1 %v4803_v25, %s5135_s1 }
 0x40d   : > { %1705 = vrot.lane.b32.xlu0 %v1672_v3, %s3254_s9 }
 0x40e   : > { %v1899_v60 = vpop.permute.xlu1 %1898 }
 0x40f   : > { %v1927_v35 = vadd.f32 %v1899_v60, %v1872_v4  ;;  %v4844_v21 = vpop.permute.xlu0 %1790  ;;  %v1714_v4 = vadd.f32 %v4749_v5, %v1657_v2  ;;  %v1886_v60 = vrot.slane %v1343_v30, 2 }
 0x410   : > { %1707 = vrot.lane.b32.xlu1 %v1674_v10, %s3254_s9 }
 0x411   : > { %v1945_v1 = vadd.f32 %v4701_v24, %v1927_v35  ;;  %1912 = vrot.lane.b32.xlu0 %v4754_v54, %s3256_s22 }
 0x412   : > { %v1637_v39 = vpop.permute.xlu1 %1636 }
 0x413   : > { %v4851_v41 = vadd.f32 %v1637_v39, %v1612_v28  ;;  %2731 = vmatmul.mubr.f32.gmra.mrb[2].mxu1 %v1945_v1  ;;  %v1488_v50 = vpop.permute.xlu0 %1487  ;;  %v1728_v28 = vrot.slane %v1392_v34, 2  ;;  %v1769_v39 = vadd.f32 %v4774_v47, %v1714_v4 }
 0x414   : > { %1914 = vrot.lane.b32.xlu1 %v4781_v38, %s3256_s22  ;;  %v1608_v38 = vadd.f32 %v4638_v22, %v1503_v11  ;;  %v1393_v22 = vsel %vm1313_vm8, %v1342_v58, 0.0  ;;  %v1509_v62 = vadd.f32 %v1488_v50, %v4516_v14  ;;  %v5181_v50 = vld [vmem:[#allocation24_spill] sm:$0xff] }
 0x415   : > { %1806 = vrot.lane.b32.xlu0 %v4816_v0, %s5135_s1  ;;  %v1729_v36 = vsel %vm1515_vm11, %v1726_v8, %v1728_v28  ;;  %v1833_v23 = vrot.slane %v1393_v22, 1  ;;  %v1817_v5 = vadd.f32 %v4844_v21, %v1769_v39 }
 0x416   : > { %v1846_v25 = vpop.permute.xlu1 %1845  ;;  %v1656_v59 = vadd.f32 %v4723_v55, %v1608_v38 }
 0x417   : > { %v4869_v17 = vpop.permute.xlu0 %1744 }
 0x418   : > { %1861 = vrot.lane.b32.xlu1 %v1672_v3, %s3244_s24  ;;  %v1713_v19 = vadd.f32 %v4739_v40, %v1656_v59 }
 0x419   : > { %1760 = vrot.lane.b32.xlu0 %v1727_v9, %s3255_s6 }
 0x41a   : > { %v1639_v31 = vpop.permute.xlu1 %1638  ;;  %v1768_v55 = vadd.f32 %v4758_v29, %v1713_v19  ;;  %v1888_v29 = vrot.slane %v1393_v22, 2 }
 0x41b   : > { %v4881_v0 = vadd.f32 %v1639_v31, %v1613_v26  ;;  %v1490_v48 = vpop.permute.xlu0 %1489  ;;  %v1830_v26 = vrot.slane %v1383_v51, 1 }
 0x41c   : > { %1863 = vrot.lane.b32.xlu1 %v1674_v10, %s3244_s24  ;;  %v1816_v56 = vadd.f32 %v4824_v13, %v1768_v55  ;;  %v1834_v13 = vsel %vm1410_vm10, %v1831_v53, %v1833_v23  ;;  %v1885_v10 = vrot.slane %v1383_v51, 2  ;;  %v1510_v63 = vadd.f32 %v1490_v48, %v5181_v50 }
 0x41d   : > { %1762 = vrot.lane.b32.xlu0 %v1729_v36, %s3255_s6  ;;  %v1832_v1 = vsel %vm1410_vm10, %v1830_v26, %v1831_v53  ;;  %v1889_v12 = vsel %vm1515_vm11, %v1886_v60, %v1888_v29 }
 0x41e   : > { %v1848_v34 = vpop.permute.xlu1 %1847  ;;  %v1873_v33 = vadd.f32 %v1846_v25, %v1816_v56  ;;  %v1887_v25 = vsel %vm1515_vm11, %v1885_v10, %v1886_v60  ;;  %v1716_v56 = vadd.f32 %v4836_v43, %v4790_v27 }
 0x41f   : > { %v4888_v37 = vpop.permute.xlu0 %1746  ;;  %v1874_v47 = vadd.f32 %v1848_v34, %v1817_v5  ;;  %v1715_v34 = vadd.f32 %v4811_v42, %v4772_v32 }
 0x420   : > { %1916 = vrot.lane.b32.xlu1 %v1727_v9, %s3256_s22  ;;  %v1771_v26 = vadd.f32 %v4888_v37, %v1716_v56 }
 0x421   : > { %1808 = vrot.lane.b32.xlu0 %v1383_v51, %s5135_s1  ;;  %v1770_v22 = vadd.f32 %v4869_v17, %v1715_v34 }
 0x422   : > { %v4899_v40 = vpop.permute.xlu1 %1693 }
 0x423   : > { %v1593_v16 = vpop.permute.xlu0 %1592 }
 0x424   : > { %v1614_v3 = vadd.f32 %v1593_v16, %v1509_v62  ;;  %1918 = vrot.lane.b32.xlu1 %v1729_v36, %s3256_s22 }
 0x425   : > { %1810 = vrot.lane.b32.xlu0 %v1343_v30, %s5135_s1  ;;  %s2564_s1 = sshll.u32 %s3217_s15, 4 }
 0x426   : > { %v1901_v14 = vpop.permute.xlu1 %1900 }
 0x427   : > { %v1928_v35 = vadd.f32 %v1901_v14, %v1873_v33  ;;  %v1793_v49 = vpop.permute.xlu0 %1792 }
 0x428   : > { %1867 = vrot.lane.b32.xlu1 %v1834_v13, %s3244_s24  ;;  %v1818_v7 = vadd.f32 %v1793_v49, %v1770_v22  ;;  %v1717_v13 = vadd.f32 %v4899_v40, %v4851_v41 }
 0x429   : > { %v1946_v45 = vadd.f32 %v4701_v24, %v1928_v35  ;;  %1865 = vrot.lane.b32.xlu0 %v1832_v1, %s3244_s24  ;;  %s2558_s24 = sshll.u32 %s3221_s16, 5 }
 0x42a   : > { %v4914_v8 = vpop.permute.xlu1 %1695  ;;  %s2277_s4 = sadd.s32 %s2564_s1, %s2558_s24 }
 0x42b   : > { %2733 = vmatprep.mubr.f32.mxu1 %v1946_v45  ;;  %v1595_v15 = vpop.permute.xlu0 %1594  ;;  %s2559_s25 = sshll.u32 %s2277_s4, 7 }
 0x42c   : > { %v1615_v54 = vadd.f32 %v1595_v15, %v1510_v63  ;;  %1922 = vrot.lane.b32.xlu1 %v1889_v12, %s3256_s22  ;;  %v1718_v15 = vadd.f32 %v4914_v8, %v4881_v0  ;;  %s5018_s16 = scalar_lea.hbm %s5082_s3, %s2559_s25 }
 0x42d   : > { %1920 = vrot.lane.b32.xlu0 %v1887_v25, %s3256_s22 }
 0x42e   : > { %v1903_v28 = vpop.permute.xlu1 %1902 }
 0x42f   : > { %v1929_v9 = vadd.f32 %v1903_v28, %v1874_v47  ;;  %v1795_v44 = vpop.permute.xlu0 %1794 }
 0x430   : > { %v1819_v17 = vadd.f32 %v1795_v44, %v1771_v26 }
 0x431   : > { %v1947_v20 = vadd.f32 %v4701_v24, %v1929_v9 }
 0x432   : > { %v1641_v11 = vpop.permute.xlu1 %1640 }
 0x433   : > { %v4922_v31 = vadd.f32 %v1641_v11, %v1614_v3  ;;  %2734 = vmatmul.mubr.f32.gmra.mrb[4].mxu1 %v1947_v20  ;;  %v1492_v21 = vpop.permute.xlu0 %1491 }
 0x434   : > { %v1511_v51 = vadd.f32 %v1492_v21, %v4598_v52 }
 0x436   : > { %v1850_v38 = vpop.permute.xlu1 %1849 }
 0x437   : > { %v1749_v48 = vpop.permute.xlu0 %1748  ;;  %v1875_v23 = vadd.f32 %v1850_v38, %v1818_v7 }
 0x438   : > { %v1772_v1 = vadd.f32 %v1749_v48, %v1717_v13 }
 0x43a   : > { %v1643_v58 = vpop.permute.xlu1 %1642 }
 0x43b   : > { %v4924_v36 = vadd.f32 %v1643_v58, %v1615_v54  ;;  %v4926_v61 = vpop.permute.xlu0 %1493 }
 0x43e   : > { %v1852_v59 = vpop.permute.xlu1 %1851 }
 0x43f   : > { %v1751_v19 = vpop.permute.xlu0 %1750  ;;  %v1876_v3 = vadd.f32 %v1852_v59, %v1819_v17 }
 0x440   : > { %v1773_v25 = vadd.f32 %v1751_v19, %v1718_v15 }
 0x442   : > { %v1698_v30 = vpop.permute.xlu1 %1697 }
 0x443   : > { %v1597_v55 = vpop.permute.xlu0 %1596  ;;  %v1719_v34 = vadd.f32 %v1698_v30, %v4922_v31  ;;  %v1512_v31 = vadd.f32 %v4926_v61, %v4593_v57 }
 0x444   : > { %v4932_v62 = vadd.f32 %v1597_v55, %v1511_v51 }
 0x446   : > { %v1905_v46 = vpop.permute.xlu1 %1904 }
 0x447   : > { %v1930_v16 = vadd.f32 %v1905_v46, %v1875_v23  ;;  %v1797_v53 = vpop.permute.xlu0 %1796 }
 0x448   : > { %v1820_v45 = vadd.f32 %v1797_v53, %v1772_v1 }
 0x449   : > { %v1948_v32 = vadd.f32 %v4701_v24, %v1930_v16 }
 0x44a   : > { %v1700_v42 = vpop.permute.xlu1 %1699 }
 0x44b   : > { %2736 = vmatprep.mubr.f32.mxu1 %v1948_v32  ;;  %v4938_v52 = vpop.permute.xlu0 %1598  ;;  %v1720_v51 = vadd.f32 %v1700_v42, %v4924_v36 }
 0x44e   : > { %v1907_v2 = vpop.permute.xlu1 %1906 }
 0x44f   : > { %v1931_v33 = vadd.f32 %v1907_v2, %v1876_v3  ;;  %v1799_v29 = vpop.permute.xlu0 %1798 }
 0x450   : > { %v1821_v9 = vadd.f32 %v1799_v29, %v1773_v25  ;;  %v1617_v29 = vadd.f32 %v4938_v52, %v1512_v31 }
 0x451   : > { %v1949_v14 = vadd.f32 %v4701_v24, %v1931_v33 }
 0x452   : > { %v1645_v4 = vpop.permute.xlu1 %1644 }
 0x453   : > { %2737 = vmatmul.mubr.f32.gmra.mrb[6].mxu1 %v1949_v14  ;;  %v4941_v27 = vpop.permute.xlu0 %1495  ;;  %v1664_v36 = vadd.f32 %v1645_v4, %v4932_v62 }
 0x454   : > { %v1513_v62 = vadd.f32 %v4941_v27, %v4699_v18 }
 0x456   : > { %v1854_v43 = vpop.permute.xlu1 %1853 }
 0x457   : > { %v1753_v60 = vpop.permute.xlu0 %1752  ;;  %v1877_v63 = vadd.f32 %v1854_v43, %v1820_v45 }
 0x458   : > { %v1774_v19 = vadd.f32 %v1753_v60, %v1719_v34 }
 0x45a   : > { %v1647_v37 = vpop.permute.xlu1 %1646 }
 0x45b   : > { %v1498_v35 = vpop.permute.xlu0 %1497  ;;  %v1665_v60 = vadd.f32 %v1647_v37, %v1617_v29 }
 0x45e   : > { %v1856_v49 = vpop.permute.xlu1 %1855 }
 0x45f   : > { %v1755_v10 = vpop.permute.xlu0 %1754  ;;  %v1878_v40 = vadd.f32 %v1856_v49, %v1821_v9 }
 0x460   : > { %v1775_v23 = vadd.f32 %v1755_v10, %v1720_v51  ;;  %v1514_v10 = vadd.f32 %v1498_v35, %v4693_v6 }
 0x462   : > { %v1702_v39 = vpop.permute.xlu1 %1701 }
 0x463   : > { %v4945_v50 = vpop.permute.xlu0 %1600  ;;  %v1721_v14 = vadd.f32 %v1702_v39, %v1664_v36 }
 0x464   : > { %v1618_v37 = vadd.f32 %v4945_v50, %v1513_v62  ;;  %v3003_v62 = vld [vmem:[%s3515_s7 + $0x49] sm:$0xff] }
 0x466   : > { %v1909_v5 = vpop.permute.xlu1 %1908 }
 0x467   : > { %v1932_v12 = vadd.f32 %v1909_v5, %v1877_v63  ;;  %v1801_v54 = vpop.permute.xlu0 %1800 }
 0x468   : > { %v1822_v55 = vadd.f32 %v1801_v54, %v1774_v19 }
 0x469   : > { %v1950_v47 = vadd.f32 %v4701_v24, %v1932_v12 }
 0x46a   : > { %v1704_v28 = vpop.permute.xlu1 %1703 }
 0x46b   : > { %2739 = vmatprep.mubr.f32.mxu1 %v1950_v47  ;;  %v1603_v41 = vpop.permute.xlu0 %1602  ;;  %v1722_v1 = vadd.f32 %v1704_v28, %v1665_v60 }
 0x46c   : > { %v1619_v5 = vadd.f32 %v1603_v41, %v1514_v10 }
 0x46e   : > { %v1911_v44 = vpop.permute.xlu1 %1910 }
 0x46f   : > { %v1933_v20 = vadd.f32 %v1911_v44, %v1878_v40  ;;  %v1803_v11 = vpop.permute.xlu0 %1802 }
 0x470   : > { %v1823_v16 = vadd.f32 %v1803_v11, %v1775_v23 }
 0x471   : > { %v1951_v21 = vadd.f32 %v4701_v24, %v1933_v20 }
 0x472   : > { %v1757_v38 = vpop.permute.xlu1 %1756 }
 0x473   : > { %2740 = vmatmul.mubr.f32.gmra.mrb[8].mxu1 %v1951_v21  ;;  %v1649_v48 = vpop.permute.xlu0 %1648  ;;  %v1776_v49 = vadd.f32 %v1757_v38, %v1721_v14 }
 0x474   : > { %v1666_v35 = vadd.f32 %v1649_v48, %v1618_v37 }
 0x476   : > { %v1651_v58 = vpop.permute.xlu1 %1650 }
 0x477   : > { %v1858_v0 = vpop.permute.xlu0 %1857  ;;  %v1667_v15 = vadd.f32 %v1651_v58, %v1619_v5 }
 0x478   : > { %v1879_v46 = vadd.f32 %v1858_v0, %v1822_v55 }
 0x47a   : > { %v1860_v8 = vpop.permute.xlu1 %1859 }
 0x47b   : > { %v1759_v59 = vpop.permute.xlu0 %1758  ;;  %v1880_v32 = vadd.f32 %v1860_v8, %v1823_v16 }
 0x47c   : > { %v1777_v57 = vadd.f32 %v1759_v59, %v1722_v1  ;;  %v5184_v1 = vld [vmem:[#allocation21_spill] sm:$0xff] }
 0x47e   : > { %v1805_v22 = vpop.permute.xlu1 %1804 }
 0x47f   : > { %v1706_v7 = vpop.permute.xlu0 %1705  ;;  %v1824_v45 = vadd.f32 %v1805_v22, %v1776_v49 }
 0x480   : > { %v1723_v40 = vadd.f32 %v1706_v7, %v1666_v35 }
 0x482   : > { %v1708_v56 = vpop.permute.xlu1 %1707 }
 0x483   : > { %v1913_v53 = vpop.permute.xlu0 %1912  ;;  %v1724_v54 = vadd.f32 %v1708_v56, %v1667_v15 }
 0x484   : > { %v1934_v26 = vadd.f32 %v1913_v53, %v1879_v46  ;;  %v5182_v53 = vld [vmem:[#allocation19_spill] sm:$0xff] }
 0x486   : > { %v1952_v17 = vadd.f32 %v4701_v24, %v1934_v26  ;;  %v1915_v3 = vpop.permute.xlu1 %1914 }
 0x487   : > { %v1935_v2 = vadd.f32 %v1915_v3, %v1880_v32  ;;  %v1807_v33 = vpop.permute.xlu0 %1806  ;;  %v5183_v32 = vld [vmem:[#allocation20_spill] sm:$0xff]  ;;  %v3000_v3 = vld [vmem:[%s3515_s7 + $0x39] sm:$0xff] }
 0x488   : > { %2742 = vmatprep.mubr.f32.mxu1 %v1952_v17  ;;  %v1825_v52 = vadd.f32 %v1807_v33, %v1777_v57  ;;  %v3001_v33 = vld [vmem:[%s3515_s7 + $0x31] sm:$0xff] }
 0x489   : > { %v1953_v30 = vadd.f32 %v4701_v24, %v1935_v2  ;;  %v3002_v57 = vld [vmem:[%s3515_s7 + $0x51] sm:$0xff] }
 0x48a   : > { %v1862_v42 = vpop.permute.xlu1 %1861 }
 0x48b   : > { %2743 = vmatmul.mubr.f32.gmra.mrb[10].mxu1 %v1953_v30  ;;  %v1761_v43 = vpop.permute.xlu0 %1760  ;;  %v1881_v61 = vadd.f32 %v1862_v42, %v1824_v45 }
 0x48c   : > { %v1778_v44 = vadd.f32 %v1761_v43, %v1723_v40 }
 0x48e   : > { %v1864_v13 = vpop.permute.xlu1 %1863 }
 0x48f   : > { %v1763_v63 = vpop.permute.xlu0 %1762  ;;  %v1882_v25 = vadd.f32 %v1864_v13, %v1825_v52 }
 0x490   : > { %v1779_v28 = vadd.f32 %v1763_v63, %v1724_v54  ;;  %v5185_v63 = vld [vmem:[#allocation22_spill] sm:$0xff] }
 0x492   : > { %v1917_v4 = vpop.permute.xlu1 %1916 }
 0x493   : > { %v1936_v39 = vadd.f32 %v1917_v4, %v1881_v61  ;;  %v1809_v12 = vpop.permute.xlu0 %1808 }
 0x494   : > { %v1826_v21 = vadd.f32 %v1809_v12, %v1778_v44  ;;  %v3005_v44 = vld [vmem:[%s3515_s7 + $0x61] sm:$0xff] }
 0x495   : > { %v1954_v6 = vadd.f32 %v4701_v24, %v1936_v39 }
 0x496   : > { %v1919_v47 = vpop.permute.xlu1 %1918 }
 0x497   : > { %v1937_v9 = vadd.f32 %v1919_v47, %v1882_v25  ;;  %2745 = vmatprep.mubr.f32.mxu1 %v1954_v6  ;;  %v1811_v41 = vpop.permute.xlu0 %1810 }
 0x498   : > { %v1827_v27 = vadd.f32 %v1811_v41, %v1779_v28  ;;  %v5186_v28 = vld [vmem:[#allocation23_spill] sm:$0xff] }
 0x499   : > { %v1955_v18 = vadd.f32 %v4701_v24, %v1937_v9  ;;  %v5187_v41 = vld [vmem:[#allocation27_spill] sm:$0xff] }
 0x49a   : > { %v1868_v20 = vpop.permute.xlu1 %1867 }
 0x49b   : > { %2746 = vmatmul.mubr.f32.gmra.mrb[12].mxu1 %v1955_v18  ;;  %v1866_v11 = vpop.permute.xlu0 %1865  ;;  %v1884_v50 = vadd.f32 %v1868_v20, %v1827_v27  ;;  %v3004_v18 = vld [vmem:[%s3515_s7 + $0x69] sm:$0xff] }
 0x49c   : > { %v1883_v38 = vadd.f32 %v1866_v11, %v1826_v21 }
 0x49e   : > { %v1923_v58 = vpop.permute.xlu1 %1922 }
 0x49f   : > { %v1939_v0 = vadd.f32 %v1923_v58, %v1884_v50  ;;  %v1921_v8 = vpop.permute.xlu0 %1920 }
 0x4a0   : > { %v1938_v48 = vadd.f32 %v1921_v8, %v1883_v38 }
 0x4a1   : > { %v1957_v34 = vadd.f32 %v4701_v24, %v1939_v0 }
 0x4a2   : > { %v1956_v59 = vadd.f32 %v4701_v24, %v1938_v48 }
 0x4a4   : > { %2748 = vmatprep.mubr.f32.mxu1 %v1956_v59 }
 0x4a5   : > { %2749 = vmatmul.mubr.f32.gmra.mrb[14].mxu1 %v1957_v34 }
 0x4b6   : > { %v2729_v19 = vpop.f32.mrb[0].mxu1 }
 0x4b7   : > { %v2540_v22 = vmul.f32 -1.442695, %v2729_v19  ;;  %v2040_v51 = vpop.f32.mrb[1].mxu1  ;;  %v5188_v19 = vld [vmem:[#allocation28_spill] sm:$0xff] }
 0x4b8   : > { %v2539_v7 = vmul.f32 -1.442695, %v2040_v51  ;;  %v5189_v51 = vld [vmem:[#allocation29_spill] sm:$0xff] }
 0x4b9   : > { %2936 = vpow2.f32 %v2540_v22 }
 0x4ba   : > { %2938 = vpow2.f32 %v2539_v7 }
 0x4c3   : > { %v2937_v55 = vpop.eup %2936 }
 0x4c4   : > { %v2939_v23 = vpop.eup %2938  ;;  %v2168_v46 = vadd.f32 1.0, %v2937_v55  ;;  %v3006_v55 = vld [vmem:[%s3515_s7 + $0x81] sm:$0xff] }
 0x4c5   : > { %v2167_v56 = vadd.f32 1.0, %v2939_v23 }
 0x4c6   : > { %2940 = vrcp.f32 %v2168_v46  ;;  %v3007_v46 = vld [vmem:[%s3515_s7 + $0x79] sm:$0xff] }
 0x4c7   : > { %2942 = vrcp.f32 %v2167_v56 }
 0x4d0   : > { %v2941_v16 = vpop.eup %2940 }
 0x4d1   : > { %v2943_v24 = vpop.eup %2942  ;;  %v2216_v26 = vmul.f32 %v2941_v16, %v5182_v53 }
 0x4d2   : > { %v2215_v17 = vmul.f32 %v2943_v24, %v5183_v32 }
 0x4d3   : > { %v2232_v2 = vadd.f32 %v3000_v3, %v2216_v26 }
 0x4d4   : > { %v2231_v31 = vadd.f32 %v3001_v33, %v2215_v17 }
 0x4d5   : > { %2248 = vst [vmem:[%s3513_s20 + $0x8] sm:$0xff] %v2232_v2 }
 0x4d6   : > { %2247 = vst [vmem:[%s3513_s20] sm:$0xff] %v2231_v31 }
 0x4e6   : > { %v2732_v36 = vpop.f32.mrb[2].mxu1 }
 0x4e7   : > { %v2542_v30 = vmul.f32 -1.442695, %v2732_v36  ;;  %v2050_v42 = vpop.f32.mrb[3].mxu1 }
 0x4e8   : > { %v2541_v29 = vmul.f32 -1.442695, %v2050_v42 }
 0x4e9   : > { %2944 = vpow2.f32 %v2542_v30 }
 0x4ea   : > { %2946 = vpow2.f32 %v2541_v29 }
 0x4f3   : > { %v2945_v14 = vpop.eup %2944 }
 0x4f4   : > { %v2947_v43 = vpop.eup %2946  ;;  %v2170_v60 = vadd.f32 1.0, %v2945_v14  ;;  %v5190_v14 = vld [vmem:[#allocation30_spill] sm:$0xff] }
 0x4f5   : > { %v2169_v49 = vadd.f32 1.0, %v2947_v43 }
 0x4f6   : > { %2948 = vrcp.f32 %v2170_v60  ;;  %v5191_v60 = vld [vmem:[#allocation31_spill] sm:$0xff] }
 0x4f7   : > { %2950 = vrcp.f32 %v2169_v49 }
 0x500   : > { %v2949_v13 = vpop.eup %2948 }
 0x501   : > { %v2951_v10 = vpop.eup %2950  ;;  %v2218_v45 = vmul.f32 %v2949_v13, %v5184_v1  ;;  %v3008_v13 = vld [vmem:[%s3515_s7 + $0x99] sm:$0xff]  ;;  %v3009_v1 = vld [vmem:[%s3515_s7 + $0x91] sm:$0xff] }
 0x502   : > { %v2217_v5 = vmul.f32 %v2951_v10, %v5185_v63 }
 0x503   : > { %v2234_v61 = vadd.f32 %v3002_v57, %v2218_v45 }
 0x504   : > { %v2233_v4 = vadd.f32 %v3003_v62, %v2217_v5 }
 0x505   : > { %2250 = vst [vmem:[%s3513_s20 + $0x18] sm:$0xff] %v2234_v61 }
 0x506   : > { %2249 = vst [vmem:[%s3513_s20 + $0x10] sm:$0xff] %v2233_v4  ;;  %v2735_v15 = vpop.f32.mrb[4].mxu1 }
 0x507   : > { %v2544_v52 = vmul.f32 -1.442695, %v2735_v15  ;;  %v2060_v39 = vpop.f32.mrb[5].mxu1 }
 0x508   : > { %v2543_v12 = vmul.f32 -1.442695, %v2060_v39 }
 0x509   : > { %2952 = vpow2.f32 %v2544_v52 }
 0x50a   : > { %2954 = vpow2.f32 %v2543_v12 }
 0x513   : > { %v2953_v37 = vpop.eup %2952 }
 0x514   : > { %v2955_v54 = vpop.eup %2954  ;;  %v2172_v25 = vadd.f32 1.0, %v2953_v37 }
 0x515   : > { %v2171_v6 = vadd.f32 1.0, %v2955_v54  ;;  %v5192_v54 = vld [vmem:[#allocation32_spill] sm:$0xff] }
 0x516   : > { %2956 = vrcp.f32 %v2172_v25 }
 0x517   : > { %2958 = vrcp.f32 %v2171_v6 }
 0x520   : > { %v2957_v35 = vpop.eup %2956 }
 0x521   : > { %v2959_v47 = vpop.eup %2958  ;;  %v2220_v9 = vmul.f32 %v2957_v35, %v5186_v28 }
 0x522   : > { %v2219_v40 = vmul.f32 %v2959_v47, %v5187_v41  ;;  %v5193_v47 = vld [vmem:[#allocation33_spill] sm:$0xff] }
 0x523   : > { %v2236_v27 = vadd.f32 %v3004_v18, %v2220_v9 }
 0x524   : > { %v2235_v20 = vadd.f32 %v3005_v44, %v2219_v40  ;;  %v3010_v40 = vld [vmem:[%s3515_s7 + $0xb1] sm:$0xff]  ;;  %v3011_v44 = vld [vmem:[%s3515_s7 + $0xa9] sm:$0xff] }
 0x525   : > { %2252 = vst [vmem:[%s3513_s20 + $0x28] sm:$0xff] %v2236_v27 }
 0x526   : > { %2251 = vst [vmem:[%s3513_s20 + $0x20] sm:$0xff] %v2235_v20  ;;  %v2738_v11 = vpop.f32.mrb[6].mxu1 }
 0x527   : > { %v2546_v21 = vmul.f32 -1.442695, %v2738_v11  ;;  %v2070_v50 = vpop.f32.mrb[7].mxu1 }
 0x528   : > { %v2545_v38 = vmul.f32 -1.442695, %v2070_v50 }
 0x529   : > { %2960 = vpow2.f32 %v2546_v21 }
 0x52a   : > { %2962 = vpow2.f32 %v2545_v38 }
 0x533   : > { %v2961_v58 = vpop.eup %2960 }
 0x534   : > { %v2963_v0 = vpop.eup %2962  ;;  %v2174_v8 = vadd.f32 1.0, %v2961_v58 }
 0x535   : > { %v2173_v48 = vadd.f32 1.0, %v2963_v0 }
 0x536   : > { %2964 = vrcp.f32 %v2174_v8 }
 0x537   : > { %2966 = vrcp.f32 %v2173_v48 }
 0x540   : > { %v2965_v59 = vpop.eup %2964 }
 0x541   : > { %v2967_v34 = vpop.eup %2966  ;;  %v2222_v22 = vmul.f32 %v2965_v59, %v5188_v19  ;;  %v5194_v59 = vld [vmem:[#allocation34_spill] sm:$0xff]  ;;  %v5195_v19 = vld [vmem:[#allocation35_spill] sm:$0xff] }
 0x542   : > { %v2221_v7 = vmul.f32 %v2967_v34, %v5189_v51  ;;  %v3012_v51 = vld [vmem:[%s3515_s7 + $0xc9] sm:$0xff] }
 0x543   : > { %v2238_v23 = vadd.f32 %v3006_v55, %v2222_v22  ;;  %v3013_v55 = vld [vmem:[%s3515_s7 + $0xc1] sm:$0xff] }
 0x544   : > { %v2237_v56 = vadd.f32 %v3007_v46, %v2221_v7 }
 0x545   : > { %2254 = vst [vmem:[%s3513_s20 + $0x38] sm:$0xff] %v2238_v23 }
 0x546   : > { %2253 = vst [vmem:[%s3513_s20 + $0x30] sm:$0xff] %v2237_v56  ;;  %v2741_v16 = vpop.f32.mrb[8].mxu1 }
 0x547   : > { %v2548_v24 = vmul.f32 -1.442695, %v2741_v16  ;;  %v2080_v53 = vpop.f32.mrb[9].mxu1  ;;  %v5196_v16 = vld [vmem:[#allocation36_spill] sm:$0xff] }
 0x548   : > { %v2547_v26 = vmul.f32 -1.442695, %v2080_v53  ;;  %v5197_v53 = vld [vmem:[#allocation37_spill] sm:$0xff] }
 0x549   : > { %2968 = vpow2.f32 %v2548_v24 }
 0x54a   : > { %2970 = vpow2.f32 %v2547_v26 }
 0x553   : > { %v2969_v32 = vpop.eup %2968 }
 0x554   : > { %v2971_v17 = vpop.eup %2970  ;;  %v2176_v3 = vadd.f32 1.0, %v2969_v32  ;;  %v3014_v32 = vld [vmem:[%s3515_s7 + $0xe1] sm:$0xff] }
 0x555   : > { %v2175_v2 = vadd.f32 1.0, %v2971_v17 }
 0x556   : > { %2972 = vrcp.f32 %v2176_v3  ;;  %v3015_v3 = vld [vmem:[%s3515_s7 + $0xd9] sm:$0xff] }
 0x557   : > { %2974 = vrcp.f32 %v2175_v2 }
 0x55e   : > { %v2744_v33 = vpop.f32.mrb[10].mxu1 }
 0x55f   : > { %v2550_v31 = vmul.f32 -1.442695, %v2744_v33  ;;  %v2090_v36 = vpop.f32.mrb[11].mxu1 }
 0x560   : > { %v2973_v30 = vpop.eup %2972  ;;  %v2549_v42 = vmul.f32 -1.442695, %v2090_v36 }
 0x561   : > { %v2975_v29 = vpop.eup %2974  ;;  %v2224_v43 = vmul.f32 %v2973_v30, %v5190_v14  ;;  %2976 = vpow2.f32 %v2550_v31 }
 0x562   : > { %v2223_v49 = vmul.f32 %v2975_v29, %v5191_v60  ;;  %2978 = vpow2.f32 %v2549_v42 }
 0x563   : > { %v2240_v10 = vadd.f32 %v3008_v13, %v2224_v43 }
 0x564   : > { %v2239_v45 = vadd.f32 %v3009_v1, %v2223_v49 }
 0x565   : > { %2256 = vst [vmem:[%s3513_s20 + $0x48] sm:$0xff] %v2240_v10 }
 0x566   : > { %2255 = vst [vmem:[%s3513_s20 + $0x40] sm:$0xff] %v2239_v45 }
 0x56b   : > { %v2977_v63 = vpop.eup %2976 }
 0x56c   : > { %v2979_v5 = vpop.eup %2978  ;;  %v2178_v57 = vadd.f32 1.0, %v2977_v63 }
 0x56d   : > { %v2177_v61 = vadd.f32 1.0, %v2979_v5 }
 0x56e   : > { %2980 = vrcp.f32 %v2178_v57  ;;  %v2747_v62 = vpop.f32.mrb[12].mxu1 }
 0x56f   : > { %2982 = vrcp.f32 %v2177_v61  ;;  %v2552_v4 = vmul.f32 -1.442695, %v2747_v62  ;;  %v2100_v15 = vpop.f32.mrb[13].mxu1 }
 0x570   : > { %v2551_v52 = vmul.f32 -1.442695, %v2100_v15 }
 0x571   : > { %2984 = vpow2.f32 %v2552_v4 }
 0x572   : > { %2986 = vpow2.f32 %v2551_v52 }
 0x578   : > { %v2981_v39 = vpop.eup %2980  ;;  %v2750_v12 = vpop.f32.mrb[14].mxu1 }
 0x579   : > { %v2983_v37 = vpop.eup %2982  ;;  %v2226_v25 = vmul.f32 %v2981_v39, %v5192_v54  ;;  %v2554_v6 = vmul.f32 -1.442695, %v2750_v12  ;;  %v2110_v35 = vpop.f32.mrb[15].mxu1 }
 0x57a   : > { %v2225_v28 = vmul.f32 %v2983_v37, %v5193_v47  ;;  %v2553_v9 = vmul.f32 -1.442695, %v2110_v35 }
 0x57b   : > { %v2985_v41 = vpop.eup %2984  ;;  %v2242_v18 = vadd.f32 %v3010_v40, %v2226_v25  ;;  %2988 = vpow2.f32 %v2554_v6 }
 0x57c   : > { %v2987_v27 = vpop.eup %2986  ;;  %v2241_v20 = vadd.f32 %v3011_v44, %v2225_v28  ;;  %v2180_v11 = vadd.f32 1.0, %v2985_v41  ;;  %2990 = vpow2.f32 %v2553_v9 }
 0x57d   : > { %2258 = vst [vmem:[%s3513_s20 + $0x58] sm:$0xff] %v2242_v18  ;;  %v2179_v21 = vadd.f32 1.0, %v2987_v27 }
 0x57e   : > { %2257 = vst [vmem:[%s3513_s20 + $0x50] sm:$0xff] %v2241_v20  ;;  %2992 = vrcp.f32 %v2180_v11 }
 0x57f   : > { %2994 = vrcp.f32 %v2179_v21 }
 0x585   : > { %v2989_v50 = vpop.eup %2988 }
 0x586   : > { %v2991_v38 = vpop.eup %2990  ;;  %v2182_v58 = vadd.f32 1.0, %v2989_v50 }
 0x587   : > { %v2181_v0 = vadd.f32 1.0, %v2991_v38 }
 0x588   : > { %v2993_v8 = vpop.eup %2992  ;;  %2996 = vrcp.f32 %v2182_v58 }
 0x589   : > { %v2995_v48 = vpop.eup %2994  ;;  %v2228_v34 = vmul.f32 %v2993_v8, %v5194_v59  ;;  %2998 = vrcp.f32 %v2181_v0 }
 0x58a   : > { %v2227_v22 = vmul.f32 %v2995_v48, %v5195_v19 }
 0x58b   : > { %v2244_v7 = vadd.f32 %v3012_v51, %v2228_v34 }
 0x58c   : > { %v2243_v23 = vadd.f32 %v3013_v55, %v2227_v22 }
 0x58d   : > { %2260 = vst [vmem:[%s3513_s20 + $0x68] sm:$0xff] %v2244_v7 }
 0x58e   : > { %2259 = vst [vmem:[%s3513_s20 + $0x60] sm:$0xff] %v2243_v23 }
 0x592   : > { %v2997_v46 = vpop.eup %2996 }
 0x593   : > { %v2999_v56 = vpop.eup %2998  ;;  %v2230_v24 = vmul.f32 %v2997_v46, %v5196_v16 }
 0x594   : > { %v2229_v26 = vmul.f32 %v2999_v56, %v5197_v53 }
 0x595   : > { %v2246_v17 = vadd.f32 %v3014_v32, %v2230_v24 }
 0x596   : > { %v2245_v2 = vadd.f32 %v3015_v3, %v2229_v26 }
 0x597   : > { %2262 = vst [vmem:[%s3513_s20 + $0x78] sm:$0xff] %v2246_v17 }
 0x598   : > { %2261 = vst [vmem:[%s3513_s20 + $0x70] sm:$0xff] %v2245_v2 }
 0x599   : > { %3142 = shalt.err (!%p3139_p12)
}
 0x59a   : > { %s3143_s20 = scalar_lea.hbm %s5018_s16, 2048  ;;  %s3147_s9 = scalar_lea.hbm %s5082_s3, 8192 }
 0x59b   : > { %p3144_p4 = scmp.ne.s32.totalorder %s5018_s16, %s3143_s20  ;;  %p3148_p7 = scmp.lt.u32.totalorder %s5018_s16, %s5082_s3 }
 0x59c   : > { %p3149_p9 = scmp.lt.u32.totalorder %s3147_s9, %s3143_s20  ;;  %p3151_p6 = scmp.lt.u32.totalorder %s3143_s20, %s5018_s16 }
 0x59d   : > { %p3145_p5 = pnand %p3144_p4, %p5199_p11 }
 0x59e   : > { %p3150_p3 = por %p3149_p9, %p3148_p7 }
 0x59f   : > { %p3146_p0 = pneg %p3145_p5 }
 0x5a0   : > { %p3152_p13 = por %p3151_p6, %p3150_p3 }
 0x5a2   : > { %p3153_p8 = pnand %p3152_p13, %p3146_p0 }
 0x5a4   : > { %3156 = shalt.err (!%p3153_p8)
}
 0x5a5   : > { %s3259_s1 = smov 128   ;;  %s3260_s24 = smov 8  }
 0x5a6   : > { %2827 = dma.vmem_to_hbm [thread:$0]  (%p5199_p11), %s5020_s28, 2048, %s5018_s16, %s5027_s29, %s3259_s1, %s3259_s1, %s3260_s24  }
 0x5a7 PF: > { %p2846_p2 = scmp.ge.s32.totalorder %s3233_s19, 2  ;;  %s2295_s4 = sand.u32 1, %s3205_s12  }
 0x5a8   : > { %p5200_p10 = scmp.ne.s32.totalorder %s5126_s27, 0  ;;  %s2296_s25 = scalar_lea.sflag [#allocation6], %s2295_s4 }
 0x5aa   : > { %p2837_p1 = pnand %p2846_p2, %p5200_p10 }
 0x5ac   : > { %3200 = dma.done.wait (!%p2837_p1), %s2296_s25, 2048  }
 0x5ad   : > { %3202 = vsyncadd (!%p2837_p1), %s2296_s25, 4294965248  ;;  %s18_s19 = sadd.s32 1, %s3233_s19   ;;  %s5201_s16 = sld [smem:[#allocation16_spill]] }
 0x5ae   : > { %p15_p12 = scmp.ge.s32.totalorder %s18_s19, 6   ;;  %s5202_s26 = sld [smem:[#allocation17_spill]] }
 0x5af   : > { %s5203_s18 = sld [smem:[#allocation18_spill]]  ;;  %s5204_s12 = smov %s3209_s13 }
 0x5b0   : > { %s5205_s13 = smov %s3213_s14  ;;  %s5206_s14 = smov %s3360_s5 }
 0x5b1   : > { %s5207_s15 = smov %s3225_s17  ;;  %17 = sbr.rel (!%p15_p12) target bundleno = 9 (0x9), region = 86 }
 0x5b4   : > { %s5208_s17 = smov %s5202_s26 }
 0x5b8   :  { %2301 = vsyncpa [#allocation5], 1 }
 0x5b9   :  { %2303 = vsyncpa [#allocation5 + $0x1], 1 }
 0x5ba   :  { %2304 = vsyncpa [#allocation8], 1 }
 0x5bb   :  { %2305 = vsyncpa [#allocation6], 1 }
 0x5bc   :  { %2307 = vsyncpa [#allocation6 + $0x1], 1 }
 0x5bd   :  { %2308 = vsyncmov [#allocation3] }
 0x5c0   :  { %s2309_s27 = vpop.sfrf %2308 }
 0x5c1   :  { %p2562_p11 = scmp.ne.s32.totalorder %s2309_s27, 0 }
 0x5c3   :  { %2313 = shalt.err (%p2562_p11)  }
 0x5c4   :  { %2315 = vsyncmov [#allocation3 + $0x1] }
 0x5c7   :  { %s2316_s5 = vpop.sfrf %2315 }
 0x5c8   :  { %p2563_p4 = scmp.ne.s32.totalorder %s2316_s5, 0 }
 0x5ca   :  { %2320 = shalt.err (%p2563_p4)  }

</bundles_post_ra>
